<compile_context>
chip_gen: v7x
topology: tpu7x:2x2x1
jax: 0.10.0
libtpu: 0.0.40
codegen_flags: <defaults>
</compile_context>

<pallas_src>
import functools

import jax
import jax.numpy as jnp
from jax.experimental import pallas as pl
from jax.experimental.pallas import tpu as pltpu

# Model dims (from Baseline.__init__)
O_DIM = 2048   # input feature dim
M_DIM = 128    # embedding dim
L_DIM = 128    # attention hidden dim
C1, C2 = 128, 64  # classifier hidden dims


def _round_up(x, m):
    return (x + m - 1) // m * m


def _attn_pool_kernel(x_ref,
                      w1_ref, b1_ref,
                      wvu_ref, bvu_ref,
                      wa_ref, ba_ref,
                      acc_out_ref, den_out_ref, max_out_ref,
                      max_sc, den_sc, acc_sc,
                      *, n_valid, tile_n, k_steps):
    s = pl.program_id(1)   # N-split index (megacore sharding when B is small)
    k = pl.program_id(2)   # N-tile step within this split (reduction axis)

    # --- init accumulators on the first N-tile of this (bag, split) ---
    @pl.when(k == 0)
    def _():
        max_sc[...] = jnp.full_like(max_sc, -jnp.inf)
        den_sc[...] = jnp.zeros_like(den_sc)
        acc_sc[...] = jnp.zeros_like(acc_sc)

    # Global tile index. It may point past the last valid tile for ragged
    # splits: the x BlockSpec clamps the DMA and every row here gets masked.
    t = s * k_steps + k
    row = t * tile_n + jax.lax.broadcasted_iota(jnp.int32, (tile_n, 1), 0)
    valid = row < n_valid                                                   # (TN, 1)

    # feature_extractor_part1: cast the native-dtype x tile to bf16 *inside*
    # the kernel (no extra HBM pass), f32 MXU accumulation.
    x_bf = x_ref[...].astype(jnp.bfloat16)
    h = jnp.dot(x_bf, w1_ref[...],
                preferred_element_type=jnp.float32) + b1_ref[...]          # (TN, M)
    # Scrub padded / out-of-range rows: partial-block contents are undefined.
    h = jnp.where(valid, h, 0.0)

    # Gated attention branches: single fused bf16 MXU pass over [wv | wu].
    g = jnp.dot(h.astype(jnp.bfloat16), wvu_ref[...],
                preferred_element_type=jnp.float32) + bvu_ref[...]         # (TN, 2L)
    gated = jnp.tanh(g[:, :L_DIM]) * jax.nn.sigmoid(g[:, L_DIM:])          # (TN, L)

    # attention logits: VPU mul + lane reduce (avoids a wasteful 1-lane matmul)
    scores = jnp.sum(gated * wa_ref[...], axis=-1, keepdims=True) + ba_ref[...]
    scores = jnp.where(valid, scores, -jnp.inf)                            # (TN, 1)

    # --- online softmax accumulation across this split's N-tiles ---
    m_prev = max_sc[...]                                                   # (1, 1)
    m_new = jnp.maximum(m_prev, jnp.max(scores, axis=0, keepdims=True))    # (1, 1)
    # Guard: a fully-masked split keeps m_new == -inf; avoid inf-inf = NaN.
    m_safe = jnp.where(m_new == -jnp.inf, jnp.zeros_like(m_new), m_new)
    scale = jnp.exp(m_prev - m_safe)                                       # (1, 1)
    p = jnp.exp(scores - m_safe)                                           # (TN, 1); masked -> 0

    den_sc[...] = scale * den_sc[...] + jnp.sum(p, axis=0, keepdims=True)
    acc_sc[...] = scale * acc_sc[...] + jnp.sum(p * h, axis=0, keepdims=True)
    max_sc[...] = m_new

    # --- finalize: emit this (bag, split)'s softmax partials, lane-dense acc ---
    @pl.when(k == pl.num_programs(2) - 1)
    def _():
        acc_out_ref[...] = acc_sc[...]
        den_out_ref[...] = den_sc[...]
        max_out_ref[...] = max_sc[...]


def baseline_forward(x, params, *, tile_n=1024, n_split=None):
    """Full Baseline forward: Pallas attention pooling + batched XLA classifier."""
    (w1, b1, wv, bv, wu, bu, wa, ba,
     wc1, bc1, wc2, bc2, wc3, bc3) = params
    B, N, O = x.shape
    assert O == O_DIM

    # Instance tile: multiple of 16, never larger than the bag (no jnp.pad of x;
    # the last block is partial and masked inside the kernel).
    if N >= 16:
        tn = max(16, min(_round_up(tile_n, 16), (N // 16) * 16))
    else:
        tn = _round_up(N, 8)
    n_blocks = pl.cdiv(N, tn)

    # v7x: when B is too small to fill both TensorCores, shard the N reduction.
    if n_split is None:
        n_split = min(2, n_blocks) if B == 1 else 1
    n_split = max(1, int(n_split))
    k_steps = pl.cdiv(n_blocks, n_split)

    # Small one-time weight prep (bf16 MXU operands, fused [wv|wu]).
    w1_bf = w1.astype(jnp.bfloat16)
    wvu_bf = jnp.concatenate([wv, wu], axis=1).astype(jnp.bfloat16)   # (M, 2L)
    bvu = jnp.concatenate([bv, bu], axis=1)                           # (1, 2L)
    wa_t = wa.reshape(1, L_DIM)                                       # (1, L)
    weights = (w1_bf, b1, wvu_bf, bvu, wa_t, ba)

    def x_map(b, s, k, _ks=k_steps, _last=n_blocks - 1):
        # Clamp so a ragged split never issues a fully out-of-bounds DMA; the
        # kernel masks those rows by global row index anyway.
        return (b, jnp.minimum(s * _ks + k, _last), 0)

    in_specs = [pl.BlockSpec((None, tn, O_DIM), x_map)]
    in_specs += [pl.BlockSpec(w.shape, lambda b, s, k: (0, 0)) for w in weights]

    def out_map(b, s, k, _ns=n_split):
        return (b * _ns + s, 0, 0)

    out_specs = [pl.BlockSpec((None, 1, M_DIM), out_map),   # sum(p*h) partial
                 pl.BlockSpec((None, 1, 1), out_map),       # softmax denom partial
                 pl.BlockSpec((None, 1, 1), out_map)]       # running max partial
    out_shape = (jax.ShapeDtypeStruct((B * n_split, 1, M_DIM), jnp.float32),
                 jax.ShapeDtypeStruct((B * n_split, 1, 1), jnp.float32),
                 jax.ShapeDtypeStruct((B * n_split, 1, 1), jnp.float32))

    kernel = functools.partial(_attn_pool_kernel,
                               n_valid=N, tile_n=tn, k_steps=k_steps)

    flops = 2 * B * n_blocks * tn * (O_DIM * M_DIM + M_DIM * 2 * L_DIM + L_DIM)
    transcendentals = B * n_blocks * tn * (2 * L_DIM + 2)
    bytes_accessed = (int(x.size) * x.dtype.itemsize
                      + int(w1_bf.size) * 2 + int(wvu_bf.size) * 2
                      + sum(int(w.size) * 4 for w in (b1, bvu, wa_t, ba))
                      + B * n_split * (M_DIM + 2) * 4)

    acc_p, den_p, mx_p = pl.pallas_call(
        kernel,
        out_shape=out_shape,
        grid_spec=pltpu.PrefetchScalarGridSpec(
            num_scalar_prefetch=0,
            grid=(B, n_split, k_steps),
            in_specs=in_specs,
            out_specs=out_specs,
            scratch_shapes=[
                pltpu.VMEM((1, 1), jnp.float32),      # running max
                pltpu.VMEM((1, 1), jnp.float32),      # running softmax denom
                pltpu.VMEM((1, M_DIM), jnp.float32),  # running sum(p * h)
            ]),
        compiler_params=pltpu.CompilerParams(
            dimension_semantics=("parallel", "parallel", "arbitrary"),
            # ~2 x (f32 x tile) + weights + temps stays well under 48 MiB at
            # tn=1024; safe on v7x's 64 MiB VMEM, headroom on v5e/v6e (128 MiB).
            vmem_limit_bytes=48 * 1024 * 1024),
        cost_estimate=pl.CostEstimate(
            flops=flops,
            transcendentals=transcendentals,
            bytes_accessed=bytes_accessed),
    )(x, *weights)

    # Merge per-split online-softmax partials (tiny log-sum-exp combine in XLA).
    acc_p = acc_p.reshape(B, n_split, M_DIM)
    den_p = den_p.reshape(B, n_split, 1)
    mx_p = mx_p.reshape(B, n_split, 1)
    m_glob = jnp.max(mx_p, axis=1, keepdims=True)                 # (B, 1, 1)
    wgt = jnp.exp(mx_p - m_glob)                                  # masked split -> 0
    pooled = jnp.sum(wgt * acc_p, axis=1) / jnp.sum(wgt * den_p, axis=1)   # (B, M)

    # classifier: one batched, well-shaped matmul chain outside the kernel
    c = jax.nn.relu(pooled @ wc1 + bc1)
    c = jax.nn.relu(c @ wc2 + bc2)
    return c @ wc3 + bc3                                          # (B, 1)


def init_params(key):
    """Deterministic PyTorch-Linear-style init: U(-1/sqrt(fan_in), 1/sqrt(fan_in))."""
    ks = jax.random.split(key, 7)

    def lin(k, fan_in, fan_out):
        kw, kb = jax.random.split(k)
        bound = 1.0 / jnp.sqrt(fan_in)
        w = jax.random.uniform(kw, (fan_in, fan_out), jnp.float32, -bound, bound)
        b = jax.random.uniform(kb, (1, fan_out), jnp.float32, -bound, bound)
        return w, b

    w1, b1 = lin(ks[0], O_DIM, M_DIM)      # feature_extractor_part1
    wv, bv = lin(ks[1], M_DIM, L_DIM)      # attention_V
    wu, bu = lin(ks[2], M_DIM, L_DIM)      # attention_U
    wa, ba = lin(ks[3], L_DIM, 1)          # attention_weights
    wc1, bc1 = lin(ks[4], L_DIM, C1)       # classifier[0]
    wc2, bc2 = lin(ks[5], C1, C2)          # classifier[2]
    wc3, bc3 = lin(ks[6], C2, 1)           # classifier[4]
    return (w1, b1, wv, bv, wu, bu, wa, ba, wc1, bc1, wc2, bc2, wc3, bc3)


def baseline_ref(x, params):
    """Pure-JAX f32 reference, mirroring the PyTorch forward exactly."""
    (w1, b1, wv, bv, wu, bu, wa, ba, wc1, bc1, wc2, bc2, wc3, bc3) = params
    h = x @ w1 + b1                                         # (B, N, M)
    a = jnp.tanh(h @ wv + bv) * jax.nn.sigmoid(h @ wu + bu)
    a = a @ wa + ba                                         # (B, N, 1)
    a = jax.nn.softmax(a, axis=1)
    m = jnp.squeeze(jnp.swapaxes(a, 1, 2) @ h, axis=1)      # (B, M)
    c = jax.nn.relu(m @ wc1 + bc1)
    c = jax.nn.relu(c @ wc2 + bc2)
    return c @ wc3 + bc3                                    # (B, 1)


def baseline_ref_mixed(x, params):
    """Reference matching the kernel's precision policy (bf16 MXU inputs, f32 accum)."""
    (w1, b1, wv, bv, wu, bu, wa, ba, wc1, bc1, wc2, bc2, wc3, bc3) = params
    h = jnp.einsum('bno,om->bnm', x.astype(jnp.bfloat16), w1.astype(jnp.bfloat16),
                   preferred_element_type=jnp.float32) + b1
    h_bf = h.astype(jnp.bfloat16)
    a_v = jnp.tanh(jnp.einsum('bnm,ml->bnl', h_bf, wv.astype(jnp.bfloat16),
                              preferred_element_type=jnp.float32) + bv)
    a_u = jax.nn.sigmoid(jnp.einsum('bnm,ml->bnl', h_bf, wu.astype(jnp.bfloat16),
                                    preferred_element_type=jnp.float32) + bu)
    a = (a_v * a_u) @ wa + ba
    a = jax.nn.softmax(a, axis=1)
    m = jnp.squeeze(jnp.swapaxes(a, 1, 2) @ h, axis=1)
    c = jax.nn.relu(m @ wc1 + bc1)
    c = jax.nn.relu(c @ wc2 + bc2)
    return c @ wc3 + bc3


if __name__ == "__main__":
    key = jax.random.PRNGKey(0)
    k_x, k_p = jax.random.split(key)
    params = init_params(k_p)

    def check(y, x_in):
        y = jax.block_until_ready(y)
        y_mix = baseline_ref_mixed(x_in, params)   # same precision policy -> tight
        y_f32 = baseline_ref(x_in, params)         # full-f32 reference -> loose
        assert jnp.all(jnp.isfinite(y)), y
        assert jnp.allclose(y, y_mix, rtol=5e-3, atol=5e-3), (y, y_mix)
        assert jnp.allclose(y, y_f32, rtol=5e-2, atol=5e-2), (y, y_f32)

    # Small shapes: bags of 2048-d patch features; N deliberately not a tile
    # multiple so the partial-last-block masking path is exercised.
    B, N = 2, 200
    x = jax.random.normal(k_x, (B, N, O_DIM), dtype=jnp.float32)

    # 1) B=2, two N-steps: multi-step online softmax, single split.
    y = baseline_forward(x, params, tile_n=128)
    assert y.shape == (B, 1)
    check(y, x)

    # 2) default tile-size selection path (tile capped to the bag length).
    y = baseline_forward(x, params)
    check(y, x)

    # 3) B=1: N reduction sharded across 2 splits (megacore path on v7x) +
    #    log-sum-exp merge of the per-split partials.
    x1 = x[:1]
    y1 = baseline_forward(x1, params, tile_n=128)
    assert y1.shape == (1, 1)
    check(y1, x1)

    # 4) degenerate split (one split owns zero valid tiles): exercises the
    #    fully-masked-tile guard and the clamped x index_map.
    x2 = x[:1, :100]
    y2 = baseline_forward(x2, params, tile_n=96, n_split=3)
    check(y2, x2)

    print("KERNEL_OK")
</pallas_src>

<mosaic_0001>
module attributes {stable_mosaic.version = 11 : i64} {
  func.func @_attn_pool_kernel(%arg0: i32, %arg1: i32, %arg2: i32, %arg3: memref<1x128x2048xf32, #tpu.memory_space<vmem>>, %arg4: memref<2048x128xbf16, #tpu.memory_space<vmem>>, %arg5: memref<1x128xf32, #tpu.memory_space<vmem>>, %arg6: memref<128x256xbf16, #tpu.memory_space<vmem>>, %arg7: memref<1x256xf32, #tpu.memory_space<vmem>>, %arg8: memref<1x128xf32, #tpu.memory_space<vmem>>, %arg9: memref<1x1xf32, #tpu.memory_space<vmem>>, %arg10: memref<1x1x128xf32, #tpu.memory_space<vmem>>, %arg11: memref<1x1x1xf32, #tpu.memory_space<vmem>>, %arg12: memref<1x1x1xf32, #tpu.memory_space<vmem>>, %arg13: memref<1x1xf32, #tpu.memory_space<vmem>>, %arg14: memref<1x1xf32, #tpu.memory_space<vmem>>, %arg15: memref<1x128xf32, #tpu.memory_space<vmem>>) attributes {dimension_semantics = [#tpu.dimension_semantics<parallel>, #tpu.dimension_semantics<parallel>, #tpu.dimension_semantics<arbitrary>], iteration_bounds = array<i64: 2, 1, 2>, scalar_prefetch = 0 : i64, scratch_operands = 3 : i64, tpu.core_type = #tpu.core_type<tc>, window_params = [{transform_indices = @transform_0, window_bounds = array<i64: 1, 128, 2048>}, {pipeline_mode = #tpu.pipeline_mode<synchronous>, transform_indices = @transform_1, window_bounds = array<i64: 2048, 128>}, {pipeline_mode = #tpu.pipeline_mode<synchronous>, transform_indices = @transform_2, window_bounds = array<i64: 1, 128>}, {pipeline_mode = #tpu.pipeline_mode<synchronous>, transform_indices = @transform_3, window_bounds = array<i64: 128, 256>}, {pipeline_mode = #tpu.pipeline_mode<synchronous>, transform_indices = @transform_4, window_bounds = array<i64: 1, 256>}, {pipeline_mode = #tpu.pipeline_mode<synchronous>, transform_indices = @transform_5, window_bounds = array<i64: 1, 128>}, {pipeline_mode = #tpu.pipeline_mode<synchronous>, transform_indices = @transform_6, window_bounds = array<i64: 1, 1>}, {transform_indices = @transform_7, window_bounds = array<i64: 1, 1, 128>}, {transform_indices = @transform_8, window_bounds = array<i64: 1, 1, 1>}, {transform_indices = @transform_9, window_bounds = array<i64: 1, 1, 1>}]} {
    %c0_i32 = arith.constant 0 : i32
    %0 = arith.cmpi eq, %arg2, %c0_i32 : i32
    %1 = arith.extui %0 : i1 to i32
    %c0_i32_0 = arith.constant 0 : i32
    %2 = arith.cmpi ne, %1, %c0_i32_0 : i32
    scf.if %2 {
      %cst_38 = arith.constant 0xFF800000 : f32
      %80 = vector.broadcast %cst_38 : f32 to vector<1x1xf32>
      %c0_39 = arith.constant 0 : index
      %c0_40 = arith.constant 0 : index
      %81 = vector.load %arg13[%c0_39, %c0_40] : memref<1x1xf32, #tpu.memory_space<vmem>>, vector<1x1xf32>
      tpu.vector_store %arg13[%c0_39, %c0_40], %80 {strides = array<i32>} : memref<1x1xf32, #tpu.memory_space<vmem>>, vector<1x1xf32>,
      %cst_41 = arith.constant 0.000000e+00 : f32
      %82 = vector.broadcast %cst_41 : f32 to vector<1x1xf32>
      %c0_42 = arith.constant 0 : index
      %c0_43 = arith.constant 0 : index
      %83 = vector.load %arg14[%c0_42, %c0_43] : memref<1x1xf32, #tpu.memory_space<vmem>>, vector<1x1xf32>
      tpu.vector_store %arg14[%c0_42, %c0_43], %82 {strides = array<i32>} : memref<1x1xf32, #tpu.memory_space<vmem>>, vector<1x1xf32>,
      %cst_44 = arith.constant 0.000000e+00 : f32
      %84 = vector.broadcast %cst_44 : f32 to vector<1x128xf32>
      %c0_45 = arith.constant 0 : index
      %c0_46 = arith.constant 0 : index
      %85 = vector.load %arg15[%c0_45, %c0_46] : memref<1x128xf32, #tpu.memory_space<vmem>>, vector<1x128xf32>
      tpu.vector_store %arg15[%c0_45, %c0_46], %84 {strides = array<i32>} : memref<1x128xf32, #tpu.memory_space<vmem>>, vector<1x128xf32>,
    } else {
    }
    %c2_i32 = arith.constant 2 : i32
    %3 = arith.muli %arg1, %c2_i32 : i32
    %4 = arith.addi %3, %arg2 : i32
    %c128_i32 = arith.constant 128 : i32
    %5 = arith.muli %4, %c128_i32 : i32
    %6 = tpu.iota {dimensions = array<i32: 0>} : vector<128x1xi32>
    %7 = vector.broadcast %5 : i32 to vector<128x1xi32>
    %8 = arith.addi %7, %6 : vector<128x1xi32>
    %c200_i32 = arith.constant 200 : i32
    %9 = vector.broadcast %c200_i32 : i32 to vector<128x1xi32>
    %10 = arith.cmpi slt, %8, %9 : vector<128x1xi32>
    %c0 = arith.constant 0 : index
    %c0_1 = arith.constant 0 : index
    %c0_2 = arith.constant 0 : index
    %11 = vector.load %arg3[%c0, %c0_1, %c0_2] : memref<1x128x2048xf32, #tpu.memory_space<vmem>>, vector<1x128x2048xf32>
    %12 = vector.shape_cast %11 : vector<1x128x2048xf32> to vector<128x2048xf32>
    %13 = arith.truncf %12 : vector<128x2048xf32> to vector<128x2048xbf16>
    %c0_3 = arith.constant 0 : index
    %c0_4 = arith.constant 0 : index
    %14 = vector.load %arg4[%c0_3, %c0_4] : memref<2048x128xbf16, #tpu.memory_space<vmem>>, vector<2048x128xbf16>
    %cst = arith.constant dense<0.000000e+00> : vector<128x128xf32>
    %15 = tpu.matmul %13, %14, %cst {dimension_numbers = #tpu.dot_dimension_numbers<[1], [0], [0], [1], [0, 0, 1, 1], [], []>} : vector<128x2048xbf16>, vector<2048x128xbf16>, vector<128x128xf32> -> vector<128x128xf32>
    %c0_5 = arith.constant 0 : index
    %c0_6 = arith.constant 0 : index
    %16 = vector.load %arg5[%c0_5, %c0_6] : memref<1x128xf32, #tpu.memory_space<vmem>>, vector<1x128xf32>
    %17 = vector.broadcast %16 : vector<1x128xf32> to vector<128x128xf32>
    %18 = arith.addf %15, %17 : vector<128x128xf32>
    %cst_7 = arith.constant 0.000000e+00 : f32
    %19 = vector.shape_cast %10 : vector<128x1xi1> to vector<128x1xi1>
    %20 = vector.broadcast %19 : vector<128x1xi1> to vector<128x128xi1>
    %21 = vector.broadcast %cst_7 : f32 to vector<128x128xf32>
    %22 = arith.select %20, %18, %21 : vector<128x128xi1>, vector<128x128xf32>
    %23 = arith.truncf %22 : vector<128x128xf32> to vector<128x128xbf16>
    %c0_8 = arith.constant 0 : index
    %c0_9 = arith.constant 0 : index
    %24 = vector.load %arg6[%c0_8, %c0_9] : memref<128x256xbf16, #tpu.memory_space<vmem>>, vector<128x256xbf16>
    %cst_10 = arith.constant dense<0.000000e+00> : vector<128x256xf32>
    %25 = tpu.matmul %23, %24, %cst_10 {dimension_numbers = #tpu.dot_dimension_numbers<[1], [0], [0], [1], [0, 0, 1, 1], [], []>} : vector<128x128xbf16>, vector<128x256xbf16>, vector<128x256xf32> -> vector<128x256xf32>
    %c0_11 = arith.constant 0 : index
    %c0_12 = arith.constant 0 : index
    %26 = vector.load %arg7[%c0_11, %c0_12] : memref<1x256xf32, #tpu.memory_space<vmem>>, vector<1x256xf32>
    %27 = vector.broadcast %26 : vector<1x256xf32> to vector<128x256xf32>
    %28 = arith.addf %25, %27 : vector<128x256xf32>
    %29 = vector.extract_strided_slice %28 {offsets = [0, 0], sizes = [128, 128], strides = [1, 1]} : vector<128x256xf32> to vector<128x128xf32>
    %30 = math.tanh %29 : vector<128x128xf32>
    %31 = vector.extract_strided_slice %28 {offsets = [0, 128], sizes = [128, 128], strides = [1, 1]} : vector<128x256xf32> to vector<128x128xf32>
    %32 = arith.negf %31 : vector<128x128xf32>
    %33 = math.exp %32 : vector<128x128xf32>
    %cst_13 = arith.constant 1.000000e+00 : f32
    %34 = vector.broadcast %cst_13 : f32 to vector<128x128xf32>
    %35 = arith.addf %34, %33 : vector<128x128xf32>
    %36 = arith.divf %34, %35 : vector<128x128xf32>
    %37 = arith.mulf %30, %36 : vector<128x128xf32>
    %c0_14 = arith.constant 0 : index
    %c0_15 = arith.constant 0 : index
    %38 = vector.load %arg8[%c0_14, %c0_15] : memref<1x128xf32, #tpu.memory_space<vmem>>, vector<1x128xf32>
    %39 = vector.broadcast %38 : vector<1x128xf32> to vector<128x128xf32>
    %40 = arith.mulf %37, %39 : vector<128x128xf32>
    %cst_16 = arith.constant dense<0.000000e+00> : vector<128xf32>
    %41 = vector.multi_reduction <add>, %40, %cst_16 [1] : vector<128x128xf32> to vector<128xf32>
    %42 = vector.shape_cast %41 : vector<128xf32> to vector<128x1xf32>
    %c0_17 = arith.constant 0 : index
    %c0_18 = arith.constant 0 : index
    %43 = vector.load %arg9[%c0_17, %c0_18] : memref<1x1xf32, #tpu.memory_space<vmem>>, vector<1x1xf32>
    %44 = vector.broadcast %43 : vector<1x1xf32> to vector<128x1xf32>
    %45 = arith.addf %42, %44 : vector<128x1xf32>
    %cst_19 = arith.constant 0xFF800000 : f32
    %46 = vector.broadcast %cst_19 : f32 to vector<128x1xf32>
    %47 = arith.select %10, %45, %46 : vector<128x1xi1>, vector<128x1xf32>
    %c0_20 = arith.constant 0 : index
    %c0_21 = arith.constant 0 : index
    %48 = vector.load %arg13[%c0_20, %c0_21] : memref<1x1xf32, #tpu.memory_space<vmem>>, vector<1x1xf32>
    %cst_22 = arith.constant dense<0xFF800000> : vector<1xf32>
    %49 = vector.multi_reduction <maximumf>, %47, %cst_22 [0] : vector<128x1xf32> to vector<1xf32>
    %50 = vector.shape_cast %49 : vector<1xf32> to vector<1x1xf32>
    %51 = arith.maximumf %48, %50 : vector<1x1xf32>
    %cst_23 = arith.constant 0xFF800000 : f32
    %52 = vector.broadcast %cst_23 : f32 to vector<1x1xf32>
    %53 = arith.cmpf oeq, %51, %52 : vector<1x1xf32>
    %cst_24 = arith.constant 0.000000e+00 : f32
    %54 = vector.broadcast %cst_24 : f32 to vector<1x1xf32>
    %55 = arith.select %53, %54, %51 : vector<1x1xi1>, vector<1x1xf32>
    %56 = arith.subf %48, %55 : vector<1x1xf32>
    %57 = math.exp %56 : vector<1x1xf32>
    %58 = vector.broadcast %55 : vector<1x1xf32> to vector<128x1xf32>
    %59 = arith.subf %47, %58 : vector<128x1xf32>
    %60 = math.exp %59 : vector<128x1xf32>
    %c0_25 = arith.constant 0 : index
    %c0_26 = arith.constant 0 : index
    %61 = vector.load %arg14[%c0_25, %c0_26] : memref<1x1xf32, #tpu.memory_space<vmem>>, vector<1x1xf32>
    %62 = arith.mulf %57, %61 : vector<1x1xf32>
    %cst_27 = arith.constant dense<0.000000e+00> : vector<1xf32>
    %63 = vector.multi_reduction <add>, %60, %cst_27 [0] : vector<128x1xf32> to vector<1xf32>
    %64 = vector.shape_cast %63 : vector<1xf32> to vector<1x1xf32>
    %65 = arith.addf %62, %64 : vector<1x1xf32>
    %c0_28 = arith.constant 0 : index
    %c0_29 = arith.constant 0 : index
    %66 = vector.load %arg14[%c0_28, %c0_29] : memref<1x1xf32, #tpu.memory_space<vmem>>, vector<1x1xf32>
    tpu.vector_store %arg14[%c0_28, %c0_29], %65 {strides = array<i32>} : memref<1x1xf32, #tpu.memory_space<vmem>>, vector<1x1xf32>,
    %c0_30 = arith.constant 0 : index
    %c0_31 = arith.constant 0 : index
    %67 = vector.load %arg15[%c0_30, %c0_31] : memref<1x128xf32, #tpu.memory_space<vmem>>, vector<1x128xf32>
    %68 = vector.broadcast %57 : vector<1x1xf32> to vector<1x128xf32>
    %69 = arith.mulf %68, %67 : vector<1x128xf32>
    %70 = vector.broadcast %60 : vector<128x1xf32> to vector<128x128xf32>
    %71 = arith.mulf %70, %22 : vector<128x128xf32>
    %cst_32 = arith.constant dense<0.000000e+00> : vector<128xf32>
    %72 = vector.multi_reduction <add>, %71, %cst_32 [0] : vector<128x128xf32> to vector<128xf32>
    %73 = vector.shape_cast %72 : vector<128xf32> to vector<1x128xf32>
    %74 = arith.addf %69, %73 : vector<1x128xf32>
    %c0_33 = arith.constant 0 : index
    %c0_34 = arith.constant 0 : index
    %75 = vector.load %arg15[%c0_33, %c0_34] : memref<1x128xf32, #tpu.memory_space<vmem>>, vector<1x128xf32>
    tpu.vector_store %arg15[%c0_33, %c0_34], %74 {strides = array<i32>} : memref<1x128xf32, #tpu.memory_space<vmem>>, vector<1x128xf32>,
    %c0_35 = arith.constant 0 : index
    %c0_36 = arith.constant 0 : index
    %76 = vector.load %arg13[%c0_35, %c0_36] : memref<1x1xf32, #tpu.memory_space<vmem>>, vector<1x1xf32>
    tpu.vector_store %arg13[%c0_35, %c0_36], %51 {strides = array<i32>} : memref<1x1xf32, #tpu.memory_space<vmem>>, vector<1x1xf32>,
    %c1_i32 = arith.constant 1 : i32
    %77 = arith.cmpi eq, %arg2, %c1_i32 : i32
    %78 = arith.extui %77 : i1 to i32
    %c0_i32_37 = arith.constant 0 : i32
    %79 = arith.cmpi ne, %78, %c0_i32_37 : i32
    scf.if %79 {
      %c0_38 = arith.constant 0 : index
      %c0_39 = arith.constant 0 : index
      %80 = vector.load %arg15[%c0_38, %c0_39] : memref<1x128xf32, #tpu.memory_space<vmem>>, vector<1x128xf32>
      %c0_40 = arith.constant 0 : index
      %c0_41 = arith.constant 0 : index
      %c0_42 = arith.constant 0 : index
      %81 = vector.load %arg10[%c0_40, %c0_41, %c0_42] : memref<1x1x128xf32, #tpu.memory_space<vmem>>, vector<1x1x128xf32>
      %82 = vector.shape_cast %81 : vector<1x1x128xf32> to vector<1x128xf32>
      %83 = vector.shape_cast %80 : vector<1x128xf32> to vector<1x1x128xf32>
      tpu.vector_store %arg10[%c0_40, %c0_41, %c0_42], %83 {strides = array<i32>} : memref<1x1x128xf32, #tpu.memory_space<vmem>>, vector<1x1x128xf32>,
      %c0_43 = arith.constant 0 : index
      %c0_44 = arith.constant 0 : index
      %84 = vector.load %arg14[%c0_43, %c0_44] : memref<1x1xf32, #tpu.memory_space<vmem>>, vector<1x1xf32>
      %c0_45 = arith.constant 0 : index
      %c0_46 = arith.constant 0 : index
      %c0_47 = arith.constant 0 : index
      %85 = vector.load %arg11[%c0_45, %c0_46, %c0_47] : memref<1x1x1xf32, #tpu.memory_space<vmem>>, vector<1x1x1xf32>
      %86 = vector.shape_cast %85 : vector<1x1x1xf32> to vector<1x1xf32>
      %87 = vector.shape_cast %84 : vector<1x1xf32> to vector<1x1x1xf32>
      tpu.vector_store %arg11[%c0_45, %c0_46, %c0_47], %87 {strides = array<i32>} : memref<1x1x1xf32, #tpu.memory_space<vmem>>, vector<1x1x1xf32>,
      %c0_48 = arith.constant 0 : index
      %c0_49 = arith.constant 0 : index
      %88 = vector.load %arg13[%c0_48, %c0_49] : memref<1x1xf32, #tpu.memory_space<vmem>>, vector<1x1xf32>
      %c0_50 = arith.constant 0 : index
      %c0_51 = arith.constant 0 : index
      %c0_52 = arith.constant 0 : index
      %89 = vector.load %arg12[%c0_50, %c0_51, %c0_52] : memref<1x1x1xf32, #tpu.memory_space<vmem>>, vector<1x1x1xf32>
      %90 = vector.shape_cast %89 : vector<1x1x1xf32> to vector<1x1xf32>
      %91 = vector.shape_cast %88 : vector<1x1xf32> to vector<1x1x1xf32>
      tpu.vector_store %arg12[%c0_50, %c0_51, %c0_52], %91 {strides = array<i32>} : memref<1x1x1xf32, #tpu.memory_space<vmem>>, vector<1x1x1xf32>,
    } else {
    }
    return
  }
  func.func @transform_0(%arg0: i32, %arg1: i32, %arg2: i32) -> (i32, i32, i32) {
    %c2_i32 = arith.constant 2 : i32
    %0 = arith.muli %arg1, %c2_i32 : i32
    %1 = arith.addi %0, %arg2 : i32
    %c1_i32 = arith.constant 1 : i32
    %2 = arith.minsi %1, %c1_i32 : i32
    %c0_i32 = arith.constant 0 : i32
    %c0_i32_0 = arith.constant 0 : i32
    return %arg0, %2, %c0_i32 : i32, i32, i32
  }
  func.func @transform_1(%arg0: i32, %arg1: i32, %arg2: i32) -> (i32, i32) {
    %c0_i32 = arith.constant 0 : i32
    %c0_i32_0 = arith.constant 0 : i32
    %c0_i32_1 = arith.constant 0 : i32
    return %c0_i32, %c0_i32_0 : i32, i32
  }
  func.func @transform_2(%arg0: i32, %arg1: i32, %arg2: i32) -> (i32, i32) {
    %c0_i32 = arith.constant 0 : i32
    %c0_i32_0 = arith.constant 0 : i32
    %c0_i32_1 = arith.constant 0 : i32
    return %c0_i32, %c0_i32_0 : i32, i32
  }
  func.func @transform_3(%arg0: i32, %arg1: i32, %arg2: i32) -> (i32, i32) {
    %c0_i32 = arith.constant 0 : i32
    %c0_i32_0 = arith.constant 0 : i32
    %c0_i32_1 = arith.constant 0 : i32
    return %c0_i32, %c0_i32_0 : i32, i32
  }
  func.func @transform_4(%arg0: i32, %arg1: i32, %arg2: i32) -> (i32, i32) {
    %c0_i32 = arith.constant 0 : i32
    %c0_i32_0 = arith.constant 0 : i32
    %c0_i32_1 = arith.constant 0 : i32
    return %c0_i32, %c0_i32_0 : i32, i32
  }
  func.func @transform_5(%arg0: i32, %arg1: i32, %arg2: i32) -> (i32, i32) {
    %c0_i32 = arith.constant 0 : i32
    %c0_i32_0 = arith.constant 0 : i32
    %c0_i32_1 = arith.constant 0 : i32
    return %c0_i32, %c0_i32_0 : i32, i32
  }
  func.func @transform_6(%arg0: i32, %arg1: i32, %arg2: i32) -> (i32, i32) {
    %c0_i32 = arith.constant 0 : i32
    %c0_i32_0 = arith.constant 0 : i32
    %c0_i32_1 = arith.constant 0 : i32
    return %c0_i32, %c0_i32_0 : i32, i32
  }
  func.func @transform_7(%arg0: i32, %arg1: i32, %arg2: i32) -> (i32, i32, i32) {
    %c1_i32 = arith.constant 1 : i32
    %0 = arith.muli %arg0, %c1_i32 : i32
    %1 = arith.addi %0, %arg1 : i32
    %c0_i32 = arith.constant 0 : i32
    %c0_i32_0 = arith.constant 0 : i32
    %c0_i32_1 = arith.constant 0 : i32
    return %1, %c0_i32, %c0_i32_0 : i32, i32, i32
  }
  func.func @transform_8(%arg0: i32, %arg1: i32, %arg2: i32) -> (i32, i32, i32) {
    %c1_i32 = arith.constant 1 : i32
    %0 = arith.muli %arg0, %c1_i32 : i32
    %1 = arith.addi %0, %arg1 : i32
    %c0_i32 = arith.constant 0 : i32
    %c0_i32_0 = arith.constant 0 : i32
    %c0_i32_1 = arith.constant 0 : i32
    return %1, %c0_i32, %c0_i32_0 : i32, i32, i32
  }
  func.func @transform_9(%arg0: i32, %arg1: i32, %arg2: i32) -> (i32, i32, i32) {
    %c1_i32 = arith.constant 1 : i32
    %0 = arith.muli %arg0, %c1_i32 : i32
    %1 = arith.addi %0, %arg1 : i32
    %c0_i32 = arith.constant 0 : i32
    %c0_i32_0 = arith.constant 0 : i32
    %c0_i32_1 = arith.constant 0 : i32
    return %1, %c0_i32, %c0_i32_0 : i32, i32, i32
  }
}

</mosaic_0001>

<bundles_post_ra>
// kernel: tpu_custom_call.1
= control target key start
LH: loop header
LB: loop body
LE: loop exit
PB: predicated region body
PF: predicated region fallthrough
CT: control target
= control target key end

     0   :  { %s6610_s0 = inlined_call_operand.hbm [shape: f32[2,200,2048], index: 0, kind: input, shape index: {}]   ;;  %s6611_s1 = inlined_call_operand.hbm [shape: bf16[2048,128], index: 1, kind: input, shape index: {}]   ;;  %s6612_s2 = inlined_call_operand.hbm [shape: f32[1,128], index: 2, kind: input, shape index: {}]   ;;  %s6613_s3 = inlined_call_operand.hbm [shape: bf16[128,256], index: 3, kind: input, shape index: {}]   ;;  %s6614_s4 = inlined_call_operand.hbm [shape: f32[1,256], index: 4, kind: input, shape index: {}]   ;;  %s6615_s5 = inlined_call_operand.hbm [shape: f32[1,128], index: 5, kind: input, shape index: {}]   ;;  %s6616_s6 = inlined_call_operand.<no memory space> [shape: f32[1,1], index: 6, kind: input, shape index: {}]   ;;  %s6617_s7 = inlined_call_operand.hbm [shape: f32[2,1,128], index: 7, kind: output, shape index: {0}]   ;;  %s6618_s8 = inlined_call_operand.vmem [shape: f32[2,1,1], index: 8, kind: output, shape index: {1}]   ;;  %s6619_s9 = inlined_call_operand.vmem [shape: f32[2,1,1], index: 9, kind: output, shape index: {2}]  }
   0x1   :  { %6648 = sst [smem:[#allocation43_spill]] %s6611_s1  ;;  %v15_v0 = vstv %s6616_s6 }
   0x2   :  { %6649 = sst [smem:[#allocation44_spill]] %s6617_s7  ;;  %16 = vst [vmem:[#allocation5] sm:$0x1] %v15_v0 }
   0x3   :  { %6650 = sst [smem:[#allocation45_spill]] %s6618_s8 }
   0x4   :  { %6651 = sst [smem:[#allocation46_spill]] %s6619_s9 }
   0x5   :  { %17 = vsyncpa [#allocation7], 0 }
   0x6   :  { %19 = vsyncpa [#allocation7 + $0x1], 0 }
   0x7   :  { %20 = vsyncpa [#allocation10], 0 }
   0x8   :  { %21 = vsyncpa [#allocation13], 0 }
   0x9   :  { %22 = vsyncpa [#allocation16], 0 }
   0xa   :  { %23 = vsyncpa [#allocation8], 0 }
   0xb   :  { %25 = vsyncpa [#allocation8 + $0x1], 0  ;;  %s5300_s11 = smov 0   ;;  %s5302_s12 = smov 0  }
   0xc   :  { %s5304_s13 = smov 0   ;;  %s5306_s14 = smov 0  }
   0xd   :  { %s5308_s15 = smov 0   ;;  %s5310_s16 = smov 0  }
   0xe   :  { %s5312_s6 = smov 0   ;;  %s5314_s17 = smov 0  }
   0xf   :  { %s5316_s18 = smov 0   ;;  %s5318_s19 = smov 0  }
  0x10   :  { %s5320_s20 = smov 0  }
  0x11 LB: > { %6652 = sst [smem:[#allocation23_spill]] %s5189_s11  ;;  %s3738_s21 = sadd.s32 4294967295, %s5229_s20   ;;  %s5229_s20 = sphi %s5320_s20, %s31_s20   ;;  %s5225_s19 = sphi %s5318_s19, %s6725_s19   ;;  %s5221_s18 = sphi %s5316_s18, %s6717_s18   ;;  %s5217_s17 = sphi %s5314_s17, %s6724_s17   ;;  %s5213_s6 = sphi %s5312_s6, %s6716_s6   ;;  %s5209_s16 = sphi %s5310_s16, %s6723_s16   ;;  %s5205_s15 = sphi %s5308_s15, %s6722_s15   ;;  %s5201_s14 = sphi %s5306_s14, %s6721_s14   ;;  %s5197_s13 = sphi %s5304_s13, %s6714_s13   ;;  %s5193_s12 = sphi %s5302_s12, %s6720_s12   ;;  %s5189_s11 = sphi %s5300_s11, %s6719_s11  }
  0x12   : > { %6653 = sst [smem:[#allocation24_spill]] %s5197_s13  ;;  %s43_s23 = sadd.s32 1, %s5221_s18 }
  0x13   : > { %6654 = sst [smem:[#allocation25_spill]] %s5213_s6  ;;  %s50_s24 = sadd.s32 1, %s5225_s19 }
  0x14   : > { %6655 = sst [smem:[#allocation26_spill]] %s5217_s17  ;;  %p44_p0 = scmp.ge.s32.totalorder %s43_s23, 2 }
  0x15   : > { %6656 = sst [smem:[#allocation27_spill]] %s5221_s18  ;;  %p56_p1 = scmp.lt.s32.totalorder %s5221_s18, 1 }
  0x16   : > { %s67_s25 = sadd.s32 1, %s5209_s16  ;;  %p74_p2 = scmp.ne.s32.totalorder %s5209_s16, %s5205_s15 }
  0x17   : > { %s6727_s23 = smov (%p44_p0, %s43_s23), 0  ;;  %s6729_s24 = smov (!%p44_p0, %s50_s24), %s5225_s19 }
  0x18   : > { %6657 = sst [smem:[#allocation28_spill]] %s6727_s23  ;;  %p52_p3 = scmp.ge.s32.totalorder %s6729_s24, 2 }
  0x19   : > { %s5367_s26 = scalar_select %p56_p1, %s5221_s18, 1 }
  0x1a   : > { %p60_p4 = scmp.lt.s32.totalorder %s6727_s23, 1  ;;  %p75_p5 = scmp.eq.s32.totalorder %s5229_s20, 0 }
  0x1b   : > { %p80_p6 = scmp.ne.s32.totalorder %s5205_s15, %s5201_s14  ;;  %s6731_s24 = smov (%p52_p3, %s6729_s24), 0 }
  0x1c   : > { %6658 = sst [smem:[#allocation29_spill]] %s6731_s24  ;;  %s62_s28 = ssub.s32 %s5225_s19, %s6731_s24 }
  0x1d   : > { %s61_s27 = scalar_select %p60_p4, %s6727_s23, 1 }
  0x1e   : > { %p5378_p7 = por %p75_p5, %p74_p2  ;;  %p5385_p8 = scmp.eq.s32.totalorder %s3738_s21, 0 }
  0x1f   : > { %s63_s30 = ssub.s32 %s5367_s26, %s61_s27  ;;  %p219_p9 = scmp.eq.s32.totalorder %s62_s28, 0 }
  0x20   : > { %s6659_s29 = scalar_select %p5378_p7, 1, 0 }
  0x21   : > { %s6660_s10 = scalar_select %p5385_p8, 1, 0 }
  0x22   : > { %s64_s14 = sor.u32 %s63_s30, %s62_s28  ;;  %p5391_p11 = por %p5385_p8, %p80_p6 }
  0x23   : > { %p65_p10 = scmp.eq.s32.totalorder %s64_s14, 0  ;;  %s221_s24 = sadd.s32 1, %s5197_s13 }
  0x24   : > { %s6661_s22 = scalar_select %p5391_p11, 1, 0 }
  0x25   : > { %p231_p12 = scmp.ne.s32.totalorder %s5197_s13, %s5193_s12  ;;  %p232_p13 = scmp.eq.s32.totalorder %s3738_s21, 3 }
  0x26   : > { %s5399_s23 = scalar_select %p65_p10, %s5209_s16, %s67_s25  }
  0x27   : > { %s5402_s27 = scalar_select %p219_p9, %s5197_s13, %s221_s24  }
  0x28   : > { %6662 = sst [smem:[#allocation30_spill]] %s5399_s23  ;;  %p237_p0 = scmp.ne.s32.totalorder %s5193_s12, %s5189_s11 }
  0x29   : > { %6663 = sst [smem:[#allocation31_spill]] %s5402_s27  ;;  %s6664_s18 = sadd.s32 4294967294, %s5229_s20  }
  0x2a   : > { %p238_p1 = scmp.eq.s32.totalorder %s6664_s18, 3  ;;  %p3740_p2 = scmp.ge.s32.totalorder %s5229_s20, 1 }
  0x2b   : > { %p5411_p3 = por %p232_p13, %p231_p12  ;;  %p301_p4 = scmp.lt.s32.totalorder %s5229_s20, 5 }
  0x2c   : > { %p5416_p5 = por %p238_p1, %p237_p0  ;;  %s5231_s24 = smov [#allocation9]  }
  0x2d   : > { %s6665_s28 = scalar_select %p5411_p3, 1, 0 }
  0x2e   : > { %s6667_s30 = scalar_select %p5416_p5, 1, 0 }
  0x2f   : > { %6666 = sst [smem:[#allocation32_spill]] %s6665_s28  ;;  %p5420_p6 = pnand %p3740_p2, %p301_p4 }
  0x30   : > { %6668 = sst [smem:[#allocation33_spill]] %s6667_s30  ;;  %s313_s21 = sshll.u32 %s5231_s24, 4  ;;  %s314_s21 = int_to_ptr.vmem [resolvable:$true] %s313_s21 }
  0x31   : > { %s6669_s25 = scalar_select %p5420_p6, 1, 0 }
  0x32   : > { %p4510_p9 = pneg %p5420_p6  ;;  %s5232_s14 = smov [#allocation12]  }
  0x33   : > { %s337_s23 = sshll.u32 %s5232_s14, 4  ;;  %s6671_s1 = sld [smem:[#allocation43_spill]]  ;;  %s5432_s23 = int_to_ptr.vmem [resolvable:$true] %s337_s23 }
  0x34   : > { %p5428_p10 = pnand %p4510_p9, %p5385_p8 }
  0x36   : > { %p5442_p13 = pneg %p5428_p10 }
  0x39   : > { %s4927_s30 = scalar_lea.hbm %s6671_s1, 16384 }
  0x3a   : > { %p4928_p12 = scmp.ne.s32.totalorder %s6671_s1, %s4927_s30  ;;  %p4934_p2 = scmp.lt.u32.totalorder %s4927_s30, %s6671_s1 }
  0x3c   : > { %p4930_p0 = pnand %p5442_p13, %p4928_p12 }
  0x3e   : > { %p4931_p1 = pneg %p4930_p0 }
  0x40   : > { %p4936_p4 = pnand %p4934_p2, %p4931_p1 }
  0x42   : > { %4939 = shalt.err (!%p4936_p4)
}
  0x43   : > { %s4940_s13 = scalar_lea.vmem %s314_s21, 16384  ;;  %p4948_p8 = scmp.lt.s32.totalorder %s314_s21, %s314_s21 }
  0x44   : > { %p4941_p9 = scmp.ne.s32.totalorder %s314_s21, %s4940_s13  ;;  %p4949_p11 = scmp.lt.s32.totalorder %s4940_s13, %s4940_s13 }
  0x46   : > { %p4943_p5 = pnand %p4941_p9, %p5442_p13  ;;  %p4950_p6 = por %p4949_p11, %p4948_p8 }
  0x48   : > { %p4944_p3 = pneg %p4943_p5 }
  0x4a   : > { %p4951_p7 = pnand %p4950_p6, %p4944_p3 }
  0x4c   : > { %4954 = shalt.err (!%p4951_p7)
}
  0x4d   : > { %s5233_s7 = smov 64   ;;  %s5234_s11 = smov 4  }
  0x4e   : > { %4513 = dma.hbm_to_vmem [thread:$0]  (!%p5428_p10), %s6671_s1, 16384, %s314_s21, [#allocation10], %s5233_s7, %s5233_s7, %s5234_s11  }
  0x4f   : > { %s4955_s6 = scalar_lea.hbm %s6613_s3, 2048 }
  0x50   : > { %p4956_p5 = scmp.ne.s32.totalorder %s6613_s3, %s4955_s6  ;;  %p4962_p11 = scmp.lt.u32.totalorder %s4955_s6, %s6613_s3 }
  0x52   : > { %p4958_p8 = pnand %p4956_p5, %p5442_p13 }
  0x54   : > { %p4959_p7 = pneg %p4958_p8 }
  0x56   : > { %p4964_p3 = pnand %p4962_p11, %p4959_p7 }
  0x58   : > { %4967 = shalt.err (!%p4964_p3)
}
  0x59   : > { %s4968_s21 = scalar_lea.vmem %s5432_s23, 2048  ;;  %p4976_p1 = scmp.lt.s32.totalorder %s5432_s23, %s5432_s23 }
  0x5a   : > { %p4969_p6 = scmp.ne.s32.totalorder %s5432_s23, %s4968_s21  ;;  %p4977_p2 = scmp.lt.s32.totalorder %s4968_s21, %s4968_s21 }
  0x5c   : > { %p4971_p12 = pnand %p4969_p6, %p5442_p13  ;;  %p4978_p4 = por %p4977_p2, %p4976_p1 }
  0x5e   : > { %p4972_p0 = pneg %p4971_p12 }
  0x60   : > { %p4979_p9 = pnand %p4978_p4, %p4972_p0 }
  0x62   : > { %4982 = shalt.err (!%p4979_p9)
}
  0x63   : > { %s5235_s8 = smov 128   ;;  %s5236_s9 = smov 8  }
  0x64   : > { %4519 = dma.hbm_to_vmem [thread:$0]  (!%p5428_p10), %s6613_s3, 2048, %s5432_s23, [#allocation13], %s5235_s8, %s5235_s8, %s5236_s9  }
  0x65   : > { %s5237_s7 = smov [#allocation11]   ;;  %s5238_s27 = smov [#allocation14]  }
  0x66   : > { %s327_s11 = sshll.u32 %s5237_s7, 4  ;;  %s351_s28 = sshll.u32 %s5238_s27, 4  ;;  %s328_s11 = int_to_ptr.vmem [resolvable:$true] %s327_s11  ;;  %s5481_s28 = int_to_ptr.vmem [resolvable:$true] %s351_s28 }
  0x67   : > { %s4983_s13 = scalar_lea.hbm %s6612_s2, 16 }
  0x68   : > { %p4984_p5 = scmp.ne.s32.totalorder %s6612_s2, %s4983_s13  ;;  %p4990_p11 = scmp.lt.u32.totalorder %s4983_s13, %s6612_s2 }
  0x6a   : > { %p4986_p8 = pnand %p4984_p5, %p5442_p13 }
  0x6c   : > { %p4987_p7 = pneg %p4986_p8 }
  0x6e   : > { %p4992_p3 = pnand %p4990_p11, %p4987_p7 }
  0x70   : > { %4995 = shalt.err (!%p4992_p3)
}
  0x71   : > { %s4996_s8 = scalar_lea.vmem %s328_s11, 16  ;;  %s5003_s9 = scalar_lea.vmem %s328_s11, 32 }
  0x72   : > { %p4997_p6 = scmp.ne.s32.totalorder %s328_s11, %s4996_s8  ;;  %p5004_p1 = scmp.lt.s32.totalorder %s328_s11, %s328_s11 }
  0x73   : > { %p5005_p2 = scmp.lt.s32.totalorder %s5003_s9, %s4996_s8 }
  0x74   : > { %p4999_p12 = pnand %p4997_p6, %p5442_p13 }
  0x75   : > { %p5006_p4 = por %p5005_p2, %p5004_p1 }
  0x76   : > { %p5000_p0 = pneg %p4999_p12 }
  0x78   : > { %p5007_p9 = pnand %p5006_p4, %p5000_p0 }
  0x7a   : > { %5010 = shalt.err (!%p5007_p9)
}
  0x7b   : > { %4516 = dma.hbm_to_vmem [thread:$0]  (!%p5428_p10), %s6612_s2, 16, %s328_s11, [#allocation10]  }
  0x7c   : > { %s5011_s30 = scalar_lea.hbm %s6614_s4, 32 }
  0x7d   : > { %p5012_p5 = scmp.ne.s32.totalorder %s6614_s4, %s5011_s30  ;;  %p5018_p11 = scmp.lt.u32.totalorder %s5011_s30, %s6614_s4 }
  0x7f   : > { %p5014_p8 = pnand %p5012_p5, %p5442_p13 }
  0x81   : > { %p5015_p7 = pneg %p5014_p8 }
  0x83   : > { %p5020_p3 = pnand %p5018_p11, %p5015_p7 }
  0x85   : > { %5023 = shalt.err (!%p5020_p3)
}
  0x86   : > { %s5024_s11 = scalar_lea.vmem %s5481_s28, 32  ;;  %p5032_p1 = scmp.lt.s32.totalorder %s5481_s28, %s5481_s28 }
  0x87   : > { %p5025_p6 = scmp.ne.s32.totalorder %s5481_s28, %s5024_s11  ;;  %p5033_p2 = scmp.lt.s32.totalorder %s5024_s11, %s5024_s11 }
  0x89   : > { %p5027_p12 = pnand %p5025_p6, %p5442_p13  ;;  %p5034_p4 = por %p5033_p2, %p5032_p1 }
  0x8b   : > { %p5028_p0 = pneg %p5027_p12 }
  0x8d   : > { %p5035_p9 = pnand %p5034_p4, %p5028_p0 }
  0x8f   : > { %5038 = shalt.err (!%p5035_p9)
}
  0x90   : > { %4522 = dma.hbm_to_vmem [thread:$0]  (!%p5428_p10), %s6614_s4, 32, %s5481_s28, [#allocation13]  }
  0x91   : > { %s5239_s9 = smov [#allocation15]   ;;  %s5039_s27 = scalar_lea.hbm %s6615_s5, 16 }
  0x92   : > { %s362_s1 = sshll.u32 %s5239_s9, 4  ;;  %p5040_p5 = scmp.ne.s32.totalorder %s6615_s5, %s5039_s27  ;;  %s363_s1 = int_to_ptr.vmem [resolvable:$true] %s362_s1 }
  0x93   : > { %p5046_p11 = scmp.lt.u32.totalorder %s5039_s27, %s6615_s5 }
  0x94   : > { %p5042_p8 = pnand %p5040_p5, %p5442_p13 }
  0x96   : > { %p5043_p7 = pneg %p5042_p8 }
  0x98   : > { %p5048_p3 = pnand %p5046_p11, %p5043_p7 }
  0x9a   : > { %5051 = shalt.err (!%p5048_p3)
}
  0x9b   : > { %s5052_s28 = scalar_lea.vmem %s363_s1, 16  ;;  %s5059_s6 = scalar_lea.vmem %s363_s1, 32 }
  0x9c   : > { %p5053_p6 = scmp.ne.s32.totalorder %s363_s1, %s5052_s28  ;;  %p5060_p1 = scmp.lt.s32.totalorder %s363_s1, %s363_s1 }
  0x9d   : > { %p5061_p2 = scmp.lt.s32.totalorder %s5059_s6, %s5052_s28 }
  0x9e   : > { %p5055_p12 = pnand %p5053_p6, %p5442_p13 }
  0x9f   : > { %p5062_p4 = por %p5061_p2, %p5060_p1 }
  0xa0   : > { %p5056_p0 = pneg %p5055_p12 }
  0xa2   : > { %p5063_p9 = pnand %p5062_p4, %p5056_p0 }
  0xa4   : > { %5066 = shalt.err (!%p5063_p9)
}
  0xa5   : > { %4525 = dma.hbm_to_vmem [thread:$0]  (!%p5428_p10), %s6615_s5, 16, %s363_s1, [#allocation16]  }
  0xa6   : > { %p3746_p5 = scmp.ge.s32.totalorder %s5229_s20, 4 }
  0xa7   : > { %p6673_p8 = scmp.ne.s32.totalorder (!%p3746_p5), %s6659_s29, 0 }
  0xa8   : > { %372 = sbr.rel (%p3746_p5) target bundleno = 213 (0xd5), region = 40 }
  0xaf   : > { %375 = sbr.rel (!%p6673_p8) target bundleno = 213 (0xd5), region = 44  ;;  %s376_s24 = sand.u32 (%p6673_p8), 1, %s5209_s16  }
  0xb0   : > { %s3748_s8 = sshll.u32 (%p6673_p8), %s5367_s26, 4  ;;  %s3747_s9 = sshll.u32 (%p6673_p8), %s376_s24, 11 }
  0xb1   : > { %s386_s17 = ssub.s32 (%p6673_p8), 25, %s3748_s8  ;;  %s5550_s27 = scalar_lea.sflag (%p6673_p8), [#allocation7], %s376_s24 }
  0xb2   : > { %p387_p13 = scmp.lt.s32.totalorder (%p6673_p8), %s386_s17, 16  ;;  %s380_s1 = scalar_lea.vmem (%p6673_p8), [#allocation6], %s3747_s9 }
  0xb6   : > { %s6733_s17 = smov (!%p387_p13, %s386_s17), 16 }
  0xb7   : > { %s5547_s7 = sshll.u32 %s6733_s17, 11 }
  0xb8   : > { %s392_s18 = ssub.s32 32768, %s5547_s7 }
  0xb9   : > { %393 = vsyncadd %s5550_s27, %s392_s18  ;;  %p3751_p10 = scmp.ne.s32.totalorder %s5547_s7, 0  ;;  %s3957_s29 = sshll.u32 %s5367_s26, 8 }
  0xba   : > { %s4486_s30 = smul.u32 400, %s5225_s19  ;;  %s401_s14 = sshll.u32 %s380_s1, 4  ;;  %s5556_s14 = int_to_ptr.vmem [resolvable:$true] %s401_s14 }
  0xbb   : > { %s5071_s8 = scalar_lea.hbm %s6610_s0, 102400 }
  0xbc   : > { %s397_s13 = sadd.s32 %s4486_s30, %s3957_s29 }
  0xbd   : > { %s3753_s21 = sshll.u32 %s397_s13, 7 }
  0xbe   : > { %s5561_s11 = scalar_lea.hbm %s6610_s0, %s3753_s21 }
  0xbf   : > { %s5067_s23 = scalar_lea.hbm %s5561_s11, %s5547_s7  ;;  %p5072_p6 = scmp.lt.u32.totalorder %s5561_s11, %s6610_s0 }
  0xc0   : > { %p5068_p7 = scmp.ne.s32.totalorder %s5561_s11, %s5067_s23  ;;  %p5073_p12 = scmp.lt.u32.totalorder %s5071_s8, %s5067_s23 }
  0xc1   : > { %p5075_p1 = scmp.lt.u32.totalorder %s5067_s23, %s5561_s11 }
  0xc2   : > { %p5069_p11 = pnand %p5068_p7, %p3751_p10  ;;  %p5074_p0 = por %p5073_p12, %p5072_p6 }
  0xc4   : > { %p5070_p3 = pneg %p5069_p11  ;;  %p5076_p2 = por %p5075_p1, %p5074_p0 }
  0xc6   : > { %p5077_p4 = pnand %p5076_p2, %p5070_p3 }
  0xc8   : > { %5080 = shalt.err (!%p5077_p4)
}
  0xc9   : > { %s5081_s18 = scalar_lea.vmem %s5556_s14, %s5547_s7  ;;  %s5240_s1 = smov [#allocation6]  }
  0xca   : > { %p5082_p9 = scmp.ne.s32.totalorder %s5556_s14, %s5081_s18  ;;  %s5085_s29 = sshll.u32 %s5240_s1, 4  ;;  %s5086_s29 = int_to_ptr.vmem [resolvable:$false] %s5085_s29 }
  0xcb   : > { %s5087_s30 = scalar_lea.vmem %s5086_s29, 65536  ;;  %p5088_p13 = scmp.lt.s32.totalorder %s5556_s14, %s5086_s29 }
  0xcc   : > { %p5083_p5 = pnand %p5082_p9, %p3751_p10  ;;  %p5089_p7 = scmp.lt.s32.totalorder %s5087_s30, %s5081_s18 }
  0xce   : > { %p5084_p8 = pneg %p5083_p5  ;;  %p5090_p11 = por %p5089_p7, %p5088_p13 }
  0xd0   : > { %p5091_p6 = pnand %p5090_p11, %p5084_p8 }
  0xd2   : > { %5094 = shalt.err (!%p5091_p6)
}
  0xd3   : > { %s5241_s13 = smov 2048   ;;  %s5242_s21 = smov 128  }
  0xd4   : > { %407 = dma.hbm_to_vmem [thread:$0]  (%p3751_p10), %s5561_s11, %s5547_s7, %s5556_s14, %s5550_s27, %s5241_s13, %s5241_s13, %s5242_s21  }
  0xd5 PF: > { %p6674_p3 = scmp.ne.s32.totalorder %s6669_s25, 0 }
  0xd7   : > { %413 = sbr.rel (%p6674_p3) target bundleno = 1441 (0x5a1), region = 48 }
  0xde   : > { %s415_s28 = sand.u32 1, %s5205_s15   ;;  %p6675_p12 = scmp.ne.s32.totalorder %s6661_s22, 0 }
  0xdf   : > { %s3757_s6 = sshll.u32 %s415_s28, 11  ;;  %s416_s23 = scalar_lea.sflag [#allocation7], %s415_s28 }
  0xe0   : > { %s5591_s26 = scalar_lea.vmem [#allocation6], %s3757_s6 }
  0xe1   : > { %5168 = dma.done.wait (%p6675_p12), %s416_s23, 32768  }
  0xe2   : > { %5170 = vsyncadd (%p6675_p12), %s416_s23, 4294934528  ;;  %p6676_p0 = scmp.ne.s32.totalorder %s6660_s10, 0 }
  0xe4   : > { %5172 = dma.done.wait (%p6676_p0), [#allocation10], 16400  }
  0xe5   : > { %5174 = vsyncadd (%p6676_p0), [#allocation10], 4294950896 }
  0xe6   : > { %5176 = dma.done.wait (%p6676_p0), [#allocation13], 2080  }
  0xe7   : > { %5178 = vsyncadd (%p6676_p0), [#allocation13], 4294965216 }
  0xe8   : > { %5180 = dma.done.wait (%p6676_p0), [#allocation16], 16  }
  0xe9   : > { %5182 = vsyncadd (%p6676_p0), [#allocation16], 4294967280  ;;  %s6677_s22 = sld [smem:[#allocation26_spill]]  ;;  %s467_s25 = sand.u32 1, %s5193_s12  }
  0xea   : > { %s6678_s14 = sld [smem:[#allocation45_spill]]  ;;  %s6679_s9 = sld [smem:[#allocation46_spill]] }
  0xeb   : > { %s5624_s10 = scalar_lea.vmem [#allocation17], %s467_s25  ;;  %s6680_s18 = sld [smem:[#allocation25_spill]] }
  0xef   : > { %p493_p10 = scmp.lt.s32.totalorder %s6677_s22, 1 }
  0xf1   : > { %s6735_s22 = smov (!%p493_p10, %s6677_s22), 1  ;;  %p3763_p1 = scmp.ne.s32.totalorder %s6680_s18, 0 }
  0xf2   : > { %s495_s11 = scalar_lea.vmem %s6678_s14, %s6735_s22  ;;  %s500_s17 = scalar_lea.vmem %s6679_s9, %s6735_s22  ;;  %vm507_vm0 = vcmask (!%p3763_p1), 0   ;;  %v5243_v1 = vmov (!%p3763_p1), -inf   ;;  %v5244_v2 = vmov (!%p3763_p1), 0.0  }
  0xf3   : > { %506 = sbr.rel (%p3763_p1) target bundleno = 250 (0xfa), region = 76  ;;  %508 = vst.msk [vmem:[#allocation2] sm:$0x1] (!%p3763_p1), %vm507_vm0, %v5243_v1  ;;  %509 = vst.msk [vmem:[#allocation3] sm:$0x1] (!%p3763_p1), %vm507_vm0, %v5244_v2 }
  0xf4   : > { %510 = vst [vmem:[#allocation4] sm:$0x1] (!%p3763_p1), %v5244_v2 }
  0xfa PF: > { %v4645_v3 = vld [vmem:[#allocation9 + $0x40] sm:$0xff]   ;;  %v4647_v5 = vld [vmem:[#allocation9 + $0x48] sm:$0xff]   ;;  %v4649_v7 = vld [vmem:[#allocation9 + $0x50] sm:$0xff]   ;;  %s6681_s1 = sld [smem:[#allocation25_spill]] }
  0xfb   : > { %v4646_v4 = vld [vmem:[#allocation9] sm:$0xff]   ;;  %4470 = vmatprep.subr.bf16.mxu1 %v4645_v3  ;;  %3958 = vmatprep.subr.bf16.mxu0 %v4645_v3  ;;  %v4648_v6 = vld [vmem:[#allocation9 + $0x8] sm:$0xff]   ;;  %v4650_v8 = vld [vmem:[#allocation9 + $0x10] sm:$0xff]  }
  0xfc   : > { %4478 = vmatpush3.bf16.msra.mxu1 %v4646_v4  ;;  %3959 = vmatpush3.bf16.msra.mxu0 %v4646_v4  ;;  %v4651_v9 = vld [vmem:[#allocation9 + $0x58] sm:$0xff]   ;;  %v4653_v11 = vld [vmem:[#allocation9 + $0x60] sm:$0xff]   ;;  %v4655_v13 = vld [vmem:[#allocation9 + $0x68] sm:$0xff]  }
  0xfd   : > { %4471 = vmatprep.subr.bf16.mxu1 %v4647_v5  ;;  %3960 = vmatprep.subr.bf16.mxu0 %v4647_v5  ;;  %v4652_v10 = vld [vmem:[#allocation9 + $0x18] sm:$0xff]   ;;  %v4654_v12 = vld [vmem:[#allocation9 + $0x20] sm:$0xff]   ;;  %v693_v14 = vld [vmem:[%s5591_s26 + $0x408] sm:$0xff] }
  0xfe   : > { %v709_v15 = vld [vmem:[%s5591_s26 + $0x488] sm:$0xff]  ;;  %v4657_v21 = vld [vmem:[#allocation9 + $0x70] sm:$0xff]   ;;  %v4659_v23 = vld [vmem:[#allocation9 + $0x78] sm:$0xff]  }
  0xff   : > { %v885_v16 = vpack.c.bf16 %v709_v15, %v693_v14  ;;  %v565_v17 = vld [vmem:[%s5591_s26 + $0x8] sm:$0xff]  ;;  %v4658_v22 = vld [vmem:[#allocation9 + $0x30] sm:$0xff]   ;;  %v4660_v24 = vld [vmem:[#allocation9 + $0x38] sm:$0xff]  }
 0x100   : > { %4479 = vmatpush3.bf16.msra.mxu1 %v4648_v6  ;;  %3961 = vmatpush3.bf16.msra.mxu0 %v4648_v6  ;;  %v581_v18 = vld [vmem:[%s5591_s26 + $0x88] sm:$0xff]  ;;  %v692_v25 = vld [vmem:[%s5591_s26 + $0x400] sm:$0xff]  ;;  %v4669_v49 = vld [vmem:[#allocation9 + $0xd0] sm:$0xff]   ;;  %s3764_s29 = sshll.u32 %s6681_s1, 7  ;;  %p3952_p2 = scmp.ne.s32.totalorder %s6681_s1, 1 }
 0x101   : > { %4472 = vmatprep.subr.bf16.mxu1 %v4649_v7  ;;  %3962 = vmatprep.subr.bf16.mxu0 %v4649_v7  ;;  %v4656_v19 = vld [vmem:[#allocation9 + $0x28] sm:$0xff]   ;;  %v821_v20 = vpack.c.bf16 %v581_v18, %v565_v17  ;;  %v708_v26 = vld [vmem:[%s5591_s26 + $0x480] sm:$0xff]  ;;  %v4671_v50 = vld [vmem:[#allocation9 + $0x150] sm:$0xff]  }
 0x102   : > { %2043 = vmatprep.mubr.bf16.mxu1 %v885_v16  ;;  %v4661_v27 = vld [vmem:[#allocation9 + $0xc0] sm:$0xff]   ;;  %v725_v33 = vld [vmem:[%s5591_s26 + $0x508] sm:$0xff]  ;;  %v884_v35 = vpack.c.bf16 %v708_v26, %v692_v25  ;;  %v4670_v51 = vld [vmem:[#allocation9 + $0x90] sm:$0xff]  }
 0x103   : > { %2011 = vmatprep.mubr.bf16.mxu0 %v821_v20  ;;  %v564_v28 = vld [vmem:[%s5591_s26] sm:$0xff]  ;;  %v741_v34 = vld [vmem:[%s5591_s26 + $0x588] sm:$0xff]  ;;  %v4672_v52 = vld [vmem:[#allocation9 + $0x110] sm:$0xff]  }
 0x104   : > { %4480 = vmatpush3.bf16.msra.mxu1 %v4650_v8  ;;  %3963 = vmatpush3.bf16.msra.mxu0 %v4650_v8  ;;  %v580_v29 = vld [vmem:[%s5591_s26 + $0x80] sm:$0xff]  ;;  %v597_v37 = vld [vmem:[%s5591_s26 + $0x108] sm:$0xff]  ;;  %v901_v42 = vpack.c.bf16 %v741_v34, %v725_v33  ;;  %v4673_v55 = vld [vmem:[#allocation9 + $0xd8] sm:$0xff]  }
 0x105   : > { %4473 = vmatprep.subr.bf16.mxu1 %v4651_v9  ;;  %3964 = vmatprep.subr.bf16.mxu0 %v4651_v9  ;;  %v4663_v30 = vld [vmem:[#allocation9 + $0x140] sm:$0xff]   ;;  %v820_v36 = vpack.c.bf16 %v580_v29, %v564_v28  ;;  %v613_v38 = vld [vmem:[%s5591_s26 + $0x188] sm:$0xff]  ;;  %v4675_v58 = vld [vmem:[#allocation9 + $0x158] sm:$0xff]  }
 0x106   : > { %v4662_v31 = vld [vmem:[#allocation9 + $0x80] sm:$0xff]   ;;  %v4665_v39 = vld [vmem:[#allocation9 + $0xc8] sm:$0xff]   ;;  %v837_v46 = vpack.c.bf16 %v613_v38, %v597_v37  ;;  %v4674_v61 = vld [vmem:[#allocation9 + $0x98] sm:$0xff]  }
 0x107   : > { %v4664_v32 = vld [vmem:[#allocation9 + $0x100] sm:$0xff]   ;;  %v4667_v40 = vld [vmem:[#allocation9 + $0x148] sm:$0xff]   ;;  %v4676_v63 = vld [vmem:[#allocation9 + $0x118] sm:$0xff]  }
 0x108   : > { %4481 = vmatpush3.bf16.msra.mxu1 %v4652_v10  ;;  %3965 = vmatpush3.bf16.msra.mxu0 %v4652_v10  ;;  %v4666_v41 = vld [vmem:[#allocation9 + $0x88] sm:$0xff]   ;;  %v724_v44 = vld [vmem:[%s5591_s26 + $0x500] sm:$0xff]  ;;  %v4687_v26 = vld [vmem:[#allocation9 + $0x170] sm:$0xff]  }
 0x109   : > { %4474 = vmatprep.subr.bf16.mxu1 %v4653_v11  ;;  %3966 = vmatprep.subr.bf16.mxu0 %v4653_v11  ;;  %v4668_v43 = vld [vmem:[#allocation9 + $0x108] sm:$0xff]   ;;  %v740_v45 = vld [vmem:[%s5591_s26 + $0x580] sm:$0xff]  ;;  %v4686_v28 = vld [vmem:[#allocation9 + $0xb0] sm:$0xff]  }
 0x10a   : > { %v596_v47 = vld [vmem:[%s5591_s26 + $0x100] sm:$0xff]  ;;  %v900_v53 = vpack.c.bf16 %v740_v45, %v724_v44  ;;  %v757_v56 = vld [vmem:[%s5591_s26 + $0x608] sm:$0xff]  ;;  %v4691_v33 = vld [vmem:[#allocation9 + $0x178] sm:$0xff]  }
 0x10b   : > { %v612_v48 = vld [vmem:[%s5591_s26 + $0x180] sm:$0xff]  ;;  %v773_v57 = vld [vmem:[%s5591_s26 + $0x688] sm:$0xff]  ;;  %v567_v34 = vld [vmem:[%s5591_s26 + $0x18] sm:$0xff] }
 0x10c   : > { %4482 = vmatpush3.bf16.msra.mxu1 %v4654_v12  ;;  %3967 = vmatpush3.bf16.msra.mxu0 %v4654_v12  ;;  %v836_v54 = vpack.c.bf16 %v612_v48, %v596_v47  ;;  %v629_v59 = vld [vmem:[%s5591_s26 + $0x208] sm:$0xff]  ;;  %v917_v62 = vpack.c.bf16 %v773_v57, %v757_v56  ;;  %v756_v0 = vld [vmem:[%s5591_s26 + $0x600] sm:$0xff]  ;;  %v4692_v37 = vld [vmem:[#allocation9 + $0x138] sm:$0xff]  }
 0x10d   : > { %4475 = vmatprep.subr.bf16.mxu1 %v4655_v13  ;;  %3968 = vmatprep.subr.bf16.mxu0 %v4655_v13  ;;  %v645_v60 = vld [vmem:[%s5591_s26 + $0x288] sm:$0xff]  ;;  %v772_v1 = vld [vmem:[%s5591_s26 + $0x680] sm:$0xff]  ;;  %v566_v38 = vld [vmem:[%s5591_s26 + $0x10] sm:$0xff] }
 0x10e   : > { %v853_v2 = vpack.c.bf16 %v645_v60, %v629_v59  ;;  %v4677_v3 = vld [vmem:[#allocation9 + $0xe0] sm:$0xff]   ;;  %v916_v8 = vpack.c.bf16 %v772_v1, %v756_v0  ;;  %v789_v11 = vld [vmem:[%s5591_s26 + $0x708] sm:$0xff]  ;;  %v599_v48 = vld [vmem:[%s5591_s26 + $0x118] sm:$0xff] }
 0x10f   : > { %v628_v4 = vld [vmem:[%s5591_s26 + $0x200] sm:$0xff]  ;;  %v805_v12 = vld [vmem:[%s5591_s26 + $0x788] sm:$0xff]  ;;  %v4697_v1 = vld [vmem:[#allocation9 + $0x1d0] sm:$0xff]  }
 0x110   : > { %4483 = vmatpush3.bf16.msra.mxu1 %v4656_v19  ;;  %3969 = vmatpush3.bf16.msra.mxu0 %v4656_v19  ;;  %v644_v5 = vld [vmem:[%s5591_s26 + $0x280] sm:$0xff]  ;;  %v4681_v13 = vld [vmem:[#allocation9 + $0xe8] sm:$0xff]   ;;  %v933_v16 = vpack.c.bf16 %v805_v12, %v789_v11  ;;  %v663_v11 = vld [vmem:[%s5591_s26 + $0x318] sm:$0xff] }
 0x111   : > { %4476 = vmatprep.subr.bf16.mxu1 %v4657_v21  ;;  %3970 = vmatprep.subr.bf16.mxu0 %v4657_v21  ;;  %v4679_v6 = vld [vmem:[#allocation9 + $0x160] sm:$0xff]   ;;  %v852_v9 = vpack.c.bf16 %v644_v5, %v628_v4  ;;  %v4683_v14 = vld [vmem:[#allocation9 + $0x168] sm:$0xff]   ;;  %v4699_v12 = vld [vmem:[#allocation9 + $0x1d8] sm:$0xff]  }
 0x112   : > { %v4678_v7 = vld [vmem:[#allocation9 + $0xa0] sm:$0xff]   ;;  %v4682_v15 = vld [vmem:[#allocation9 + $0xa8] sm:$0xff]  }
 0x113   : > { %v4680_v10 = vld [vmem:[#allocation9 + $0x120] sm:$0xff]   ;;  %v4684_v17 = vld [vmem:[#allocation9 + $0x128] sm:$0xff]  }
 0x114   : > { %4484 = vmatpush3.bf16.msra.mxu1 %v4658_v22  ;;  %3971 = vmatpush3.bf16.msra.mxu0 %v4658_v22  ;;  %v788_v18 = vld [vmem:[%s5591_s26 + $0x700] sm:$0xff]  ;;  %v661_v20 = vld [vmem:[%s5591_s26 + $0x308] sm:$0xff]  ;;  %v4685_v22 = vld [vmem:[#allocation9 + $0xf0] sm:$0xff]  }
 0x115   : > { %4477 = vmatprep.subr.bf16.mxu1 %v4659_v23  ;;  %3972 = vmatprep.subr.bf16.mxu0 %v4659_v23  ;;  %v804_v19 = vld [vmem:[%s5591_s26 + $0x780] sm:$0xff]  ;;  %v677_v21 = vld [vmem:[%s5591_s26 + $0x388] sm:$0xff] }
 0x116   : > { %v869_v23 = vpack.c.bf16 %v677_v21, %v661_v20  ;;  %v676_v25 = vld [vmem:[%s5591_s26 + $0x380] sm:$0xff]  ;;  %v617_v56 = vld [vmem:[%s5591_s26 + $0x1a8] sm:$0xff] }
 0x117   : > { %v4694_v45 = vld [vmem:[#allocation9 + $0x180] sm:$0xff]  }
 0x118   : > { %4485 = vmatpush3.bf16.msra.mxu1 %v4660_v24  ;;  %3973 = vmatpush3.bf16.msra.mxu0 %v4660_v24  ;;  %v660_v24 = vld [vmem:[%s5591_s26 + $0x300] sm:$0xff] }
 0x119   : > { %4022 = vmatprep.subr.bf16.mxu1 %v4661_v27  ;;  %4086 = vmatprep.subr.bf16.mxu0 %v4663_v30  ;;  %v932_v27 = vpack.c.bf16 %v804_v19, %v788_v18  ;;  %v868_v29 = vpack.c.bf16 %v676_v25, %v660_v24  ;;  %v4688_v30 = vld [vmem:[#allocation9 + $0x130] sm:$0xff]   ;;  %v584_v47 = vld [vmem:[%s5591_s26 + $0xa0] sm:$0xff] }
 0x11a   : > { %v600_v59 = vld [vmem:[%s5591_s26 + $0x120] sm:$0xff] }
 0x11b   : > { %2044 = vmatmul.mubr.bf16.vlgmr.msra.gmra.mrb[0].mxu1 %v884_v35  ;;  %2012 = vmatmul.mubr.bf16.vlgmr.msra.gmra.mrb[0].mxu0 %v820_v36  ;;  %v583_v35 = vld [vmem:[%s5591_s26 + $0x98] sm:$0xff]  ;;  %v616_v60 = vld [vmem:[%s5591_s26 + $0x1a0] sm:$0xff] }
 0x11c   : > { %4023 = vmatpush3.bf16.msra.mxu1 %v4662_v31  ;;  %4087 = vmatpush3.bf16.msra.mxu0 %v4664_v32  ;;  %v4689_v31 = vld [vmem:[#allocation9 + $0xf8] sm:$0xff]   ;;  %v823_v36 = vpack.c.bf16 %v583_v35, %v567_v34  ;;  %v840_v0 = vpack.c.bf16 %v616_v60, %v600_v59  ;;  %v4701_v21 = vld [vmem:[#allocation9 + $0x1e0] sm:$0xff]   ;;  %v742_v59 = vld [vmem:[%s5591_s26 + $0x590] sm:$0xff] }
 0x11d   : > { %4024 = vmatprep.subr.bf16.mxu1 %v4665_v39  ;;  %4088 = vmatprep.subr.bf16.mxu0 %v4667_v40  ;;  %v4690_v32 = vld [vmem:[#allocation9 + $0xb8] sm:$0xff]   ;;  %v582_v39 = vld [vmem:[%s5591_s26 + $0x90] sm:$0xff]  ;;  %v4693_v40 = vld [vmem:[#allocation9 + $0x1c0] sm:$0xff]  }
 0x11e   : > { %2051 = vmatprep.mubr.bf16.mxu1 %v901_v42  ;;  %2019 = vmatprep.mubr.bf16.mxu0 %v837_v46  ;;  %v585_v42 = vld [vmem:[%s5591_s26 + $0xa8] sm:$0xff]  ;;  %v568_v46 = vld [vmem:[%s5591_s26 + $0x20] sm:$0xff] }
 0x11f   : > { %v664_v24 = vld [vmem:[%s5591_s26 + $0x320] sm:$0xff] }
 0x120   : > { %4025 = vmatpush3.bf16.msra.mxu1 %v4666_v41  ;;  %4089 = vmatpush3.bf16.msra.mxu0 %v4668_v43  ;;  %v569_v41 = vld [vmem:[%s5591_s26 + $0x28] sm:$0xff]  ;;  %v822_v43 = vpack.c.bf16 %v582_v39, %v566_v38  ;;  %v680_v25 = vld [vmem:[%s5591_s26 + $0x3a0] sm:$0xff] }
 0x121   : > { %4026 = vmatprep.subr.bf16.mxu1 %v4669_v49  ;;  %4090 = vmatprep.subr.bf16.mxu0 %v4671_v50  ;;  %v825_v44 = vpack.c.bf16 %v585_v42, %v569_v41  ;;  %v615_v49 = vld [vmem:[%s5591_s26 + $0x198] sm:$0xff]  ;;  %v824_v50 = vpack.c.bf16 %v584_v47, %v568_v46  ;;  %v872_v35 = vpack.c.bf16 %v680_v25, %v664_v24  ;;  %v4707_v39 = vld [vmem:[#allocation9 + $0x1e8] sm:$0xff]   ;;  %v710_v41 = vld [vmem:[%s5591_s26 + $0x490] sm:$0xff] }
 0x122   : > { %v696_v42 = vld [vmem:[%s5591_s26 + $0x420] sm:$0xff]  ;;  %v743_v46 = vld [vmem:[%s5591_s26 + $0x598] sm:$0xff]  ;;  %v729_v47 = vld [vmem:[%s5591_s26 + $0x528] sm:$0xff] }
 0x123   : > { %2052 = vmatmul.mubr.bf16.gmra.mrb[4].mxu1 %v900_v53  ;;  %2020 = vmatmul.mubr.bf16.gmra.mrb[4].mxu0 %v836_v54  ;;  %v614_v53 = vld [vmem:[%s5591_s26 + $0x190] sm:$0xff]  ;;  %v4695_v54 = vld [vmem:[#allocation9 + $0x1c8] sm:$0xff]   ;;  %v728_v60 = vld [vmem:[%s5591_s26 + $0x520] sm:$0xff] }
 0x124   : > { %4027 = vmatpush3.bf16.msra.mxu1 %v4670_v51  ;;  %4091 = vmatpush3.bf16.msra.mxu0 %v4672_v52  ;;  %v839_v51 = vpack.c.bf16 %v615_v49, %v599_v48  ;;  %v598_v52 = vld [vmem:[%s5591_s26 + $0x110] sm:$0xff]  ;;  %v745_v48 = vld [vmem:[%s5591_s26 + $0x5a8] sm:$0xff]  ;;  %v4723_v25 = vld [vmem:[#allocation9 + $0x278] sm:$0xff]  }
 0x125   : > { %4028 = vmatprep.subr.bf16.mxu1 %v4673_v55  ;;  %4092 = vmatprep.subr.bf16.mxu0 %v4675_v58  ;;  %v601_v55 = vld [vmem:[%s5591_s26 + $0x128] sm:$0xff]  ;;  %v4709_v49 = vld [vmem:[#allocation9 + $0x250] sm:$0xff]  }
 0x126   : > { %2059 = vmatprep.mubr.bf16.mxu1 %v917_v62  ;;  %2027 = vmatprep.mubr.bf16.mxu0 %v853_v2  ;;  %v841_v57 = vpack.c.bf16 %v617_v56, %v601_v55  ;;  %v4696_v58 = vld [vmem:[#allocation9 + $0x188] sm:$0xff]   ;;  %v647_v62 = vld [vmem:[%s5591_s26 + $0x298] sm:$0xff]  ;;  %v905_v55 = vpack.c.bf16 %v745_v48, %v729_v47 }
 0x127   : > { %v633_v2 = vld [vmem:[%s5591_s26 + $0x228] sm:$0xff]  ;;  %v4712_v56 = vld [vmem:[#allocation9 + $0x218] sm:$0xff]  }
 0x128   : > { %4029 = vmatpush3.bf16.msra.mxu1 %v4674_v61  ;;  %4093 = vmatpush3.bf16.msra.mxu0 %v4676_v63  ;;  %v631_v61 = vld [vmem:[%s5591_s26 + $0x218] sm:$0xff]  ;;  %v838_v63 = vpack.c.bf16 %v614_v53, %v598_v52  ;;  %v605_v48 = vld [vmem:[%s5591_s26 + $0x148] sm:$0xff] }
 0x129   : > { %4030 = vmatprep.subr.bf16.mxu1 %v4677_v3  ;;  %4094 = vmatprep.subr.bf16.mxu0 %v4679_v6  ;;  %v649_v3 = vld [vmem:[%s5591_s26 + $0x2a8] sm:$0xff]  ;;  %v855_v4 = vpack.c.bf16 %v647_v62, %v631_v61  ;;  %v4698_v6 = vld [vmem:[#allocation9 + $0x190] sm:$0xff]   ;;  %v744_v61 = vld [vmem:[%s5591_s26 + $0x5a0] sm:$0xff] }
 0x12a   : > { %v857_v5 = vpack.c.bf16 %v649_v3, %v633_v2  ;;  %v759_v62 = vld [vmem:[%s5591_s26 + $0x618] sm:$0xff]  ;;  %v777_v2 = vld [vmem:[%s5591_s26 + $0x6a8] sm:$0xff]  ;;  %v4715_v3 = vld [vmem:[#allocation9 + $0x260] sm:$0xff]  }
 0x12b   : > { %2060 = vmatmul.mubr.bf16.gmra.mrb[8].mxu1 %v916_v8  ;;  %2028 = vmatmul.mubr.bf16.gmra.mrb[8].mxu0 %v852_v9  ;;  %v646_v8 = vld [vmem:[%s5591_s26 + $0x290] sm:$0xff]  ;;  %v632_v9 = vld [vmem:[%s5591_s26 + $0x220] sm:$0xff]  ;;  %v619_v47 = vld [vmem:[%s5591_s26 + $0x1b8] sm:$0xff] }
 0x12c   : > { %4031 = vmatpush3.bf16.msra.mxu1 %v4678_v7  ;;  %4095 = vmatpush3.bf16.msra.mxu0 %v4680_v10  ;;  %v630_v7 = vld [vmem:[%s5591_s26 + $0x210] sm:$0xff]  ;;  %v648_v10 = vld [vmem:[%s5591_s26 + $0x2a0] sm:$0xff] }
 0x12d   : > { %4032 = vmatprep.subr.bf16.mxu1 %v4681_v13  ;;  %4096 = vmatprep.subr.bf16.mxu0 %v4683_v14  ;;  %v679_v13 = vld [vmem:[%s5591_s26 + $0x398] sm:$0xff]  ;;  %v665_v14 = vld [vmem:[%s5591_s26 + $0x328] sm:$0xff]  ;;  %v856_v18 = vpack.c.bf16 %v648_v10, %v632_v9 }
 0x12e   : > { %2067 = vmatprep.mubr.bf16.mxu1 %v933_v16  ;;  %2035 = vmatprep.mubr.bf16.mxu0 %v869_v23  ;;  %v4700_v16 = vld [vmem:[#allocation9 + $0x198] sm:$0xff]   ;;  %v871_v19 = vpack.c.bf16 %v679_v13, %v663_v11  ;;  %v678_v23 = vld [vmem:[%s5591_s26 + $0x390] sm:$0xff]  ;;  %v4718_v10 = vld [vmem:[#allocation9 + $0x228] sm:$0xff]  }
 0x12f   : > { %v758_v11 = vld [vmem:[%s5591_s26 + $0x610] sm:$0xff]  ;;  %v760_v13 = vld [vmem:[%s5591_s26 + $0x620] sm:$0xff] }
 0x130   : > { %4033 = vmatpush3.bf16.msra.mxu1 %v4682_v15  ;;  %4097 = vmatpush3.bf16.msra.mxu0 %v4684_v17  ;;  %v681_v15 = vld [vmem:[%s5591_s26 + $0x3a8] sm:$0xff]  ;;  %v854_v17 = vpack.c.bf16 %v646_v8, %v630_v7 }
 0x131   : > { %4034 = vmatprep.subr.bf16.mxu1 %v4685_v22  ;;  %4098 = vmatprep.subr.bf16.mxu0 %v4687_v26  ;;  %v873_v20 = vpack.c.bf16 %v681_v15, %v665_v14  ;;  %v662_v22 = vld [vmem:[%s5591_s26 + $0x310] sm:$0xff]  ;;  %v4702_v26 = vld [vmem:[#allocation9 + $0x1a0] sm:$0xff]   ;;  %v4717_v7 = vld [vmem:[#allocation9 + $0x268] sm:$0xff]  }
 0x132   : > { %v870_v34 = vpack.c.bf16 %v678_v23, %v662_v22  ;;  %v776_v14 = vld [vmem:[%s5591_s26 + $0x6a0] sm:$0xff]  ;;  %v4719_v15 = vld [vmem:[#allocation9 + $0x1f8] sm:$0xff]   ;;  %v4722_v22 = vld [vmem:[#allocation9 + $0x230] sm:$0xff]  }
 0x133   : > { %2068 = vmatmul.mubr.bf16.gmra.mrb[12].mxu1 %v932_v27  ;;  %2036 = vmatmul.mubr.bf16.gmra.mrb[12].mxu0 %v868_v29  ;;  %v695_v27 = vld [vmem:[%s5591_s26 + $0x418] sm:$0xff]  ;;  %v697_v29 = vld [vmem:[%s5591_s26 + $0x428] sm:$0xff]  ;;  %v920_v24 = vpack.c.bf16 %v776_v14, %v760_v13  ;;  %v4736_v13 = vld [vmem:[#allocation9 + $0x300] sm:$0xff]  }
 0x134   : > { %4035 = vmatpush3.bf16.msra.mxu1 %v4686_v28  ;;  %4099 = vmatpush3.bf16.msra.mxu0 %v4688_v30  ;;  %v711_v28 = vld [vmem:[%s5591_s26 + $0x498] sm:$0xff]  ;;  %v713_v30 = vld [vmem:[%s5591_s26 + $0x4a8] sm:$0xff] }
 0x135   : > { %4036 = vmatprep.subr.bf16.mxu1 %v4689_v31  ;;  %4100 = vmatprep.subr.bf16.mxu0 %v4691_v33  ;;  %v4703_v31 = vld [vmem:[#allocation9 + $0x240] sm:$0xff]   ;;  %v4705_v33 = vld [vmem:[#allocation9 + $0x248] sm:$0xff]   ;;  %v889_v38 = vpack.c.bf16 %v713_v30, %v697_v29  ;;  %v790_v29 = vld [vmem:[%s5591_s26 + $0x710] sm:$0xff] }
 0x136   : > { %2108 = vmatprep.mubr.bf16.mxu1 %v823_v36  ;;  %2205 = vmatprep.mubr.bf16.mxu0 %v825_v44  ;;  %v4706_v36 = vld [vmem:[#allocation9 + $0x208] sm:$0xff]   ;;  %v806_v30 = vld [vmem:[%s5591_s26 + $0x790] sm:$0xff]  ;;  %v667_v14 = vld [vmem:[%s5591_s26 + $0x338] sm:$0xff] }
 0x137   : > { %v4708_v44 = vld [vmem:[#allocation9 + $0x1a8] sm:$0xff]  }
 0x138   : > { %4037 = vmatpush3.bf16.msra.mxu1 %v4690_v32  ;;  %4101 = vmatpush3.bf16.msra.mxu0 %v4692_v37  ;;  %v4704_v32 = vld [vmem:[#allocation9 + $0x200] sm:$0xff]   ;;  %v887_v37 = vpack.c.bf16 %v711_v28, %v695_v27  ;;  %v4724_v28 = vld [vmem:[#allocation9 + $0x238] sm:$0xff]  }
 0x139   : > { %4150 = vmatprep.subr.bf16.mxu1 %v4693_v40  ;;  %4214 = vmatprep.subr.bf16.mxu0 %v4703_v31  ;;  %v694_v40 = vld [vmem:[%s5591_s26 + $0x410] sm:$0xff]  ;;  %v792_v31 = vld [vmem:[%s5591_s26 + $0x720] sm:$0xff] }
 0x13a   : > { %v886_v52 = vpack.c.bf16 %v710_v41, %v694_v40 }
 0x13b   : > { %2109 = vmatmul.mubr.bf16.vlgmr.msra.gmra.mrb[16].mxu1 %v822_v43  ;;  %2206 = vmatmul.mubr.bf16.vlgmr.msra.gmra.mrb[16].mxu0 %v824_v50  ;;  %v712_v43 = vld [vmem:[%s5591_s26 + $0x4a0] sm:$0xff]  ;;  %v4710_v50 = vld [vmem:[#allocation9 + $0x210] sm:$0xff]  }
 0x13c   : > { %4151 = vmatpush3.bf16.msra.mxu1 %v4694_v45  ;;  %2116 = vmatprep.mubr.bf16.mxu1 %v839_v51  ;;  %v727_v45 = vld [vmem:[%s5591_s26 + $0x518] sm:$0xff]  ;;  %v888_v53 = vpack.c.bf16 %v712_v43, %v696_v42  ;;  %v570_v42 = vld [vmem:[%s5591_s26 + $0x30] sm:$0xff] }
 0x13d   : > { %4152 = vmatprep.subr.bf16.mxu1 %v4695_v54  ;;  %2213 = vmatprep.mubr.bf16.mxu0 %v841_v57  ;;  %v4711_v51 = vld [vmem:[#allocation9 + $0x258] sm:$0xff]   ;;  %v903_v54 = vpack.c.bf16 %v743_v46, %v727_v45  ;;  %v4713_v57 = vld [vmem:[#allocation9 + $0x1f0] sm:$0xff]   ;;  %v588_v45 = vld [vmem:[%s5591_s26 + $0xc0] sm:$0xff] }
 0x13e   : > { %4215 = vmatpush3.bf16.msra.mxu0 %v4704_v32  ;;  %v808_v32 = vld [vmem:[%s5591_s26 + $0x7a0] sm:$0xff]  ;;  %v586_v43 = vld [vmem:[%s5591_s26 + $0xb0] sm:$0xff]  ;;  %v603_v46 = vld [vmem:[%s5591_s26 + $0x138] sm:$0xff] }
 0x13f   : > { %4216 = vmatprep.subr.bf16.mxu0 %v4705_v33  ;;  %v4725_v33 = vld [vmem:[#allocation9 + $0x2c0] sm:$0xff]  }
 0x140   : > { %4153 = vmatpush3.bf16.msra.mxu1 %v4696_v58  ;;  %v726_v58 = vld [vmem:[%s5591_s26 + $0x510] sm:$0xff] }
 0x141   : > { %4154 = vmatprep.subr.bf16.mxu1 %v4697_v1  ;;  %v4714_v1 = vld [vmem:[#allocation9 + $0x1b0] sm:$0xff]  }
 0x142   : > { %4217 = vmatpush3.bf16.msra.mxu0 %v4706_v36  ;;  %v573_v36 = vld [vmem:[%s5591_s26 + $0x48] sm:$0xff] }
 0x143   : > { %2117 = vmatmul.mubr.bf16.gmra.mrb[20].mxu1 %v838_v63  ;;  %2214 = vmatmul.mubr.bf16.gmra.mrb[20].mxu0 %v840_v0  ;;  %v775_v63 = vld [vmem:[%s5591_s26 + $0x698] sm:$0xff]  ;;  %v761_v0 = vld [vmem:[%s5591_s26 + $0x628] sm:$0xff] }
 0x144   : > { %2124 = vmatprep.mubr.bf16.mxu1 %v855_v4  ;;  %2221 = vmatprep.mubr.bf16.mxu0 %v857_v5  ;;  %v4716_v4 = vld [vmem:[#allocation9 + $0x220] sm:$0xff]   ;;  %v902_v5 = vpack.c.bf16 %v742_v59, %v726_v58  ;;  %v919_v8 = vpack.c.bf16 %v775_v63, %v759_v62  ;;  %v921_v9 = vpack.c.bf16 %v777_v2, %v761_v0  ;;  %v4728_v58 = vld [vmem:[#allocation9 + $0x288] sm:$0xff]   ;;  %v651_v62 = vld [vmem:[%s5591_s26 + $0x2b8] sm:$0xff] }
 0x145   : > { %4155 = vmatpush3.bf16.msra.mxu1 %v4698_v6  ;;  %4218 = vmatprep.subr.bf16.mxu0 %v4709_v49  ;;  %v904_v6 = vpack.c.bf16 %v744_v61, %v728_v60  ;;  %v621_v49 = vld [vmem:[%s5591_s26 + $0x1c8] sm:$0xff]  ;;  %v604_v59 = vld [vmem:[%s5591_s26 + $0x140] sm:$0xff]  ;;  %v635_v61 = vld [vmem:[%s5591_s26 + $0x238] sm:$0xff] }
 0x146   : > { %4156 = vmatprep.subr.bf16.mxu1 %v4699_v12  ;;  %4219 = vmatpush3.bf16.msra.mxu0 %v4710_v50  ;;  %v774_v12 = vld [vmem:[%s5591_s26 + $0x690] sm:$0xff]  ;;  %v826_v50 = vpack.c.bf16 %v586_v43, %v570_v42  ;;  %v620_v60 = vld [vmem:[%s5591_s26 + $0x1c0] sm:$0xff]  ;;  %v637_v0 = vld [vmem:[%s5591_s26 + $0x248] sm:$0xff] }
 0x147   : > { %4220 = vmatprep.subr.bf16.mxu0 %v4711_v51  ;;  %v918_v23 = vpack.c.bf16 %v774_v12, %v758_v11  ;;  %v4729_v63 = vld [vmem:[#allocation9 + $0x2d0] sm:$0xff]   ;;  %v636_v11 = vld [vmem:[%s5591_s26 + $0x240] sm:$0xff] }
 0x148   : > { %v652_v12 = vld [vmem:[%s5591_s26 + $0x2c0] sm:$0xff]  ;;  %v4745_v43 = vld [vmem:[#allocation9 + $0x2f0] sm:$0xff]  }
 0x149   : > { %4157 = vmatpush3.bf16.msra.mxu1 %v4700_v16  ;;  %v791_v16 = vld [vmem:[%s5591_s26 + $0x718] sm:$0xff] }
 0x14a   : > { %4158 = vmatprep.subr.bf16.mxu1 %v4701_v21  ;;  %4221 = vmatpush3.bf16.msra.mxu0 %v4712_v56  ;;  %v4721_v21 = vld [vmem:[#allocation9 + $0x270] sm:$0xff]  }
 0x14b   : > { %2125 = vmatmul.mubr.bf16.gmra.mrb[24].mxu1 %v854_v17  ;;  %2222 = vmatmul.mubr.bf16.gmra.mrb[24].mxu0 %v856_v18  ;;  %v807_v17 = vld [vmem:[%s5591_s26 + $0x798] sm:$0xff]  ;;  %v793_v18 = vld [vmem:[%s5591_s26 + $0x728] sm:$0xff]  ;;  %v602_v56 = vld [vmem:[%s5591_s26 + $0x130] sm:$0xff] }
 0x14c   : > { %2132 = vmatprep.mubr.bf16.mxu1 %v871_v19  ;;  %2229 = vmatprep.mubr.bf16.mxu0 %v873_v20  ;;  %v809_v19 = vld [vmem:[%s5591_s26 + $0x7a8] sm:$0xff]  ;;  %v4720_v20 = vld [vmem:[#allocation9 + $0x1b8] sm:$0xff]  }
 0x14d   : > { %4159 = vmatpush3.bf16.msra.mxu1 %v4702_v26  ;;  %4222 = vmatprep.subr.bf16.mxu0 %v4715_v3  ;;  %v935_v26 = vpack.c.bf16 %v807_v17, %v791_v16  ;;  %v937_v27 = vpack.c.bf16 %v809_v19, %v793_v18  ;;  %v844_v3 = vpack.c.bf16 %v620_v60, %v604_v59  ;;  %v4737_v16 = vld [vmem:[#allocation9 + $0x348] sm:$0xff]   ;;  %v4732_v19 = vld [vmem:[#allocation9 + $0x298] sm:$0xff]  }
 0x14e   : > { %4160 = vmatprep.subr.bf16.mxu1 %v4707_v39  ;;  %4223 = vmatpush3.bf16.msra.mxu0 %v4716_v4  ;;  %v936_v39 = vpack.c.bf16 %v808_v32, %v792_v31  ;;  %v4730_v4 = vld [vmem:[#allocation9 + $0x290] sm:$0xff]   ;;  %v669_v17 = vld [vmem:[%s5591_s26 + $0x348] sm:$0xff]  ;;  %v668_v31 = vld [vmem:[%s5591_s26 + $0x340] sm:$0xff] }
 0x14f   : > { %4224 = vmatprep.subr.bf16.mxu0 %v4717_v7  ;;  %v4731_v7 = vld [vmem:[#allocation9 + $0x2d8] sm:$0xff]   ;;  %v685_v18 = vld [vmem:[%s5591_s26 + $0x3c8] sm:$0xff]  ;;  %v684_v32 = vld [vmem:[%s5591_s26 + $0x3c0] sm:$0xff] }
 0x150   : > { %v876_v42 = vpack.c.bf16 %v684_v32, %v668_v31  ;;  %v810_v31 = vld [vmem:[%s5591_s26 + $0x7b0] sm:$0xff]  ;;  %v796_v32 = vld [vmem:[%s5591_s26 + $0x740] sm:$0xff] }
 0x151   : > { %4161 = vmatpush3.bf16.msra.mxu1 %v4708_v44  ;;  %v572_v44 = vld [vmem:[%s5591_s26 + $0x40] sm:$0xff] }
 0x152   : > { %4162 = vmatprep.subr.bf16.mxu1 %v4713_v57  ;;  %4225 = vmatpush3.bf16.msra.mxu0 %v4718_v10  ;;  %v828_v51 = vpack.c.bf16 %v588_v45, %v572_v44  ;;  %v618_v57 = vld [vmem:[%s5591_s26 + $0x1b0] sm:$0xff] }
 0x153   : > { %2133 = vmatmul.mubr.bf16.gmra.mrb[28].mxu1 %v870_v34  ;;  %2230 = vmatmul.mubr.bf16.gmra.mrb[28].mxu0 %v872_v35  ;;  %v571_v34 = vld [vmem:[%s5591_s26 + $0x38] sm:$0xff]  ;;  %v842_v2 = vpack.c.bf16 %v618_v57, %v602_v56  ;;  %v650_v10 = vld [vmem:[%s5591_s26 + $0x2b0] sm:$0xff]  ;;  %v4749_v56 = vld [vmem:[#allocation9 + $0x368] sm:$0xff]  }
 0x154   : > { %2140 = vmatprep.mubr.bf16.mxu1 %v887_v37  ;;  %2237 = vmatprep.mubr.bf16.mxu0 %v889_v38  ;;  %v587_v35 = vld [vmem:[%s5591_s26 + $0xb8] sm:$0xff]  ;;  %v589_v37 = vld [vmem:[%s5591_s26 + $0xc8] sm:$0xff]  ;;  %v934_v38 = vpack.c.bf16 %v806_v30, %v790_v29  ;;  %v666_v29 = vld [vmem:[%s5591_s26 + $0x330] sm:$0xff] }
 0x155   : > { %4163 = vmatpush3.bf16.msra.mxu1 %v4714_v1  ;;  %4226 = vmatprep.subr.bf16.mxu0 %v4721_v21  ;;  %v827_v40 = vpack.c.bf16 %v587_v35, %v571_v34  ;;  %v829_v41 = vpack.c.bf16 %v589_v37, %v573_v36  ;;  %v653_v1 = vld [vmem:[%s5591_s26 + $0x2c8] sm:$0xff]  ;;  %v682_v30 = vld [vmem:[%s5591_s26 + $0x3b0] sm:$0xff]  ;;  %v699_v34 = vld [vmem:[%s5591_s26 + $0x438] sm:$0xff] }
 0x156   : > { %4164 = vmatprep.subr.bf16.mxu1 %v4719_v15  ;;  %4227 = vmatpush3.bf16.msra.mxu0 %v4722_v22  ;;  %v683_v15 = vld [vmem:[%s5591_s26 + $0x3b8] sm:$0xff]  ;;  %v4738_v21 = vld [vmem:[#allocation9 + $0x308] sm:$0xff]  }
 0x157   : > { %4228 = vmatprep.subr.bf16.mxu0 %v4723_v25  ;;  %v877_v25 = vpack.c.bf16 %v685_v18, %v669_v17  ;;  %v4743_v35 = vld [vmem:[#allocation9 + $0x358] sm:$0xff]   ;;  %v701_v37 = vld [vmem:[%s5591_s26 + $0x448] sm:$0xff]  ;;  %v4757_v17 = vld [vmem:[#allocation9 + $0x3c0] sm:$0xff]  }
 0x158   : > { %v715_v36 = vld [vmem:[%s5591_s26 + $0x4b8] sm:$0xff]  ;;  %v749_v57 = vld [vmem:[%s5591_s26 + $0x5c8] sm:$0xff]  ;;  %v762_v18 = vld [vmem:[%s5591_s26 + $0x630] sm:$0xff] }
 0x159   : > { %4165 = vmatpush3.bf16.msra.mxu1 %v4720_v20  ;;  %v4733_v20 = vld [vmem:[#allocation9 + $0x2e0] sm:$0xff]   ;;  %v891_v44 = vpack.c.bf16 %v715_v36, %v699_v34  ;;  %v575_v34 = vld [vmem:[%s5591_s26 + $0x58] sm:$0xff]  ;;  %v577_v36 = vld [vmem:[%s5591_s26 + $0x68] sm:$0xff] }
 0x15a   : > { %4229 = vmatpush3.bf16.msra.mxu0 %v4724_v28  ;;  %4278 = vmatprep.subr.bf16.mxu1 %v4725_v33  ;;  %v4741_v28 = vld [vmem:[#allocation9 + $0x350] sm:$0xff]  }
 0x15b   : > { %2141 = vmatmul.mubr.bf16.gmra.mrb[32].mxu1 %v886_v52  ;;  %2238 = vmatmul.mubr.bf16.gmra.mrb[32].mxu0 %v888_v53  ;;  %v4726_v52 = vld [vmem:[#allocation9 + $0x280] sm:$0xff]   ;;  %v843_v53 = vpack.c.bf16 %v619_v47, %v603_v46  ;;  %v4742_v33 = vld [vmem:[#allocation9 + $0x310] sm:$0xff]  }
 0x15c   : > { %2148 = vmatprep.mubr.bf16.mxu1 %v903_v54  ;;  %2245 = vmatprep.mubr.bf16.mxu0 %v905_v55  ;;  %v4727_v54 = vld [vmem:[#allocation9 + $0x2c8] sm:$0xff]   ;;  %v845_v55 = vpack.c.bf16 %v621_v49, %v605_v48  ;;  %v4746_v46 = vld [vmem:[#allocation9 + $0x2b0] sm:$0xff]   ;;  %v700_v49 = vld [vmem:[%s5591_s26 + $0x440] sm:$0xff] }
 0x15d   : > { %v698_v47 = vld [vmem:[%s5591_s26 + $0x430] sm:$0xff] }
 0x15e   : > { %v714_v48 = vld [vmem:[%s5591_s26 + $0x4b0] sm:$0xff] }
 0x15f   : > { %v890_v59 = vpack.c.bf16 %v714_v48, %v698_v47  ;;  %v623_v47 = vld [vmem:[%s5591_s26 + $0x1d8] sm:$0xff]  ;;  %v609_v48 = vld [vmem:[%s5591_s26 + $0x168] sm:$0xff] }
 0x163   : > { %2149 = vmatmul.mubr.bf16.gmra.mrb[36].mxu1 %v902_v5  ;;  %2246 = vmatmul.mubr.bf16.gmra.mrb[36].mxu0 %v904_v6  ;;  %v859_v5 = vpack.c.bf16 %v651_v62, %v635_v61  ;;  %v861_v6 = vpack.c.bf16 %v653_v1, %v637_v0  ;;  %v4751_v61 = vld [vmem:[#allocation9 + $0x2f8] sm:$0xff]   ;;  %v730_v1 = vld [vmem:[%s5591_s26 + $0x530] sm:$0xff] }
 0x164   : > { %2156 = vmatprep.mubr.bf16.mxu1 %v919_v8  ;;  %2253 = vmatprep.mubr.bf16.mxu0 %v921_v9  ;;  %v4735_v8 = vld [vmem:[#allocation9 + $0x340] sm:$0xff]   ;;  %v634_v9 = vld [vmem:[%s5591_s26 + $0x230] sm:$0xff]  ;;  %v4752_v0 = vld [vmem:[#allocation9 + $0x2b8] sm:$0xff]  }
 0x165   : > { %4342 = vmatprep.subr.bf16.mxu0 %v4735_v8  ;;  %v858_v22 = vpack.c.bf16 %v650_v10, %v634_v9  ;;  %v4754_v8 = vld [vmem:[#allocation9 + $0x330] sm:$0xff]   ;;  %v765_v9 = vld [vmem:[%s5591_s26 + $0x648] sm:$0xff] }
 0x166   : > { %v781_v10 = vld [vmem:[%s5591_s26 + $0x6c8] sm:$0xff] }
 0x16b   : > { %2157 = vmatmul.mubr.bf16.gmra.mrb[40].mxu1 %v918_v23  ;;  %2254 = vmatmul.mubr.bf16.gmra.mrb[40].mxu0 %v920_v24  ;;  %v860_v23 = vpack.c.bf16 %v652_v12, %v636_v11  ;;  %v875_v24 = vpack.c.bf16 %v683_v15, %v667_v14  ;;  %v4755_v11 = vld [vmem:[#allocation9 + $0x378] sm:$0xff]  }
 0x16c   : > { %2164 = vmatprep.mubr.bf16.mxu1 %v935_v26  ;;  %2261 = vmatprep.mubr.bf16.mxu0 %v937_v27  ;;  %v4734_v26 = vld [vmem:[#allocation9 + $0x2a0] sm:$0xff]   ;;  %v4739_v27 = vld [vmem:[#allocation9 + $0x2e8] sm:$0xff]   ;;  %v4756_v12 = vld [vmem:[#allocation9 + $0x338] sm:$0xff]  }
 0x173   : > { %2165 = vmatmul.mubr.bf16.gmra.mrb[44].mxu1 %v934_v38  ;;  %2262 = vmatmul.mubr.bf16.gmra.mrb[44].mxu0 %v936_v39  ;;  %v717_v38 = vld [vmem:[%s5591_s26 + $0x4c8] sm:$0xff] }
 0x174   : > { %2302 = vmatprep.mubr.bf16.mxu1 %v827_v40  ;;  %2399 = vmatprep.mubr.bf16.mxu0 %v829_v41  ;;  %v4740_v39 = vld [vmem:[#allocation9 + $0x2a8] sm:$0xff]   ;;  %v4744_v40 = vld [vmem:[#allocation9 + $0x318] sm:$0xff]   ;;  %v874_v41 = vpack.c.bf16 %v682_v30, %v666_v29  ;;  %v893_v45 = vpack.c.bf16 %v717_v38, %v701_v37  ;;  %v794_v30 = vld [vmem:[%s5591_s26 + $0x730] sm:$0xff] }
 0x175   : > { %v593_v37 = vld [vmem:[%s5591_s26 + $0xe8] sm:$0xff]  ;;  %v938_v38 = vpack.c.bf16 %v810_v31, %v794_v30 }
 0x176   : > { %v705_v30 = vld [vmem:[%s5591_s26 + $0x468] sm:$0xff] }
 0x177   : > { %v721_v31 = vld [vmem:[%s5591_s26 + $0x4e8] sm:$0xff] }
 0x17b   : > { %2303 = vmatmul.mubr.bf16.vlgmr.msra.gmra.mrb[48].mxu1 %v826_v50  ;;  %2400 = vmatmul.mubr.bf16.vlgmr.msra.gmra.mrb[48].mxu0 %v828_v51  ;;  %v716_v50 = vld [vmem:[%s5591_s26 + $0x4c0] sm:$0xff] }
 0x17c   : > { %4279 = vmatpush3.bf16.msra.mxu1 %v4726_v52  ;;  %2310 = vmatprep.mubr.bf16.mxu1 %v843_v53  ;;  %v4747_v51 = vld [vmem:[#allocation9 + $0x360] sm:$0xff]   ;;  %v731_v52 = vld [vmem:[%s5591_s26 + $0x538] sm:$0xff]  ;;  %v892_v60 = vpack.c.bf16 %v716_v50, %v700_v49  ;;  %v625_v49 = vld [vmem:[%s5591_s26 + $0x1e8] sm:$0xff] }
 0x17d   : > { %4280 = vmatprep.subr.bf16.mxu1 %v4727_v54  ;;  %2407 = vmatprep.mubr.bf16.mxu0 %v845_v55  ;;  %v747_v53 = vld [vmem:[%s5591_s26 + $0x5b8] sm:$0xff]  ;;  %v4748_v54 = vld [vmem:[#allocation9 + $0x320] sm:$0xff]   ;;  %v733_v55 = vld [vmem:[%s5591_s26 + $0x548] sm:$0xff] }
 0x17e   : > { %4343 = vmatpush3.bf16.msra.mxu0 %v4736_v13  ;;  %v907_v62 = vpack.c.bf16 %v747_v53, %v731_v52  ;;  %v4758_v52 = vld [vmem:[#allocation9 + $0x380] sm:$0xff]  }
 0x17f   : > { %4344 = vmatprep.subr.bf16.mxu0 %v4737_v16  ;;  %v925_v16 = vpack.c.bf16 %v781_v10, %v765_v9  ;;  %v654_v9 = vld [vmem:[%s5591_s26 + $0x2d0] sm:$0xff]  ;;  %v640_v10 = vld [vmem:[%s5591_s26 + $0x260] sm:$0xff] }
 0x180   : > { %4281 = vmatpush3.bf16.msra.mxu1 %v4728_v58  ;;  %v4750_v58 = vld [vmem:[#allocation9 + $0x328] sm:$0xff]  }
 0x181   : > { %4282 = vmatprep.subr.bf16.mxu1 %v4729_v63  ;;  %v909_v63 = vpack.c.bf16 %v749_v57, %v733_v55  ;;  %v849_v55 = vpack.c.bf16 %v625_v49, %v609_v48  ;;  %v622_v57 = vld [vmem:[%s5591_s26 + $0x1d0] sm:$0xff]  ;;  %v4772_v48 = vld [vmem:[#allocation9 + $0x3b8] sm:$0xff]  }
 0x182   : > { %4345 = vmatpush3.bf16.msra.mxu0 %v4738_v21  ;;  %v780_v21 = vld [vmem:[%s5591_s26 + $0x6c0] sm:$0xff] }
 0x183   : > { %2311 = vmatmul.mubr.bf16.gmra.mrb[52].mxu1 %v842_v2  ;;  %2408 = vmatmul.mubr.bf16.gmra.mrb[52].mxu0 %v844_v3  ;;  %v746_v2 = vld [vmem:[%s5591_s26 + $0x5b0] sm:$0xff]  ;;  %v732_v3 = vld [vmem:[%s5591_s26 + $0x540] sm:$0xff] }
 0x184   : > { %2318 = vmatprep.mubr.bf16.mxu1 %v859_v5  ;;  %2415 = vmatprep.mubr.bf16.mxu0 %v861_v6  ;;  %v763_v5 = vld [vmem:[%s5591_s26 + $0x638] sm:$0xff]  ;;  %v906_v13 = vpack.c.bf16 %v746_v2, %v730_v1  ;;  %v657_v1 = vld [vmem:[%s5591_s26 + $0x2e8] sm:$0xff] }
 0x185   : > { %4283 = vmatpush3.bf16.msra.mxu1 %v4730_v4  ;;  %4346 = vmatprep.subr.bf16.mxu0 %v4741_v28  ;;  %v748_v4 = vld [vmem:[%s5591_s26 + $0x5c0] sm:$0xff]  ;;  %v779_v6 = vld [vmem:[%s5591_s26 + $0x6b8] sm:$0xff] }
 0x186   : > { %4284 = vmatprep.subr.bf16.mxu1 %v4731_v7  ;;  %4347 = vmatpush3.bf16.msra.mxu0 %v4742_v33  ;;  %v4753_v7 = vld [vmem:[#allocation9 + $0x370] sm:$0xff]   ;;  %v908_v14 = vpack.c.bf16 %v748_v4, %v732_v3  ;;  %v923_v15 = vpack.c.bf16 %v779_v6, %v763_v5  ;;  %v812_v33 = vld [vmem:[%s5591_s26 + $0x7c0] sm:$0xff] }
 0x187   : > { %4348 = vmatprep.subr.bf16.mxu0 %v4743_v35  ;;  %v591_v35 = vld [vmem:[%s5591_s26 + $0xd8] sm:$0xff]  ;;  %v4762_v6 = vld [vmem:[#allocation9 + $0x390] sm:$0xff]  }
 0x189   : > { %4285 = vmatpush3.bf16.msra.mxu1 %v4732_v19  ;;  %v778_v19 = vld [vmem:[%s5591_s26 + $0x6b0] sm:$0xff] }
 0x18a   : > { %4286 = vmatprep.subr.bf16.mxu1 %v4733_v20  ;;  %4349 = vmatpush3.bf16.msra.mxu0 %v4744_v40  ;;  %v764_v20 = vld [vmem:[%s5591_s26 + $0x640] sm:$0xff]  ;;  %v831_v40 = vpack.c.bf16 %v591_v35, %v575_v34 }
 0x18b   : > { %2319 = vmatmul.mubr.bf16.gmra.mrb[56].mxu1 %v858_v22  ;;  %2416 = vmatmul.mubr.bf16.gmra.mrb[56].mxu0 %v860_v23  ;;  %v795_v22 = vld [vmem:[%s5591_s26 + $0x738] sm:$0xff] }
 0x18c   : > { %2326 = vmatprep.mubr.bf16.mxu1 %v875_v24  ;;  %2423 = vmatprep.mubr.bf16.mxu0 %v877_v25  ;;  %v811_v23 = vld [vmem:[%s5591_s26 + $0x7b8] sm:$0xff]  ;;  %v797_v24 = vld [vmem:[%s5591_s26 + $0x748] sm:$0xff] }
 0x18d   : > { %4287 = vmatpush3.bf16.msra.mxu1 %v4734_v26  ;;  %4350 = vmatprep.subr.bf16.mxu0 %v4747_v51  ;;  %v813_v25 = vld [vmem:[%s5591_s26 + $0x7c8] sm:$0xff]  ;;  %v922_v26 = vpack.c.bf16 %v778_v19, %v762_v18  ;;  %v939_v28 = vpack.c.bf16 %v811_v23, %v795_v22  ;;  %v4766_v22 = vld [vmem:[#allocation9 + $0x3a0] sm:$0xff]  }
 0x18e   : > { %4288 = vmatprep.subr.bf16.mxu1 %v4739_v27  ;;  %4351 = vmatpush3.bf16.msra.mxu0 %v4748_v54  ;;  %v924_v27 = vpack.c.bf16 %v780_v21, %v764_v20  ;;  %v941_v29 = vpack.c.bf16 %v813_v25, %v797_v24  ;;  %v4759_v54 = vld [vmem:[#allocation9 + $0x3c8] sm:$0xff]   ;;  %v670_v24 = vld [vmem:[%s5591_s26 + $0x350] sm:$0xff] }
 0x18f   : > { %4352 = vmatprep.subr.bf16.mxu0 %v4749_v56  ;;  %v606_v56 = vld [vmem:[%s5591_s26 + $0x150] sm:$0xff]  ;;  %v4767_v23 = vld [vmem:[#allocation9 + $0x3e8] sm:$0xff]  }
 0x190   : > { %v846_v2 = vpack.c.bf16 %v622_v57, %v606_v56  ;;  %v686_v25 = vld [vmem:[%s5591_s26 + $0x3d0] sm:$0xff]  ;;  %v752_v56 = vld [vmem:[%s5591_s26 + $0x5e0] sm:$0xff]  ;;  %v767_v57 = vld [vmem:[%s5591_s26 + $0x658] sm:$0xff] }
 0x191   : > { %4289 = vmatpush3.bf16.msra.mxu1 %v4740_v39  ;;  %v940_v39 = vpack.c.bf16 %v812_v33, %v796_v32  ;;  %v4768_v32 = vld [vmem:[#allocation9 + $0x3a8] sm:$0xff]   ;;  %v4769_v33 = vld [vmem:[#allocation9 + $0x3f0] sm:$0xff]   ;;  %v878_v34 = vpack.c.bf16 %v686_v25, %v670_v24 }
 0x192   : > { %4290 = vmatprep.subr.bf16.mxu1 %v4745_v43  ;;  %4353 = vmatpush3.bf16.msra.mxu0 %v4750_v58  ;;  %v590_v43 = vld [vmem:[%s5591_s26 + $0xd0] sm:$0xff]  ;;  %v4760_v58 = vld [vmem:[#allocation9 + $0x388] sm:$0xff]  }
 0x193   : > { %2327 = vmatmul.mubr.bf16.gmra.mrb[60].mxu1 %v874_v41  ;;  %2424 = vmatmul.mubr.bf16.gmra.mrb[60].mxu0 %v876_v42  ;;  %v833_v41 = vpack.c.bf16 %v593_v37, %v577_v36  ;;  %v574_v42 = vld [vmem:[%s5591_s26 + $0x50] sm:$0xff] }
 0x194   : > { %2334 = vmatprep.mubr.bf16.mxu1 %v891_v44  ;;  %2431 = vmatprep.mubr.bf16.mxu0 %v893_v45  ;;  %v576_v44 = vld [vmem:[%s5591_s26 + $0x60] sm:$0xff]  ;;  %v830_v50 = vpack.c.bf16 %v590_v43, %v574_v42  ;;  %v4770_v36 = vld [vmem:[#allocation9 + $0x3b0] sm:$0xff]  }
 0x195   : > { %4291 = vmatpush3.bf16.msra.mxu1 %v4746_v46  ;;  %4354 = vmatprep.subr.bf16.mxu0 %v4753_v7  ;;  %v592_v45 = vld [vmem:[%s5591_s26 + $0xe0] sm:$0xff]  ;;  %v607_v46 = vld [vmem:[%s5591_s26 + $0x158] sm:$0xff] }
 0x196   : > { %4292 = vmatprep.subr.bf16.mxu1 %v4751_v61  ;;  %4355 = vmatpush3.bf16.msra.mxu0 %v4754_v8  ;;  %v832_v51 = vpack.c.bf16 %v592_v45, %v576_v44  ;;  %v847_v53 = vpack.c.bf16 %v623_v47, %v607_v46  ;;  %v639_v61 = vld [vmem:[%s5591_s26 + $0x258] sm:$0xff]  ;;  %v638_v8 = vld [vmem:[%s5591_s26 + $0x250] sm:$0xff]  ;;  %v704_v42 = vld [vmem:[%s5591_s26 + $0x460] sm:$0xff] }
 0x197   : > { %4356 = vmatprep.subr.bf16.mxu0 %v4755_v11  ;;  %v4763_v7 = vld [vmem:[#allocation9 + $0x3d8] sm:$0xff]   ;;  %v656_v11 = vld [vmem:[%s5591_s26 + $0x2e0] sm:$0xff]  ;;  %v862_v18 = vpack.c.bf16 %v654_v9, %v638_v8  ;;  %v737_v46 = vld [vmem:[%s5591_s26 + $0x568] sm:$0xff] }
 0x198   : > { %v864_v19 = vpack.c.bf16 %v656_v11, %v640_v10  ;;  %v720_v43 = vld [vmem:[%s5591_s26 + $0x4e0] sm:$0xff]  ;;  %v735_v44 = vld [vmem:[%s5591_s26 + $0x558] sm:$0xff]  ;;  %v753_v47 = vld [vmem:[%s5591_s26 + $0x5e8] sm:$0xff] }
 0x199   : > { %4293 = vmatpush3.bf16.msra.mxu1 %v4752_v0  ;;  %v641_v0 = vld [vmem:[%s5591_s26 + $0x268] sm:$0xff]  ;;  %v751_v45 = vld [vmem:[%s5591_s26 + $0x5d8] sm:$0xff] }
 0x19a   : > { %4357 = vmatpush3.bf16.msra.mxu0 %v4756_v12  ;;  %4406 = vmatprep.subr.bf16.mxu1 %v4757_v17  ;;  %v865_v5 = vpack.c.bf16 %v657_v1, %v641_v0  ;;  %v671_v12 = vld [vmem:[%s5591_s26 + $0x358] sm:$0xff]  ;;  %v4765_v17 = vld [vmem:[#allocation9 + $0x3e0] sm:$0xff]   ;;  %v766_v1 = vld [vmem:[%s5591_s26 + $0x650] sm:$0xff] }
 0x19b   : > { %2335 = vmatmul.mubr.bf16.gmra.mrb[64].mxu1 %v890_v59  ;;  %2432 = vmatmul.mubr.bf16.gmra.mrb[64].mxu0 %v892_v60  ;;  %v608_v59 = vld [vmem:[%s5591_s26 + $0x160] sm:$0xff]  ;;  %v817_v8 = vld [vmem:[%s5591_s26 + $0x7e8] sm:$0xff] }
 0x19c   : > { %2342 = vmatprep.mubr.bf16.mxu1 %v907_v62  ;;  %2439 = vmatprep.mubr.bf16.mxu0 %v909_v63  ;;  %v624_v60 = vld [vmem:[%s5591_s26 + $0x1e0] sm:$0xff]  ;;  %v655_v62 = vld [vmem:[%s5591_s26 + $0x2d8] sm:$0xff]  ;;  %v4761_v63 = vld [vmem:[#allocation9 + $0x3d0] sm:$0xff]  }
 0x19d   : > { %v848_v3 = vpack.c.bf16 %v624_v60, %v608_v59  ;;  %v863_v4 = vpack.c.bf16 %v655_v62, %v639_v61  ;;  %v769_v59 = vld [vmem:[%s5591_s26 + $0x668] sm:$0xff] }
 0x19e   : > { %v785_v60 = vld [vmem:[%s5591_s26 + $0x6e8] sm:$0xff] }
 0x19f   : > { %v929_v0 = vpack.c.bf16 %v785_v60, %v769_v59 }
 0x1a3   : > { %2343 = vmatmul.mubr.bf16.gmra.mrb[68].mxu1 %v906_v13  ;;  %2440 = vmatmul.mubr.bf16.gmra.mrb[68].mxu0 %v908_v14  ;;  %v687_v13 = vld [vmem:[%s5591_s26 + $0x3d8] sm:$0xff]  ;;  %v673_v14 = vld [vmem:[%s5591_s26 + $0x368] sm:$0xff] }
 0x1a4   : > { %2350 = vmatprep.mubr.bf16.mxu1 %v923_v15  ;;  %2447 = vmatprep.mubr.bf16.mxu0 %v925_v16  ;;  %v689_v15 = vld [vmem:[%s5591_s26 + $0x3e8] sm:$0xff]  ;;  %v4764_v16 = vld [vmem:[#allocation9 + $0x398] sm:$0xff]   ;;  %v879_v20 = vpack.c.bf16 %v687_v13, %v671_v12  ;;  %v798_v13 = vld [vmem:[%s5591_s26 + $0x750] sm:$0xff] }
 0x1a5   : > { %v881_v21 = vpack.c.bf16 %v689_v15, %v673_v14  ;;  %v814_v14 = vld [vmem:[%s5591_s26 + $0x7d0] sm:$0xff]  ;;  %v800_v15 = vld [vmem:[%s5591_s26 + $0x760] sm:$0xff] }
 0x1ab   : > { %2351 = vmatmul.mubr.bf16.gmra.mrb[72].mxu1 %v922_v26  ;;  %2448 = vmatmul.mubr.bf16.gmra.mrb[72].mxu0 %v924_v27  ;;  %v672_v26 = vld [vmem:[%s5591_s26 + $0x360] sm:$0xff] }
 0x1ac   : > { %2358 = vmatprep.mubr.bf16.mxu1 %v939_v28  ;;  %2455 = vmatprep.mubr.bf16.mxu0 %v941_v29  ;;  %v688_v27 = vld [vmem:[%s5591_s26 + $0x3e0] sm:$0xff]  ;;  %v703_v28 = vld [vmem:[%s5591_s26 + $0x458] sm:$0xff] }
 0x1ad   : > { %v719_v29 = vld [vmem:[%s5591_s26 + $0x4d8] sm:$0xff]  ;;  %v880_v35 = vpack.c.bf16 %v688_v27, %v672_v26 }
 0x1ae   : > { %v895_v37 = vpack.c.bf16 %v719_v29, %v703_v28 }
 0x1b3   : > { %2359 = vmatmul.mubr.bf16.gmra.mrb[76].mxu1 %v938_v38  ;;  %2456 = vmatmul.mubr.bf16.gmra.mrb[76].mxu0 %v940_v39  ;;  %v897_v38 = vpack.c.bf16 %v721_v31, %v705_v30  ;;  %v4771_v39 = vld [vmem:[#allocation9 + $0x3f8] sm:$0xff]  }
 0x1b4   : > { %2496 = vmatprep.mubr.bf16.mxu1 %v831_v40  ;;  %2593 = vmatprep.mubr.bf16.mxu0 %v833_v41  ;;  %v702_v40 = vld [vmem:[%s5591_s26 + $0x450] sm:$0xff] }
 0x1b5   : > { %v718_v41 = vld [vmem:[%s5591_s26 + $0x4d0] sm:$0xff] }
 0x1b6   : > { %v894_v49 = vpack.c.bf16 %v718_v41, %v702_v40 }
 0x1bb   : > { %2497 = vmatmul.mubr.bf16.vlgmr.msra.gmra.mrb[80].mxu1 %v830_v50  ;;  %2594 = vmatmul.mubr.bf16.vlgmr.msra.gmra.mrb[80].mxu0 %v832_v51  ;;  %v896_v50 = vpack.c.bf16 %v720_v43, %v704_v42  ;;  %v911_v51 = vpack.c.bf16 %v751_v45, %v735_v44 }
 0x1bc   : > { %4407 = vmatpush3.bf16.msra.mxu1 %v4758_v52  ;;  %2504 = vmatprep.mubr.bf16.mxu1 %v847_v53  ;;  %v913_v52 = vpack.c.bf16 %v753_v47, %v737_v46  ;;  %v734_v53 = vld [vmem:[%s5591_s26 + $0x550] sm:$0xff] }
 0x1bd   : > { %4408 = vmatprep.subr.bf16.mxu1 %v4759_v54  ;;  %2601 = vmatprep.mubr.bf16.mxu0 %v849_v55  ;;  %v750_v54 = vld [vmem:[%s5591_s26 + $0x5d0] sm:$0xff]  ;;  %v736_v55 = vld [vmem:[%s5591_s26 + $0x560] sm:$0xff] }
 0x1be   : > { %v910_v61 = vpack.c.bf16 %v750_v54, %v734_v53  ;;  %v912_v62 = vpack.c.bf16 %v752_v56, %v736_v55  ;;  %v626_v53 = vld [vmem:[%s5591_s26 + $0x1f0] sm:$0xff]  ;;  %v643_v54 = vld [vmem:[%s5591_s26 + $0x278] sm:$0xff] }
 0x1bf   : > { %v659_v55 = vld [vmem:[%s5591_s26 + $0x2f8] sm:$0xff] }
 0x1c0   : > { %4409 = vmatpush3.bf16.msra.mxu1 %v4760_v58  ;;  %v783_v58 = vld [vmem:[%s5591_s26 + $0x6d8] sm:$0xff] }
 0x1c1   : > { %4410 = vmatprep.subr.bf16.mxu1 %v4761_v63  ;;  %v927_v63 = vpack.c.bf16 %v783_v58, %v767_v57 }
 0x1c3   : > { %2505 = vmatmul.mubr.bf16.gmra.mrb[84].mxu1 %v846_v2  ;;  %2602 = vmatmul.mubr.bf16.gmra.mrb[84].mxu0 %v848_v3  ;;  %v782_v2 = vld [vmem:[%s5591_s26 + $0x6d0] sm:$0xff]  ;;  %v768_v3 = vld [vmem:[%s5591_s26 + $0x660] sm:$0xff] }
 0x1c4   : > { %2512 = vmatprep.mubr.bf16.mxu1 %v863_v4  ;;  %2609 = vmatprep.mubr.bf16.mxu0 %v865_v5  ;;  %v784_v4 = vld [vmem:[%s5591_s26 + $0x6e0] sm:$0xff]  ;;  %v799_v5 = vld [vmem:[%s5591_s26 + $0x758] sm:$0xff]  ;;  %v926_v9 = vpack.c.bf16 %v782_v2, %v766_v1  ;;  %v867_v1 = vpack.c.bf16 %v659_v55, %v643_v54  ;;  %v706_v55 = vld [vmem:[%s5591_s26 + $0x470] sm:$0xff] }
 0x1c5   : > { %4411 = vmatpush3.bf16.msra.mxu1 %v4762_v6  ;;  %v815_v6 = vld [vmem:[%s5591_s26 + $0x7d8] sm:$0xff]  ;;  %v928_v10 = vpack.c.bf16 %v784_v4, %v768_v3 }
 0x1c6   : > { %4412 = vmatprep.subr.bf16.mxu1 %v4763_v7  ;;  %v801_v7 = vld [vmem:[%s5591_s26 + $0x768] sm:$0xff]  ;;  %v943_v11 = vpack.c.bf16 %v815_v6, %v799_v5  ;;  %v642_v6 = vld [vmem:[%s5591_s26 + $0x270] sm:$0xff] }
 0x1c7   : > { %v945_v12 = vpack.c.bf16 %v817_v8, %v801_v7  ;;  %v658_v7 = vld [vmem:[%s5591_s26 + $0x2f0] sm:$0xff]  ;;  %v675_v8 = vld [vmem:[%s5591_s26 + $0x378] sm:$0xff] }
 0x1c9   : > { %4413 = vmatpush3.bf16.msra.mxu1 %v4764_v16  ;;  %v816_v16 = vld [vmem:[%s5591_s26 + $0x7e0] sm:$0xff] }
 0x1ca   : > { %4414 = vmatprep.subr.bf16.mxu1 %v4765_v17  ;;  %v579_v17 = vld [vmem:[%s5591_s26 + $0x78] sm:$0xff] }
 0x1cb   : > { %2513 = vmatmul.mubr.bf16.gmra.mrb[88].mxu1 %v862_v18  ;;  %2610 = vmatmul.mubr.bf16.gmra.mrb[88].mxu0 %v864_v19  ;;  %v595_v18 = vld [vmem:[%s5591_s26 + $0xf8] sm:$0xff] }
 0x1cc   : > { %2520 = vmatprep.mubr.bf16.mxu1 %v879_v20  ;;  %2617 = vmatprep.mubr.bf16.mxu0 %v881_v21  ;;  %v835_v27 = vpack.c.bf16 %v595_v18, %v579_v17 }
 0x1cd   : > { %4415 = vmatpush3.bf16.msra.mxu1 %v4766_v22  ;;  %v942_v22 = vpack.c.bf16 %v814_v14, %v798_v13  ;;  %v866_v13 = vpack.c.bf16 %v658_v7, %v642_v6 }
 0x1ce   : > { %4416 = vmatprep.subr.bf16.mxu1 %v4767_v23  ;;  %v944_v23 = vpack.c.bf16 %v816_v16, %v800_v15 }
 0x1d1   : > { %4417 = vmatpush3.bf16.msra.mxu1 %v4768_v32 }
 0x1d2   : > { %4418 = vmatprep.subr.bf16.mxu1 %v4769_v33 }
 0x1d3   : > { %2521 = vmatmul.mubr.bf16.gmra.mrb[92].mxu1 %v878_v34  ;;  %2618 = vmatmul.mubr.bf16.gmra.mrb[92].mxu0 %v880_v35  ;;  %v578_v34 = vld [vmem:[%s5591_s26 + $0x70] sm:$0xff] }
 0x1d4   : > { %2528 = vmatprep.mubr.bf16.mxu1 %v895_v37  ;;  %2625 = vmatprep.mubr.bf16.mxu0 %v897_v38  ;;  %v594_v35 = vld [vmem:[%s5591_s26 + $0xf0] sm:$0xff]  ;;  %v627_v37 = vld [vmem:[%s5591_s26 + $0x1f8] sm:$0xff] }
 0x1d5   : > { %4419 = vmatpush3.bf16.msra.mxu1 %v4770_v36  ;;  %v611_v36 = vld [vmem:[%s5591_s26 + $0x178] sm:$0xff]  ;;  %v834_v41 = vpack.c.bf16 %v594_v35, %v578_v34 }
 0x1d6   : > { %4420 = vmatprep.subr.bf16.mxu1 %v4771_v39  ;;  %v851_v45 = vpack.c.bf16 %v627_v37, %v611_v36 }
 0x1d9   : > { %4421 = vmatpush3.bf16.msra.mxu1 %v4772_v48 }
 0x1db   : > { %2529 = vmatmul.mubr.bf16.gmra.mrb[96].mxu1 %v894_v49  ;;  %2626 = vmatmul.mubr.bf16.gmra.mrb[96].mxu0 %v896_v50 }
 0x1dc   : > { %2536 = vmatprep.mubr.bf16.mxu1 %v911_v51  ;;  %2633 = vmatprep.mubr.bf16.mxu0 %v913_v52  ;;  %v610_v52 = vld [vmem:[%s5591_s26 + $0x170] sm:$0xff] }
 0x1dd   : > { %v850_v59 = vpack.c.bf16 %v626_v53, %v610_v52 }
 0x1e3   : > { %2537 = vmatmul.mubr.bf16.gmra.mrb[100].mxu1 %v910_v61  ;;  %2634 = vmatmul.mubr.bf16.gmra.mrb[100].mxu0 %v912_v62 }
 0x1e4   : > { %2544 = vmatprep.mubr.bf16.mxu1 %v927_v63  ;;  %2641 = vmatprep.mubr.bf16.mxu0 %v929_v0 }
 0x1eb   : > { %2545 = vmatmul.mubr.bf16.gmra.mrb[104].mxu1 %v926_v9  ;;  %2642 = vmatmul.mubr.bf16.gmra.mrb[104].mxu0 %v928_v10  ;;  %v691_v9 = vld [vmem:[%s5591_s26 + $0x3f8] sm:$0xff] }
 0x1ec   : > { %2552 = vmatprep.mubr.bf16.mxu1 %v943_v11  ;;  %2649 = vmatprep.mubr.bf16.mxu0 %v945_v12 }
 0x1ee   : > { %v3998_v19 = vpop.f32.mrb[0].mxu1  ;;  %v3974_v20 = vpop.f32.mrb[0].mxu0 }
 0x1ef   : > { %v3999_v21 = vpop.f32.mrb[1].mxu1  ;;  %v3975_v24 = vpop.f32.mrb[1].mxu0 }
 0x1f0   : > { %v5853_v25 = vadd.f32 %v3999_v21, %v3998_v19  ;;  %v4001_v26 = vpop.f32.mrb[2].mxu1  ;;  %v5855_v28 = vadd.f32 %v3975_v24, %v3974_v20  ;;  %v3977_v29 = vpop.f32.mrb[2].mxu0  ;;  %v883_v19 = vpack.c.bf16 %v691_v9, %v675_v8  ;;  %v674_v24 = vld [vmem:[%s5591_s26 + $0x370] sm:$0xff] }
 0x1f1   : > { %v4002_v30 = vpop.f32.mrb[3].mxu1  ;;  %v3978_v31 = vpop.f32.mrb[3].mxu0 }
 0x1f2   : > { %v5857_v32 = vadd.f32 %v4002_v30, %v4001_v26  ;;  %v5859_v33 = vadd.f32 %v3978_v31, %v3977_v29  ;;  %v690_v26 = vld [vmem:[%s5591_s26 + $0x3f0] sm:$0xff]  ;;  %v707_v29 = vld [vmem:[%s5591_s26 + $0x478] sm:$0xff] }
 0x1f3   : > { %2553 = vmatmul.mubr.bf16.gmra.mrb[108].mxu1 %v942_v22  ;;  %2650 = vmatmul.mubr.bf16.gmra.mrb[108].mxu0 %v944_v23  ;;  %v723_v30 = vld [vmem:[%s5591_s26 + $0x4f8] sm:$0xff] }
 0x1f4   : > { %2690 = vmatprep.mubr.bf16.mxu1 %v835_v27  ;;  %v5899_v27 = vld [vmem:[#allocation11] ss:$0 sm:$0xff] }
 0x1f5   : > { %v2014_v31 = vadd.f32 %v5855_v28, %v5899_v27 }
 0x1f6   : > { %v4004_v38 = vpop.f32.mrb[4].mxu1  ;;  %v3980_v39 = vpop.f32.mrb[4].mxu0 }
 0x1f7   : > { %v4005_v40 = vpop.f32.mrb[5].mxu1  ;;  %v3981_v42 = vpop.f32.mrb[5].mxu0 }
 0x1f8   : > { %v5865_v43 = vadd.f32 %v4005_v40, %v4004_v38  ;;  %v4007_v44 = vpop.f32.mrb[6].mxu1  ;;  %v5867_v46 = vadd.f32 %v3981_v42, %v3980_v39  ;;  %v3983_v47 = vpop.f32.mrb[6].mxu0  ;;  %v882_v38 = vpack.c.bf16 %v690_v26, %v674_v24  ;;  %v2017_v39 = vadd.f32 %v5859_v33, %v5899_v27  ;;  %v722_v33 = vld [vmem:[%s5591_s26 + $0x4f0] sm:$0xff]  ;;  %v771_v24 = vld [vmem:[%s5591_s26 + $0x678] sm:$0xff] }
 0x1f9   : > { %v4008_v48 = vpop.f32.mrb[7].mxu1  ;;  %v3984_v49 = vpop.f32.mrb[7].mxu0  ;;  %v787_v26 = vld [vmem:[%s5591_s26 + $0x6f8] sm:$0xff] }
 0x1fa   : > { %v5869_v50 = vadd.f32 %v4008_v48, %v4007_v44  ;;  %v5871_v51 = vadd.f32 %v3984_v49, %v3983_v47 }
 0x1fb   : > { %2691 = vmatmul.mubr.bf16.vlgmr.msra.gmra.mrb[112].mxu1 %v834_v41 }
 0x1fc   : > { %2698 = vmatprep.mubr.bf16.mxu1 %v851_v45  ;;  %v899_v45 = vpack.c.bf16 %v723_v30, %v707_v29 }
 0x1fe   : > { %v4010_v56 = vpop.f32.mrb[8].mxu1  ;;  %v3986_v57 = vpop.f32.mrb[8].mxu0 }
 0x1ff   : > { %v4011_v58 = vpop.f32.mrb[9].mxu1  ;;  %v3987_v60 = vpop.f32.mrb[9].mxu0 }
 0x200   : > { %v5877_v61 = vadd.f32 %v4011_v58, %v4010_v56  ;;  %v4013_v62 = vpop.f32.mrb[10].mxu1  ;;  %v5879_v63 = vadd.f32 %v3987_v60, %v3986_v57  ;;  %v3989_v0 = vpop.f32.mrb[10].mxu0  ;;  %v739_v56 = vld [vmem:[%s5591_s26 + $0x578] sm:$0xff]  ;;  %v2022_v58 = vadd.f32 %v5867_v46, %v5899_v27 }
 0x201   : > { %v4014_v2 = vpop.f32.mrb[11].mxu1  ;;  %v3990_v3 = vpop.f32.mrb[11].mxu0  ;;  %v755_v57 = vld [vmem:[%s5591_s26 + $0x5f8] sm:$0xff] }
 0x202   : > { %v5881_v4 = vadd.f32 %v4014_v2, %v4013_v62  ;;  %v5883_v5 = vadd.f32 %v3990_v3, %v3989_v0  ;;  %v898_v2 = vpack.c.bf16 %v722_v33, %v706_v55  ;;  %v2025_v3 = vadd.f32 %v5871_v51, %v5899_v27  ;;  %v738_v51 = vld [vmem:[%s5591_s26 + $0x570] sm:$0xff] }
 0x203   : > { %2699 = vmatmul.mubr.bf16.gmra.mrb[116].mxu1 %v850_v59  ;;  %v2030_v29 = vadd.f32 %v5879_v63, %v5899_v27  ;;  %v786_v33 = vld [vmem:[%s5591_s26 + $0x6f0] sm:$0xff] }
 0x204   : > { %2706 = vmatprep.mubr.bf16.mxu1 %v867_v1 }
 0x206   : > { %v4016_v10 = vpop.f32.mrb[12].mxu1  ;;  %v3992_v11 = vpop.f32.mrb[12].mxu0 }
 0x207   : > { %v4017_v12 = vpop.f32.mrb[13].mxu1  ;;  %v3993_v14 = vpop.f32.mrb[13].mxu0 }
 0x208   : > { %v5889_v15 = vadd.f32 %v4017_v12, %v4016_v10  ;;  %v4019_v16 = vpop.f32.mrb[14].mxu1  ;;  %v5891_v17 = vadd.f32 %v3993_v14, %v3992_v11  ;;  %v3995_v18 = vpop.f32.mrb[14].mxu0  ;;  %v915_v10 = vpack.c.bf16 %v755_v57, %v739_v56  ;;  %v803_v56 = vld [vmem:[%s5591_s26 + $0x778] sm:$0xff] }
 0x209   : > { %v4020_v20 = vpop.f32.mrb[15].mxu1  ;;  %v3996_v21 = vpop.f32.mrb[15].mxu0  ;;  %v819_v57 = vld [vmem:[%s5591_s26 + $0x7f8] sm:$0xff] }
 0x20a   : > { %v5893_v22 = vadd.f32 %v4020_v20, %v4019_v16  ;;  %v5895_v23 = vadd.f32 %v3996_v21, %v3995_v18  ;;  %v4773_v16 = vld [vmem:[#allocation12] ss:$8 sps:$4 sm:$0xff]   ;;  %v4775_v18 = vld [vmem:[#allocation12 + $0x4] ss:$8 sps:$4 sm:$0xff]  }
 0x20b   : > { %2707 = vmatmul.mubr.bf16.gmra.mrb[120].mxu1 %v866_v13  ;;  %v754_v21 = vld [vmem:[%s5591_s26 + $0x5f0] sm:$0xff]  ;;  %2919 = vmatprep.subr.bf16.mxu0 %v4775_v18 }
 0x20c   : > { %2714 = vmatprep.mubr.bf16.mxu1 %v883_v19  ;;  %2920 = vmatpush1.bf16.msra.mxu0 %v4773_v16  ;;  %v4779_v16 = vld [vmem:[#allocation12 + $0x20] ss:$8 sps:$4 sm:$0xff]   ;;  %v4781_v18 = vld [vmem:[#allocation12 + $0x24] ss:$8 sps:$4 sm:$0xff]  }
 0x20e   : > { %v4038_v34 = vpop.f32.mrb[16].mxu1  ;;  %v4102_v35 = vpop.f32.mrb[16].mxu0 }
 0x20f   : > { %v4039_v36 = vpop.f32.mrb[17].mxu1  ;;  %v4103_v37 = vpop.f32.mrb[17].mxu0 }
 0x210   : > { %v4040_v40 = vadd.f32 %v4039_v36, %v4038_v34  ;;  %v4041_v41 = vpop.f32.mrb[18].mxu1  ;;  %v4104_v42 = vadd.f32 %v4103_v37, %v4102_v35  ;;  %v4105_v44 = vpop.f32.mrb[18].mxu0  ;;  %v914_v37 = vpack.c.bf16 %v754_v21, %v738_v51  ;;  %v818_v21 = vld [vmem:[%s5591_s26 + $0x7f0] sm:$0xff] }
 0x211   : > { %v4042_v47 = vpop.f32.mrb[19].mxu1  ;;  %v4106_v48 = vpop.f32.mrb[19].mxu0 }
 0x212   : > { %v2111_v28 = vadd.f32 %v4040_v40, %v2014_v31  ;;  %v4043_v49 = vadd.f32 %v4042_v47, %v4041_v41  ;;  %v4107_v52 = vadd.f32 %v4106_v48, %v4105_v44  ;;  %v931_v44 = vpack.c.bf16 %v787_v26, %v771_v24 }
 0x213   : > { %2715 = vmatmul.mubr.bf16.gmra.mrb[124].mxu1 %v882_v38  ;;  %v2033_v38 = vadd.f32 %v5883_v5, %v5899_v27  ;;  %v770_v5 = vld [vmem:[%s5591_s26 + $0x670] sm:$0xff] }
 0x214   : > { %v2114_v53 = vadd.f32 %v4043_v49, %v2017_v39  ;;  %v5907_v54 = vadd.f32 %v4104_v42, %v2111_v28  ;;  %2722 = vmatprep.mubr.bf16.mxu1 %v899_v45  ;;  %v4776_v49 = vld [vmem:[#allocation12 + $0x10] ss:$8 sps:$4 sm:$0xff]  }
 0x216   : > { %v5915_v59 = vadd.f32 %v4107_v52, %v2114_v53  ;;  %v4044_v60 = vpop.f32.mrb[20].mxu1  ;;  %v4108_v62 = vpop.f32.mrb[20].mxu0  ;;  %v4778_v52 = vld [vmem:[#allocation12 + $0x14] ss:$8 sps:$4 sm:$0xff]  }
 0x217   : > { %v4045_v0 = vpop.f32.mrb[21].mxu1  ;;  %v4109_v1 = vpop.f32.mrb[21].mxu0  ;;  %2921 = vmatprep.subr.bf16.mxu0 %v4778_v52 }
 0x218   : > { %v4046_v6 = vadd.f32 %v4045_v0, %v4044_v60  ;;  %v4047_v7 = vpop.f32.mrb[22].mxu1  ;;  %v4110_v8 = vadd.f32 %v4109_v1, %v4108_v62  ;;  %v4111_v9 = vpop.f32.mrb[22].mxu0  ;;  %2922 = vmatpush1.bf16.msra.mxu0 %v4776_v49 }
 0x219   : > { %v4048_v46 = vpop.f32.mrb[23].mxu1  ;;  %v4112_v11 = vpop.f32.mrb[23].mxu0  ;;  %2923 = vmatprep.subr.bf16.mxu0 %v4781_v18 }
 0x21a   : > { %v2119_v12 = vadd.f32 %v4046_v6, %v2022_v58  ;;  %v4049_v13 = vadd.f32 %v4048_v46, %v4047_v7  ;;  %v4113_v14 = vadd.f32 %v4112_v11, %v4111_v9  ;;  %v2038_v58 = vadd.f32 %v5891_v17, %v5899_v27 }
 0x21b   : > { %2723 = vmatmul.mubr.bf16.gmra.mrb[128].mxu1 %v898_v2  ;;  %v2041_v6 = vadd.f32 %v5895_v23, %v5899_v27  ;;  %v947_v46 = vpack.c.bf16 %v819_v57, %v803_v56  ;;  %v802_v23 = vld [vmem:[%s5591_s26 + $0x770] sm:$0xff] }
 0x21c   : > { %v2122_v19 = vadd.f32 %v4049_v13, %v2025_v3  ;;  %v5919_v20 = vadd.f32 %v4110_v8, %v2119_v12  ;;  %2730 = vmatprep.mubr.bf16.mxu1 %v915_v10  ;;  %v930_v3 = vpack.c.bf16 %v786_v33, %v770_v5  ;;  %2924 = vmatpush1.bf16.msra.mxu0 %v4779_v16 }
 0x21d   : > { %v2062_v16 = vadd.f32 %v5877_v61, %v5899_v27 }
 0x21e   : > { %v5927_v30 = vadd.f32 %v4113_v14, %v2122_v19  ;;  %v4050_v31 = vpop.f32.mrb[24].mxu1  ;;  %v4114_v34 = vpop.f32.mrb[24].mxu0 }
 0x21f   : > { %v4051_v35 = vpop.f32.mrb[25].mxu1  ;;  %v4115_v36 = vpop.f32.mrb[25].mxu0 }
 0x220   : > { %v4052_v39 = vadd.f32 %v4051_v35, %v4050_v31  ;;  %v4053_v40 = vpop.f32.mrb[26].mxu1  ;;  %v4116_v41 = vadd.f32 %v4115_v36, %v4114_v34  ;;  %v4117_v42 = vpop.f32.mrb[26].mxu0  ;;  %v946_v35 = vpack.c.bf16 %v818_v21, %v802_v23  ;;  %v2046_v36 = vadd.f32 %v5853_v25, %v5899_v27 }
 0x221   : > { %v4054_v63 = vpop.f32.mrb[27].mxu1  ;;  %v4118_v45 = vpop.f32.mrb[27].mxu0 }
 0x222   : > { %v2127_v47 = vadd.f32 %v4052_v39, %v2030_v29  ;;  %v4055_v48 = vadd.f32 %v4054_v63, %v4053_v40  ;;  %v4119_v28 = vadd.f32 %v4118_v45, %v4117_v42 }
 0x223   : > { %2731 = vmatmul.mubr.bf16.gmra.mrb[132].mxu1 %v914_v37 }
 0x224   : > { %v2130_v53 = vadd.f32 %v4055_v48, %v2033_v38  ;;  %v5931_v55 = vadd.f32 %v4116_v41, %v2127_v47  ;;  %2738 = vmatprep.mubr.bf16.mxu1 %v931_v44  ;;  %v2049_v44 = vadd.f32 %v5857_v32, %v5899_v27  ;;  %v4782_v48 = vld [vmem:[#allocation12 + $0x30] ss:$8 sps:$4 sm:$0xff]   ;;  %v2054_v32 = vadd.f32 %v5865_v43, %v5899_v27 }
 0x226   : > { %v5939_v60 = vadd.f32 %v4119_v28, %v2130_v53  ;;  %v4056_v62 = vpop.f32.mrb[28].mxu1  ;;  %v4120_v0 = vpop.f32.mrb[28].mxu0  ;;  %v4784_v28 = vld [vmem:[#allocation12 + $0x34] ss:$8 sps:$4 sm:$0xff]  }
 0x227   : > { %v4057_v1 = vpop.f32.mrb[29].mxu1  ;;  %v4121_v2 = vpop.f32.mrb[29].mxu0  ;;  %2925 = vmatprep.subr.bf16.mxu0 %v4784_v28 }
 0x228   : > { %v4058_v7 = vadd.f32 %v4057_v1, %v4056_v62  ;;  %v4059_v8 = vpop.f32.mrb[30].mxu1  ;;  %v4122_v9 = vadd.f32 %v4121_v2, %v4120_v0  ;;  %v4123_v10 = vpop.f32.mrb[30].mxu0  ;;  %2926 = vmatpush1.bf16.msra.mxu0 %v4782_v48 }
 0x229   : > { %v4060_v11 = vpop.f32.mrb[31].mxu1  ;;  %v4124_v12 = vpop.f32.mrb[31].mxu0 }
 0x22a   : > { %v2135_v17 = vadd.f32 %v4058_v7, %v2038_v58  ;;  %v4061_v13 = vadd.f32 %v4060_v11, %v4059_v8  ;;  %v4125_v14 = vadd.f32 %v4124_v12, %v4123_v10  ;;  %v4787_v10 = vld [vmem:[#allocation12 + $0x44] ss:$8 sps:$4 sm:$0xff]  }
 0x22b   : > { %2739 = vmatmul.mubr.bf16.gmra.mrb[136].mxu1 %v930_v3  ;;  %v2057_v3 = vadd.f32 %v5869_v50, %v5899_v27  ;;  %2927 = vmatprep.subr.bf16.mxu0 %v4787_v10 }
 0x22c   : > { %v2138_v19 = vadd.f32 %v4061_v13, %v2041_v6  ;;  %v5943_v51 = vadd.f32 %v4122_v9, %v2135_v17  ;;  %2746 = vmatprep.mubr.bf16.mxu1 %v947_v46  ;;  %v4785_v9 = vld [vmem:[#allocation12 + $0x40] ss:$8 sps:$4 sm:$0xff]  }
 0x22d   : > { %2928 = vmatpush1.bf16.msra.mxu0 %v4785_v9 }
 0x22e   : > { %v5947_v24 = vadd.f32 %v4125_v14, %v2138_v19  ;;  %v4062_v26 = vpop.f32.mrb[32].mxu1  ;;  %v4126_v29 = vpop.f32.mrb[32].mxu0 }
 0x22f   : > { %v4063_v31 = vpop.f32.mrb[33].mxu1  ;;  %v4127_v34 = vpop.f32.mrb[33].mxu0 }
 0x230   : > { %v4064_v37 = vadd.f32 %v4063_v31, %v4062_v26  ;;  %v4065_v38 = vpop.f32.mrb[34].mxu1  ;;  %v4128_v39 = vadd.f32 %v4127_v34, %v4126_v29  ;;  %v4129_v40 = vpop.f32.mrb[34].mxu0  ;;  %v2065_v29 = vadd.f32 %v5881_v4, %v5899_v27 }
 0x231   : > { %v4066_v41 = vpop.f32.mrb[35].mxu1  ;;  %v4130_v42 = vpop.f32.mrb[35].mxu0 }
 0x232   : > { %v2143_v63 = vadd.f32 %v4064_v37, %v2046_v36  ;;  %v4067_v45 = vadd.f32 %v4066_v41, %v4065_v38  ;;  %v4131_v47 = vadd.f32 %v4130_v42, %v4129_v40  ;;  %v4788_v36 = vld [vmem:[#allocation12 + $0x50] ss:$8 sps:$4 sm:$0xff]   ;;  %v4790_v37 = vld [vmem:[#allocation12 + $0x54] ss:$8 sps:$4 sm:$0xff]  }
 0x233   : > { %2747 = vmatmul.mubr.bf16.gmra.mrb[140].mxu1 %v946_v35  ;;  %2929 = vmatprep.subr.bf16.mxu0 %v4790_v37 }
 0x234   : > { %v2146_v49 = vadd.f32 %v4067_v45, %v2049_v44  ;;  %v5953_v52 = vadd.f32 %v4128_v39, %v2143_v63  ;;  %2930 = vmatpush1.bf16.msra.mxu0 %v4788_v36  ;;  %v2070_v63 = vadd.f32 %v5889_v15, %v5899_v27 }
 0x236   : > { %v5955_v25 = vadd.f32 %v4131_v47, %v2146_v49  ;;  %v4068_v53 = vpop.f32.mrb[36].mxu1  ;;  %v4132_v5 = vpop.f32.mrb[36].mxu0 }
 0x237   : > { %v4069_v33 = vpop.f32.mrb[37].mxu1  ;;  %v4133_v56 = vpop.f32.mrb[37].mxu0 }
 0x238   : > { %v4070_v57 = vadd.f32 %v4069_v33, %v4068_v53  ;;  %v4071_v58 = vpop.f32.mrb[38].mxu1  ;;  %v4134_v62 = vadd.f32 %v4133_v56, %v4132_v5  ;;  %v4135_v0 = vpop.f32.mrb[38].mxu0  ;;  %v2073_v53 = vadd.f32 %v5893_v22, %v5899_v27 }
 0x239   : > { %v4072_v1 = vpop.f32.mrb[39].mxu1  ;;  %v4136_v2 = vpop.f32.mrb[39].mxu0 }
 0x23a   : > { %v2151_v6 = vadd.f32 %v4070_v57, %v2054_v32  ;;  %v4073_v7 = vadd.f32 %v4072_v1, %v4071_v58  ;;  %v4137_v8 = vadd.f32 %v4136_v2, %v4135_v0  ;;  %v4791_v32 = vld [vmem:[#allocation12 + $0x60] ss:$8 sps:$4 sm:$0xff]   ;;  %v4793_v57 = vld [vmem:[#allocation12 + $0x64] ss:$8 sps:$4 sm:$0xff]  }
 0x23b   : > { %2931 = vmatprep.subr.bf16.mxu0 %v4793_v57 }
 0x23c   : > { %v2154_v46 = vadd.f32 %v4073_v7, %v2057_v3  ;;  %v5961_v11 = vadd.f32 %v4134_v62, %v2151_v6  ;;  %2932 = vmatpush1.bf16.msra.mxu0 %v4791_v32 }
 0x23e   : > { %v5963_v43 = vadd.f32 %v4137_v8, %v2154_v46  ;;  %v4074_v12 = vpop.f32.mrb[40].mxu1  ;;  %v4138_v17 = vpop.f32.mrb[40].mxu0 }
 0x23f   : > { %v4075_v13 = vpop.f32.mrb[41].mxu1  ;;  %v4139_v14 = vpop.f32.mrb[41].mxu0 }
 0x240   : > { %v4076_v50 = vadd.f32 %v4075_v13, %v4074_v12  ;;  %v4077_v18 = vpop.f32.mrb[42].mxu1  ;;  %v4140_v19 = vadd.f32 %v4139_v14, %v4138_v17  ;;  %v4141_v23 = vpop.f32.mrb[42].mxu0  ;;  %v4794_v17 = vld [vmem:[#allocation12 + $0x70] ss:$8 sps:$4 sm:$0xff]   ;;  %v4796_v13 = vld [vmem:[#allocation12 + $0x74] ss:$8 sps:$4 sm:$0xff]  }
 0x241   : > { %v4078_v21 = vpop.f32.mrb[43].mxu1  ;;  %v4142_v26 = vpop.f32.mrb[43].mxu0  ;;  %2933 = vmatprep.subr.bf16.mxu0 %v4796_v13 }
 0x242   : > { %v2159_v31 = vadd.f32 %v4076_v50, %v2062_v16  ;;  %v4079_v34 = vadd.f32 %v4078_v21, %v4077_v18  ;;  %v4143_v35 = vadd.f32 %v4142_v26, %v4141_v23  ;;  %2934 = vmatpush1.bf16.msra.mxu0 %v4794_v17  ;;  %v5245_v26 = vmov 0  }
 0x243   : > { %2951 = vmatprep.mubr.bf16.mxu0 %v5245_v26  ;;  %4644 = vset.pattern.permute.xlu1 %v5245_v26 }
 0x244   : > { %v2162_v38 = vadd.f32 %v4079_v34, %v2065_v29  ;;  %v5969_v39 = vadd.f32 %v4140_v19, %v2159_v31  ;;  %4643 = vset.pattern.permute.xlu0 %v5245_v26 }
 0x246   : > { %v5971_v61 = vadd.f32 %v4143_v35, %v2162_v38  ;;  %v4080_v40 = vpop.f32.mrb[44].mxu1  ;;  %v4144_v41 = vpop.f32.mrb[44].mxu0 }
 0x247   : > { %v4081_v42 = vpop.f32.mrb[45].mxu1  ;;  %v4145_v44 = vpop.f32.mrb[45].mxu0 }
 0x248   : > { %v4082_v4 = vadd.f32 %v4081_v42, %v4080_v40  ;;  %v4083_v45 = vpop.f32.mrb[46].mxu1  ;;  %v4146_v47 = vadd.f32 %v4145_v44, %v4144_v41  ;;  %v4147_v48 = vpop.f32.mrb[46].mxu0 }
 0x249   : > { %v4084_v28 = vpop.f32.mrb[47].mxu1  ;;  %v4148_v49 = vpop.f32.mrb[47].mxu0 }
 0x24a   : > { %v2167_v5 = vadd.f32 %v4082_v4, %v2070_v63  ;;  %v4085_v33 = vadd.f32 %v4084_v28, %v4083_v45  ;;  %v4149_v56 = vadd.f32 %v4148_v49, %v4147_v48 }
 0x24c   : > { %v2170_v58 = vadd.f32 %v4085_v33, %v2073_v53  ;;  %v5977_v62 = vadd.f32 %v4146_v47, %v2167_v5 }
 0x24e   : > { %v5979_v15 = vadd.f32 %v4149_v56, %v2170_v58  ;;  %v4166_v0 = vpop.f32.mrb[48].mxu1  ;;  %v4230_v1 = vpop.f32.mrb[48].mxu0 }
 0x24f   : > { %v4167_v2 = vpop.f32.mrb[49].mxu1  ;;  %v4231_v3 = vpop.f32.mrb[49].mxu0 }
 0x250   : > { %v4168_v6 = vadd.f32 %v4167_v2, %v4166_v0  ;;  %v4169_v7 = vpop.f32.mrb[50].mxu1  ;;  %v4232_v8 = vadd.f32 %v4231_v3, %v4230_v1  ;;  %v4233_v22 = vpop.f32.mrb[50].mxu0 }
 0x251   : > { %v4170_v27 = vpop.f32.mrb[51].mxu1  ;;  %v4234_v9 = vpop.f32.mrb[51].mxu0 }
 0x252   : > { %v2305_v10 = vadd.f32 %v4168_v6, %v5907_v54  ;;  %v4171_v46 = vadd.f32 %v4170_v27, %v4169_v7  ;;  %v4235_v12 = vadd.f32 %v4234_v9, %v4233_v22 }
 0x254   : > { %v2308_v14 = vadd.f32 %v4171_v46, %v5915_v59  ;;  %v5983_v16 = vadd.f32 %v4232_v8, %v2305_v10 }
 0x256   : > { %v5985_v50 = vadd.f32 %v4235_v12, %v2308_v14  ;;  %v4172_v18 = vpop.f32.mrb[52].mxu1  ;;  %v4236_v19 = vpop.f32.mrb[52].mxu0 }
 0x257   : > { %v4173_v23 = vpop.f32.mrb[53].mxu1  ;;  %v4237_v21 = vpop.f32.mrb[53].mxu0 }
 0x258   : > { %v4174_v54 = vadd.f32 %v4173_v23, %v4172_v18  ;;  %v4175_v29 = vpop.f32.mrb[54].mxu1  ;;  %v4238_v31 = vadd.f32 %v4237_v21, %v4236_v19  ;;  %v4239_v34 = vpop.f32.mrb[54].mxu0 }
 0x259   : > { %v4176_v59 = vpop.f32.mrb[55].mxu1  ;;  %v4240_v35 = vpop.f32.mrb[55].mxu0 }
 0x25a   : > { %v2313_v36 = vadd.f32 %v4174_v54, %v5919_v20  ;;  %v4177_v37 = vadd.f32 %v4176_v59, %v4175_v29  ;;  %v4241_v38 = vadd.f32 %v4240_v35, %v4239_v34 }
 0x25c   : > { %v2316_v40 = vadd.f32 %v4177_v37, %v5927_v30  ;;  %v5992_v41 = vadd.f32 %v4238_v31, %v2313_v36 }
 0x25e   : > { %v5994_v42 = vadd.f32 %v4241_v38, %v2316_v40  ;;  %v4178_v44 = vpop.f32.mrb[56].mxu1  ;;  %v4242_v63 = vpop.f32.mrb[56].mxu0 }
 0x25f   : > { %v4179_v4 = vpop.f32.mrb[57].mxu1  ;;  %v4243_v45 = vpop.f32.mrb[57].mxu0 }
 0x260   : > { %v4180_v47 = vadd.f32 %v4179_v4, %v4178_v44  ;;  %v4181_v48 = vpop.f32.mrb[58].mxu1  ;;  %v4244_v28 = vadd.f32 %v4243_v45, %v4242_v63  ;;  %v4245_v49 = vpop.f32.mrb[58].mxu0 }
 0x261   : > { %v4182_v53 = vpop.f32.mrb[59].mxu1  ;;  %v4246_v5 = vpop.f32.mrb[59].mxu0 }
 0x262   : > { %v2321_v20 = vadd.f32 %v4180_v47, %v5931_v55  ;;  %v4183_v33 = vadd.f32 %v4182_v53, %v4181_v48  ;;  %v4247_v56 = vadd.f32 %v4246_v5, %v4245_v49 }
 0x264   : > { %v2324_v30 = vadd.f32 %v4183_v33, %v5939_v60  ;;  %v5998_v32 = vadd.f32 %v4244_v28, %v2321_v20 }
 0x266   : > { %v6000_v57 = vadd.f32 %v4247_v56, %v2324_v30  ;;  %v4184_v58 = vpop.f32.mrb[60].mxu1  ;;  %v4248_v0 = vpop.f32.mrb[60].mxu0 }
 0x267   : > { %v4185_v1 = vpop.f32.mrb[61].mxu1  ;;  %v4249_v2 = vpop.f32.mrb[61].mxu0 }
 0x268   : > { %v4186_v3 = vadd.f32 %v4185_v1, %v4184_v58  ;;  %v4187_v6 = vpop.f32.mrb[62].mxu1  ;;  %v4250_v7 = vadd.f32 %v4249_v2, %v4248_v0  ;;  %v4251_v8 = vpop.f32.mrb[62].mxu0 }
 0x269   : > { %v4188_v22 = vpop.f32.mrb[63].mxu1  ;;  %v4252_v27 = vpop.f32.mrb[63].mxu0 }
 0x26a   : > { %v2329_v55 = vadd.f32 %v4186_v3, %v5943_v51  ;;  %v4189_v9 = vadd.f32 %v4188_v22, %v4187_v6  ;;  %v4253_v10 = vadd.f32 %v4252_v27, %v4251_v8 }
 0x26c   : > { %v2332_v60 = vadd.f32 %v4189_v9, %v5947_v24  ;;  %v6004_v46 = vadd.f32 %v4250_v7, %v2329_v55 }
 0x26e   : > { %v6006_v12 = vadd.f32 %v4253_v10, %v2332_v60  ;;  %v4190_v17 = vpop.f32.mrb[64].mxu1  ;;  %v4254_v13 = vpop.f32.mrb[64].mxu0 }
 0x26f   : > { %v4191_v14 = vpop.f32.mrb[65].mxu1  ;;  %v4255_v18 = vpop.f32.mrb[65].mxu0 }
 0x270   : > { %v4192_v19 = vadd.f32 %v4191_v14, %v4190_v17  ;;  %v4193_v23 = vpop.f32.mrb[66].mxu1  ;;  %v4256_v21 = vadd.f32 %v4255_v18, %v4254_v13  ;;  %v4257_v54 = vpop.f32.mrb[66].mxu0 }
 0x271   : > { %v4194_v29 = vpop.f32.mrb[67].mxu1  ;;  %v4258_v31 = vpop.f32.mrb[67].mxu0 }
 0x272   : > { %v2337_v51 = vadd.f32 %v4192_v19, %v5953_v52  ;;  %v4195_v34 = vadd.f32 %v4194_v29, %v4193_v23  ;;  %v4259_v59 = vadd.f32 %v4258_v31, %v4257_v54 }
 0x274   : > { %v2340_v24 = vadd.f32 %v4195_v34, %v5955_v25  ;;  %v6010_v35 = vadd.f32 %v4256_v21, %v2337_v51 }
 0x276   : > { %v6012_v36 = vadd.f32 %v4259_v59, %v2340_v24  ;;  %v4196_v37 = vpop.f32.mrb[68].mxu1  ;;  %v4260_v38 = vpop.f32.mrb[68].mxu0 }
 0x277   : > { %v4197_v40 = vpop.f32.mrb[69].mxu1  ;;  %v4261_v44 = vpop.f32.mrb[69].mxu0 }
 0x278   : > { %v4198_v63 = vadd.f32 %v4197_v40, %v4196_v37  ;;  %v4199_v4 = vpop.f32.mrb[70].mxu1  ;;  %v4262_v45 = vadd.f32 %v4261_v44, %v4260_v38  ;;  %v4263_v47 = vpop.f32.mrb[70].mxu0 }
 0x279   : > { %v4200_v48 = vpop.f32.mrb[71].mxu1  ;;  %v4264_v28 = vpop.f32.mrb[71].mxu0 }
 0x27a   : > { %v2345_v52 = vadd.f32 %v4198_v63, %v5961_v11  ;;  %v4201_v49 = vadd.f32 %v4200_v48, %v4199_v4  ;;  %v4265_v53 = vadd.f32 %v4264_v28, %v4263_v47 }
 0x27c   : > { %v2348_v25 = vadd.f32 %v4201_v49, %v5963_v43  ;;  %v6016_v5 = vadd.f32 %v4262_v45, %v2345_v52 }
 0x27e   : > { %v6018_v20 = vadd.f32 %v4265_v53, %v2348_v25  ;;  %v4202_v33 = vpop.f32.mrb[72].mxu1  ;;  %v4266_v56 = vpop.f32.mrb[72].mxu0 }
 0x27f   : > { %v4203_v30 = vpop.f32.mrb[73].mxu1  ;;  %v4267_v58 = vpop.f32.mrb[73].mxu0 }
 0x280   : > { %v4204_v0 = vadd.f32 %v4203_v30, %v4202_v33  ;;  %v4205_v1 = vpop.f32.mrb[74].mxu1  ;;  %v4268_v2 = vadd.f32 %v4267_v58, %v4266_v56  ;;  %v4269_v3 = vpop.f32.mrb[74].mxu0 }
 0x281   : > { %v4206_v6 = vpop.f32.mrb[75].mxu1  ;;  %v4270_v7 = vpop.f32.mrb[75].mxu0 }
 0x282   : > { %v2353_v11 = vadd.f32 %v4204_v0, %v5969_v39  ;;  %v4207_v8 = vadd.f32 %v4206_v6, %v4205_v1  ;;  %v4271_v22 = vadd.f32 %v4270_v7, %v4269_v3 }
 0x284   : > { %v2356_v43 = vadd.f32 %v4207_v8, %v5971_v61  ;;  %v6022_v27 = vadd.f32 %v4268_v2, %v2353_v11 }
 0x286   : > { %v6024_v55 = vadd.f32 %v4271_v22, %v2356_v43  ;;  %v4208_v9 = vpop.f32.mrb[76].mxu1  ;;  %v4272_v10 = vpop.f32.mrb[76].mxu0 }
 0x287   : > { %v4209_v60 = vpop.f32.mrb[77].mxu1  ;;  %v4273_v17 = vpop.f32.mrb[77].mxu0 }
 0x288   : > { %v4210_v13 = vadd.f32 %v4209_v60, %v4208_v9  ;;  %v4211_v14 = vpop.f32.mrb[78].mxu1  ;;  %v4274_v18 = vadd.f32 %v4273_v17, %v4272_v10  ;;  %v4275_v19 = vpop.f32.mrb[78].mxu0 }
 0x289   : > { %v4212_v23 = vpop.f32.mrb[79].mxu1  ;;  %v4276_v21 = vpop.f32.mrb[79].mxu0 }
 0x28a   : > { %v2361_v39 = vadd.f32 %v4210_v13, %v5977_v62  ;;  %v4213_v54 = vadd.f32 %v4212_v23, %v4211_v14  ;;  %v4277_v29 = vadd.f32 %v4276_v21, %v4275_v19 }
 0x28c   : > { %v2364_v61 = vadd.f32 %v4213_v54, %v5979_v15  ;;  %v6028_v31 = vadd.f32 %v4274_v18, %v2361_v39 }
 0x28e   : > { %v6030_v51 = vadd.f32 %v4277_v29, %v2364_v61  ;;  %v4294_v34 = vpop.f32.mrb[80].mxu1  ;;  %v4358_v59 = vpop.f32.mrb[80].mxu0 }
 0x28f   : > { %v4295_v24 = vpop.f32.mrb[81].mxu1  ;;  %v4359_v37 = vpop.f32.mrb[81].mxu0 }
 0x290   : > { %v4296_v38 = vadd.f32 %v4295_v24, %v4294_v34  ;;  %v4297_v40 = vpop.f32.mrb[82].mxu1  ;;  %v4360_v44 = vadd.f32 %v4359_v37, %v4358_v59  ;;  %v4361_v63 = vpop.f32.mrb[82].mxu0 }
 0x291   : > { %v4298_v4 = vpop.f32.mrb[83].mxu1  ;;  %v4362_v45 = vpop.f32.mrb[83].mxu0 }
 0x292   : > { %v2499_v62 = vadd.f32 %v4296_v38, %v5983_v16  ;;  %v4299_v47 = vadd.f32 %v4298_v4, %v4297_v40  ;;  %v4363_v48 = vadd.f32 %v4362_v45, %v4361_v63 }
 0x294   : > { %v2502_v15 = vadd.f32 %v4299_v47, %v5985_v50  ;;  %v6034_v28 = vadd.f32 %v4360_v44, %v2499_v62 }
 0x296   : > { %v6036_v52 = vadd.f32 %v4363_v48, %v2502_v15  ;;  %v4300_v49 = vpop.f32.mrb[84].mxu1  ;;  %v4364_v53 = vpop.f32.mrb[84].mxu0 }
 0x297   : > { %v4301_v25 = vpop.f32.mrb[85].mxu1  ;;  %v4365_v33 = vpop.f32.mrb[85].mxu0 }
 0x298   : > { %v4302_v56 = vadd.f32 %v4301_v25, %v4300_v49  ;;  %v4303_v30 = vpop.f32.mrb[86].mxu1  ;;  %v4366_v58 = vadd.f32 %v4365_v33, %v4364_v53  ;;  %v4367_v0 = vpop.f32.mrb[86].mxu0 }
 0x299   : > { %v4304_v1 = vpop.f32.mrb[87].mxu1  ;;  %v4368_v2 = vpop.f32.mrb[87].mxu0 }
 0x29a   : > { %v2507_v16 = vadd.f32 %v4302_v56, %v5992_v41  ;;  %v4305_v3 = vadd.f32 %v4304_v1, %v4303_v30  ;;  %v4369_v6 = vadd.f32 %v4368_v2, %v4367_v0 }
 0x29c   : > { %v2510_v50 = vadd.f32 %v4305_v3, %v5994_v42  ;;  %v6040_v7 = vadd.f32 %v4366_v58, %v2507_v16 }
 0x29e   : > { %v6042_v11 = vadd.f32 %v4369_v6, %v2510_v50  ;;  %v4306_v8 = vpop.f32.mrb[88].mxu1  ;;  %v4370_v22 = vpop.f32.mrb[88].mxu0 }
 0x29f   : > { %v4307_v43 = vpop.f32.mrb[89].mxu1  ;;  %v4371_v9 = vpop.f32.mrb[89].mxu0 }
 0x2a0   : > { %v4308_v10 = vadd.f32 %v4307_v43, %v4306_v8  ;;  %v4309_v60 = vpop.f32.mrb[90].mxu1  ;;  %v4372_v17 = vadd.f32 %v4371_v9, %v4370_v22  ;;  %v4373_v13 = vpop.f32.mrb[90].mxu0 }
 0x2a1   : > { %v4310_v14 = vpop.f32.mrb[91].mxu1  ;;  %v4374_v18 = vpop.f32.mrb[91].mxu0 }
 0x2a2   : > { %v2515_v41 = vadd.f32 %v4308_v10, %v5998_v32  ;;  %v4311_v19 = vadd.f32 %v4310_v14, %v4309_v60  ;;  %v4375_v23 = vadd.f32 %v4374_v18, %v4373_v13 }
 0x2a4   : > { %v2518_v42 = vadd.f32 %v4311_v19, %v6000_v57  ;;  %v6046_v21 = vadd.f32 %v4372_v17, %v2515_v41 }
 0x2a6   : > { %v6048_v39 = vadd.f32 %v4375_v23, %v2518_v42  ;;  %v4312_v54 = vpop.f32.mrb[92].mxu1  ;;  %v4376_v29 = vpop.f32.mrb[92].mxu0 }
 0x2a7   : > { %v4313_v61 = vpop.f32.mrb[93].mxu1  ;;  %v4377_v34 = vpop.f32.mrb[93].mxu0 }
 0x2a8   : > { %v4314_v59 = vadd.f32 %v4313_v61, %v4312_v54  ;;  %v4315_v24 = vpop.f32.mrb[94].mxu1  ;;  %v4378_v37 = vadd.f32 %v4377_v34, %v4376_v29  ;;  %v4379_v38 = vpop.f32.mrb[94].mxu0 }
 0x2a9   : > { %v4316_v40 = vpop.f32.mrb[95].mxu1  ;;  %v4380_v44 = vpop.f32.mrb[95].mxu0 }
 0x2aa   : > { %v2523_v32 = vadd.f32 %v4314_v59, %v6004_v46  ;;  %v4317_v63 = vadd.f32 %v4316_v40, %v4315_v24  ;;  %v4381_v4 = vadd.f32 %v4380_v44, %v4379_v38  ;;  %v514_v44 = vlaneseq }
 0x2ac   : > { %v2526_v57 = vadd.f32 %v4317_v63, %v6006_v12  ;;  %v6052_v45 = vadd.f32 %v4378_v37, %v2523_v32 }
 0x2ae   : > { %v6054_v62 = vadd.f32 %v4381_v4, %v2526_v57  ;;  %v4318_v47 = vpop.f32.mrb[96].mxu1  ;;  %v4382_v48 = vpop.f32.mrb[96].mxu0 }
 0x2af   : > { %v4319_v15 = vpop.f32.mrb[97].mxu1  ;;  %v4383_v49 = vpop.f32.mrb[97].mxu0 }
 0x2b0   : > { %v4320_v53 = vadd.f32 %v4319_v15, %v4318_v47  ;;  %v4321_v25 = vpop.f32.mrb[98].mxu1  ;;  %v4384_v33 = vadd.f32 %v4383_v49, %v4382_v48  ;;  %v4385_v56 = vpop.f32.mrb[98].mxu0  ;;  %v6074_v47 = vshrl.u32 %v514_v44, 7 }
 0x2b1   : > { %v4322_v30 = vpop.f32.mrb[99].mxu1  ;;  %v4386_v58 = vpop.f32.mrb[99].mxu0 }
 0x2b2   : > { %v2531_v46 = vadd.f32 %v4320_v53, %v6010_v35  ;;  %v4323_v0 = vadd.f32 %v4322_v30, %v4321_v25  ;;  %v4387_v1 = vadd.f32 %v4386_v58, %v4385_v56 }
 0x2b4   : > { %v2534_v12 = vadd.f32 %v4323_v0, %v6012_v36  ;;  %v6058_v2 = vadd.f32 %v4384_v33, %v2531_v46  ;;  %v516_v46 = vadd.s32 8, %v6074_v47 }
 0x2b6   : > { %v6060_v16 = vadd.f32 %v4387_v1, %v2534_v12  ;;  %v4324_v3 = vpop.f32.mrb[100].mxu1  ;;  %v4388_v6 = vpop.f32.mrb[100].mxu0  ;;  %v6082_v12 = vstv %s3764_s29 }
 0x2b7   : > { %v4325_v50 = vpop.f32.mrb[101].mxu1  ;;  %v4389_v8 = vpop.f32.mrb[101].mxu0 }
 0x2b8   : > { %v4326_v22 = vadd.f32 %v4325_v50, %v4324_v3  ;;  %v4327_v43 = vpop.f32.mrb[102].mxu1  ;;  %v4390_v9 = vadd.f32 %v4389_v8, %v4388_v6  ;;  %v4391_v10 = vpop.f32.mrb[102].mxu0  ;;  %v6087_v50 = vadd.s32 %v6082_v12, %v516_v46 }
 0x2b9   : > { %v4328_v60 = vpop.f32.mrb[103].mxu1  ;;  %v4392_v17 = vpop.f32.mrb[103].mxu0 }
 0x2ba   : > { %v2539_v35 = vadd.f32 %v4326_v22, %v6016_v5  ;;  %v4329_v13 = vadd.f32 %v4328_v60, %v4327_v43  ;;  %v4393_v14 = vadd.f32 %v4392_v17, %v4391_v10  ;;  %v6091_v43 = vadd.s32 %v6082_v12, %v6074_v47 }
 0x2bb   : > { %vm549_vm1 = vcmp.lt.s32.totalorder %v6087_v50, 200  ;;  %v518_v60 = vadd.s32 24, %v6074_v47 }
 0x2bc   : > { %v2542_v36 = vadd.f32 %v4329_v13, %v6018_v20  ;;  %v6064_v18 = vadd.f32 %v4390_v9, %v2539_v35  ;;  %vm548_vm2 = vcmp.lt.s32.totalorder %v6091_v43, 200  ;;  %v517_v35 = vadd.s32 16, %v6074_v47 }
 0x2bd   : > { %vm3910_vm3 = vmpackc.low %vm549_vm1, %vm548_vm2 }
 0x2be   : > { %v6066_v41 = vadd.f32 %v4393_v14, %v2542_v36  ;;  %v4330_v19 = vpop.f32.mrb[104].mxu1  ;;  %v4394_v23 = vpop.f32.mrb[104].mxu0  ;;  %v6110_v14 = vadd.s32 %v6082_v12, %v518_v60 }
 0x2bf   : > { %v4331_v42 = vpop.f32.mrb[105].mxu1  ;;  %v4395_v54 = vpop.f32.mrb[105].mxu0 }
 0x2c0   : > { %v4332_v29 = vadd.f32 %v4331_v42, %v4330_v19  ;;  %v4333_v61 = vpop.f32.mrb[106].mxu1  ;;  %v4396_v34 = vadd.f32 %v4395_v54, %v4394_v23  ;;  %v4397_v59 = vpop.f32.mrb[106].mxu0  ;;  %v6113_v23 = vadd.s32 %v6082_v12, %v517_v35  ;;  %vm551_vm4 = vcmp.lt.s32.totalorder %v6110_v14, 200 }
 0x2c1   : > { %v4334_v24 = vpop.f32.mrb[107].mxu1  ;;  %v4398_v37 = vpop.f32.mrb[107].mxu0 }
 0x2c2   : > { %v2547_v5 = vadd.f32 %v4332_v29, %v6022_v27  ;;  %v4335_v38 = vadd.f32 %v4334_v24, %v4333_v61  ;;  %v4399_v40 = vadd.f32 %v4398_v37, %v4397_v59  ;;  %v520_v61 = vadd.s32 40, %v6074_v47 }
 0x2c3   : > { %vm550_vm5 = vcmp.lt.s32.totalorder %v6113_v23, 200  ;;  %v519_v59 = vadd.s32 32, %v6074_v47 }
 0x2c4   : > { %v2550_v20 = vadd.f32 %v4335_v38, %v6024_v55  ;;  %v6070_v32 = vadd.f32 %v4396_v34, %v2547_v5  ;;  %vm3913_vm6 = vmpackc.low %vm551_vm4, %vm550_vm5  ;;  %v6133_v37 = vadd.s32 %v6082_v12, %v520_v61 }
 0x2c6   : > { %v6072_v63 = vadd.f32 %v4399_v40, %v2550_v20  ;;  %v4336_v4 = vpop.f32.mrb[108].mxu1  ;;  %v4400_v57 = vpop.f32.mrb[108].mxu0  ;;  %v6136_v40 = vadd.s32 %v6082_v12, %v519_v59  ;;  %vm553_vm7 = vcmp.lt.s32.totalorder %v6133_v37, 200 }
 0x2c7   : > { %v4337_v48 = vpop.f32.mrb[109].mxu1  ;;  %v4401_v15 = vpop.f32.mrb[109].mxu0 }
 0x2c8   : > { %v4338_v49 = vadd.f32 %v4337_v48, %v4336_v4  ;;  %v4339_v53 = vpop.f32.mrb[110].mxu1  ;;  %v4402_v25 = vadd.f32 %v4401_v15, %v4400_v57  ;;  %v4403_v27 = vpop.f32.mrb[110].mxu0  ;;  %v522_v57 = vadd.s32 56, %v6074_v47  ;;  %vm552_vm8 = vcmp.lt.s32.totalorder %v6136_v40, 200 }
 0x2c9   : > { %v4340_v33 = vpop.f32.mrb[111].mxu1  ;;  %v4404_v56 = vpop.f32.mrb[111].mxu0  ;;  %v521_v15 = vadd.s32 48, %v6074_v47  ;;  %vm3916_vm9 = vmpackc.low %vm553_vm7, %vm552_vm8 }
 0x2ca   : > { %v2555_v30 = vadd.f32 %v4338_v49, %v6028_v31  ;;  %v4341_v55 = vadd.f32 %v4340_v33, %v4339_v53  ;;  %v4405_v58 = vadd.f32 %v4404_v56, %v4403_v27  ;;  %v6156_v53 = vadd.s32 %v6082_v12, %v522_v57 }
 0x2cb   : > { %v6159_v33 = vadd.s32 %v6082_v12, %v521_v15 }
 0x2cc   : > { %v2558_v0 = vadd.f32 %v4341_v55, %v6030_v51  ;;  %v6080_v1 = vadd.f32 %v4402_v25, %v2555_v30  ;;  %vm555_vm10 = vcmp.lt.s32.totalorder %v6156_v53, 200 }
 0x2cd   : > { %vm554_vm11 = vcmp.lt.s32.totalorder %v6159_v33, 200 }
 0x2ce   : > { %v6084_v3 = vadd.f32 %v4405_v58, %v2558_v0  ;;  %v4422_v6 = vpop.f32.mrb[112].mxu1  ;;  %v524_v58 = vadd.s32 72, %v6074_v47  ;;  %v523_v0 = vadd.s32 64, %v6074_v47  ;;  %vm3919_vm12 = vmpackc.low %vm555_vm10, %vm554_vm11 }
 0x2cf   : > { %v4423_v8 = vpop.f32.mrb[113].mxu1 }
 0x2d0   : > { %v4424_v22 = vadd.f32 %v4423_v8, %v4422_v6  ;;  %v4425_v31 = vpop.f32.mrb[114].mxu1  ;;  %v6179_v8 = vadd.s32 %v6082_v12, %v524_v58 }
 0x2d1   : > { %v4426_v9 = vpop.f32.mrb[115].mxu1 }
 0x2d2   : > { %v6094_v51 = vadd.f32 %v4424_v22, %v6034_v28  ;;  %v4427_v10 = vadd.f32 %v4426_v9, %v4425_v31  ;;  %v6182_v9 = vadd.s32 %v6082_v12, %v523_v0  ;;  %vm557_vm13 = vcmp.lt.s32.totalorder %v6179_v8, 200 }
 0x2d4   : > { %v6099_v17 = vadd.f32 %v4427_v10, %v6036_v52  ;;  %vm556_vm14 = vcmp.lt.s32.totalorder %v6182_v9, 200 }
 0x2d5   : > { %vm3922_vm15 = vmpackc.low %vm557_vm13, %vm556_vm14 }
 0x2d6   : > { %v3911_v28 = vpack.c.bf16 %v6099_v17, %v6094_v51  ;;  %v4428_v13 = vpop.f32.mrb[116].mxu1 }
 0x2d7   : > { %v4429_v36 = vpop.f32.mrb[117].mxu1 }
 0x2d8   : > { %v4430_v19 = vadd.f32 %v4429_v36, %v4428_v13  ;;  %v4431_v52 = vpop.f32.mrb[118].mxu1  ;;  %3912 = vmatmul.mubr.msk.bf16.vlgmr.msra.gmra.mrb[112].mxu0 %vm3910_vm3, %v3911_v28  ;;  %v526_v28 = vadd.s32 88, %v6074_v47  ;;  %v525_v36 = vadd.s32 80, %v6074_v47 }
 0x2d9   : > { %v4432_v42 = vpop.f32.mrb[119].mxu1  ;;  %2961 = vmatprep.mubr.bf16.mxu0 %v5245_v26 }
 0x2da   : > { %v6117_v54 = vadd.f32 %v4430_v19, %v6040_v7  ;;  %v4433_v29 = vadd.f32 %v4432_v42, %v4431_v52  ;;  %v6202_v52 = vadd.s32 %v6082_v12, %v526_v28  ;;  %v6205_v61 = vadd.s32 %v6082_v12, %v525_v36 }
 0x2dc   : > { %v6122_v34 = vadd.f32 %v4433_v29, %v6042_v11  ;;  %6682 = vst [vmem:[#allocation34_spill] sm:$0xff] %v6202_v52  ;;  %vm6637_vm0 = vcmp.lt.s32.totalorder %v6202_v52, 200  ;;  %vm558_vm3 = vcmp.lt.s32.totalorder %v6205_v61, 200 }
 0x2de   : > { %v3914_v7 = vpack.c.bf16 %v6122_v34, %v6117_v54  ;;  %v4434_v24 = vpop.f32.mrb[120].mxu1  ;;  %v2790_v43 = vsel %vm551_vm4, %v6122_v34, 0.0 }
 0x2df   : > { %v4435_v5 = vpop.f32.mrb[121].mxu1 }
 0x2e0   : > { %v4436_v38 = vadd.f32 %v4435_v5, %v4434_v24  ;;  %v4437_v11 = vpop.f32.mrb[122].mxu1  ;;  %3915 = vmatmul.mubr.msk.bf16.gmra.mrb[116].mxu0 %vm3913_vm6, %v3914_v7  ;;  %v528_v5 = vadd.s32 104, %v6074_v47  ;;  %vm3925_vm6 = vmpackc.low %vm6637_vm0, %vm558_vm3 }
 0x2e1   : > { %v4438_v44 = vpop.f32.mrb[123].mxu1  ;;  %2971 = vmatprep.mubr.bf16.mxu0 %v5245_v26 }
 0x2e2   : > { %v6140_v20 = vadd.f32 %v4436_v38, %v6046_v21  ;;  %v4439_v4 = vadd.f32 %v4438_v44, %v4437_v11  ;;  %v527_v11 = vadd.s32 96, %v6074_v47 }
 0x2e4   : > { %v6145_v48 = vadd.f32 %v4439_v4, %v6048_v39  ;;  %v6225_v4 = vadd.s32 %v6082_v12, %v528_v5  ;;  %v2791_v50 = vsel %vm552_vm8, %v6140_v20, 0.0 }
 0x2e6   : > { %v3917_v21 = vpack.c.bf16 %v6145_v48, %v6140_v20  ;;  %v4440_v49 = vpop.f32.mrb[124].mxu1  ;;  %6684 = vst [vmem:[#allocation36_spill] sm:$0xff] %v6225_v4  ;;  %v2792_v23 = vsel %vm553_vm7, %v6145_v48, 0.0 }
 0x2e7   : > { %v4441_v25 = vpop.f32.mrb[125].mxu1 }
 0x2e8   : > { %v4442_v27 = vadd.f32 %v4441_v25, %v4440_v49  ;;  %v4443_v39 = vpop.f32.mrb[126].mxu1  ;;  %3918 = vmatmul.mubr.msk.bf16.gmra.mrb[120].mxu0 %vm3916_vm9, %v3917_v21  ;;  %v6228_v21 = vadd.s32 %v6082_v12, %v527_v11  ;;  %vm561_vm9 = vcmp.lt.s32.totalorder %v6225_v4, 200 }
 0x2e9   : > { %v4444_v56 = vpop.f32.mrb[127].mxu1  ;;  %2981 = vmatprep.mubr.bf16.mxu0 %v5245_v26 }
 0x2ea   : > { %v6163_v30 = vadd.f32 %v4442_v27, %v6052_v45  ;;  %v4445_v55 = vadd.f32 %v4444_v56, %v4443_v39  ;;  %6685 = vst [vmem:[#allocation37_spill] sm:$0xff] %v6228_v21  ;;  %v530_v39 = vadd.s32 120, %v6074_v47 }
 0x2ec   : > { %v6168_v46 = vadd.f32 %v4445_v55, %v6054_v62  ;;  %v529_v55 = vadd.s32 112, %v6074_v47  ;;  %v6248_v0 = vadd.s32 %v6082_v12, %v530_v39  ;;  %v2793_v14 = vsel %vm554_vm11, %v6163_v30, 0.0 }
 0x2ee   : > { %v3920_v45 = vpack.c.bf16 %v6168_v46, %v6163_v30  ;;  %v4446_v6 = vpop.f32.mrb[128].mxu1  ;;  %v2794_v40 = vsel %vm555_vm10, %v6168_v46, 0.0 }
 0x2ef   : > { %v4447_v22 = vpop.f32.mrb[129].mxu1 }
 0x2f0   : > { %v4448_v31 = vadd.f32 %v4447_v22, %v4446_v6  ;;  %v4449_v62 = vpop.f32.mrb[130].mxu1  ;;  %3921 = vmatmul.mubr.msk.bf16.gmra.mrb[124].mxu0 %vm3919_vm12, %v3920_v45  ;;  %vm6636_vm12 = vcmp.lt.s32.totalorder %v6228_v21, 200  ;;  %v6251_v22 = vadd.s32 %v6082_v12, %v529_v55 }
 0x2f1   : > { %v4450_v10 = vpop.f32.mrb[131].mxu1  ;;  %2991 = vmatprep.mubr.bf16.mxu0 %v5245_v26 }
 0x2f2   : > { %v6186_v60 = vadd.f32 %v4448_v31, %v6058_v2  ;;  %v4451_v35 = vadd.f32 %v4450_v10, %v4449_v62  ;;  %6688 = vst [vmem:[#allocation40_spill] sm:$0xff] %v6251_v22 }
 0x2f4   : > { %v6191_v13 = vadd.f32 %v4451_v35, %v6060_v16  ;;  %v2795_v48 = vsel %vm556_vm14, %v6186_v60, 0.0 }
 0x2f6   : > { %v3923_v2 = vpack.c.bf16 %v6191_v13, %v6186_v60  ;;  %v4452_v19 = vpop.f32.mrb[132].mxu1  ;;  %v2796_v33 = vsel %vm557_vm13, %v6191_v13, 0.0 }
 0x2f7   : > { %v4453_v42 = vpop.f32.mrb[133].mxu1 }
 0x2f8   : > { %v4454_v29 = vadd.f32 %v4453_v42, %v4452_v19  ;;  %v4455_v16 = vpop.f32.mrb[134].mxu1  ;;  %3924 = vmatmul.mubr.msk.bf16.gmra.mrb[128].mxu0 %vm3922_vm15, %v3923_v2  ;;  %vm3928_vm15 = vmpackc.low %vm561_vm9, %vm6636_vm12  ;;  %vm562_vm12 = vcmp.lt.s32.totalorder %v6251_v22, 200 }
 0x2f9   : > { %v4456_v59 = vpop.f32.mrb[135].mxu1  ;;  %3001 = vmatprep.mubr.bf16.mxu0 %v5245_v26 }
 0x2fa   : > { %v6209_v7 = vadd.f32 %v4454_v29, %v6064_v18  ;;  %v4457_v24 = vadd.f32 %v4456_v59, %v4455_v16  ;;  %v6274_v59 = vsub.s32 0, %v6074_v47 }
 0x2fc   : > { %v6214_v38 = vadd.f32 %v4457_v24, %v6066_v41  ;;  %v2797_v53 = vsel %vm558_vm3, %v6209_v7, 0.0 }
 0x2fe   : > { %6683 = vst [vmem:[#allocation35_spill] sm:$0xff] %v6214_v38  ;;  %v3926_v18 = vpack.c.bf16 %v6214_v38, %v6209_v7  ;;  %v4458_v44 = vpop.f32.mrb[136].mxu1 }
 0x2ff   : > { %v4459_v57 = vpop.f32.mrb[137].mxu1 }
 0x300   : > { %v4460_v15 = vadd.f32 %v4459_v57, %v4458_v44  ;;  %v4461_v41 = vpop.f32.mrb[138].mxu1  ;;  %3927 = vmatmul.mubr.msk.bf16.gmra.mrb[132].mxu0 %vm3925_vm6, %v3926_v18  ;;  %vm6647_vm6 = vcmp.lt.s32.totalorder %v6248_v0, 200 }
 0x301   : > { %v4462_v49 = vpop.f32.mrb[139].mxu1  ;;  %3011 = vmatprep.mubr.bf16.mxu0 %v5245_v26 }
 0x302   : > { %v6232_v25 = vadd.f32 %v4460_v15, %v6070_v32  ;;  %v4463_v27 = vadd.f32 %v4462_v49, %v4461_v41 }
 0x304   : > { %6686 = vst [vmem:[#allocation38_spill] sm:$0xff] %v6232_v25  ;;  %v6237_v56 = vadd.f32 %v4463_v27, %v6072_v63 }
 0x306   : > { %6687 = vst [vmem:[#allocation39_spill] sm:$0xff] %v6237_v56  ;;  %v3929_v32 = vpack.c.bf16 %v6237_v56, %v6232_v25  ;;  %v4464_v58 = vpop.f32.mrb[140].mxu1 }
 0x307   : > { %v4465_v45 = vpop.f32.mrb[141].mxu1 }
 0x308   : > { %v4466_v6 = vadd.f32 %v4465_v45, %v4464_v58  ;;  %v4467_v63 = vpop.f32.mrb[142].mxu1  ;;  %3930 = vmatmul.mubr.msk.bf16.gmra.mrb[136].mxu0 %vm3928_vm15, %v3929_v32  ;;  %vm3931_vm15 = vmpackc.low %vm6647_vm6, %vm562_vm12 }
 0x309   : > { %v4468_v31 = vpop.f32.mrb[143].mxu1  ;;  %3021 = vmatprep.mubr.bf16.mxu0 %v5245_v26  ;;  %v2835_v26 = vsub.s32 1, %v6074_v47 }
 0x30a   : > { %v6255_v62 = vadd.f32 %v4466_v6, %v6080_v1  ;;  %v4469_v10 = vadd.f32 %v4468_v31, %v4467_v63  ;;  %v2827_v1 = vld [vmem:[#allocation14] sm:$0x3] }
 0x30b   : > { %v6269_v28 = vrot.slane %v2827_v1, %v2835_v26  ;;  %v6277_v18 = vrot.slane %v2827_v1, %v6274_v59 }
 0x30c   : > { %6689 = vst [vmem:[#allocation41_spill] sm:$0xff] %v6255_v62  ;;  %v6259_v35 = vadd.f32 %v4469_v10, %v6084_v3 }
 0x30e   : > { %6690 = vst [vmem:[#allocation42_spill] sm:$0xff] %v6259_v35  ;;  %v3932_v12 = vpack.c.bf16 %v6259_v35, %v6255_v62 }
 0x310   : > { %3933 = vmatmul.mubr.msk.bf16.gmra.mrb[140].mxu0 %vm3931_vm15, %v3932_v12  ;;  %vm3255_vm15 = vcmask 7168  }
 0x3ab   : > { %v2953_v36 = vpop.f32.mrb[112].mxu0 }
 0x3ac   : > { %v2955_v2 = vpop.f32.mrb[113].mxu0  ;;  %v2954_v27 = vadd.f32 %v2953_v36, %v6277_v18 }
 0x3ad   : > { %v2956_v3 = vadd.f32 %v2955_v2, %v6269_v28  ;;  %v2957_v19 = vpop.f32.mrb[114].mxu0 }
 0x3ae   : > { %v2959_v42 = vpop.f32.mrb[115].mxu0  ;;  %v2958_v55 = vadd.f32 %v2957_v19, %v6277_v18 }
 0x3af   : > { %v3934_v29 = vmul.f32 -1.442695, %v2956_v3  ;;  %v2960_v16 = vadd.f32 %v2959_v42, %v6269_v28 }
 0x3b1   : > { %4797 = vpow2.f32 %v3934_v29  ;;  %v3935_v24 = vmul.f32 -1.442695, %v2960_v16 }
 0x3b3   : > { %4799 = vpow2.f32 %v3935_v24  ;;  %v2963_v5 = vpop.f32.mrb[116].mxu0 }
 0x3b4   : > { %v2965_v11 = vpop.f32.mrb[117].mxu0  ;;  %v2964_v36 = vadd.f32 %v2963_v5, %v6277_v18 }
 0x3b5   : > { %v2966_v44 = vadd.f32 %v2965_v11, %v6269_v28  ;;  %v2967_v57 = vpop.f32.mrb[118].mxu0 }
 0x3b6   : > { %v2969_v15 = vpop.f32.mrb[119].mxu0  ;;  %v2968_v19 = vadd.f32 %v2967_v57, %v6277_v18  ;;  %v6289_v57 = vld [vmem:[#allocation15] ss:$0 sm:$0xff] }
 0x3b7   : > { %v3936_v41 = vmul.f32 -1.442695, %v2966_v44  ;;  %v2970_v49 = vadd.f32 %v2969_v15, %v6269_v28 }
 0x3b9   : > { %4801 = vpow2.f32 %v3936_v41  ;;  %v3937_v47 = vmul.f32 -1.442695, %v2970_v49 }
 0x3bb   : > { %v4798_v39 = vpop.eup %4797  ;;  %4803 = vpow2.f32 %v3937_v47  ;;  %v2973_v32 = vpop.f32.mrb[120].mxu0 }
 0x3bc   : > { %v3096_v58 = vadd.f32 1.0, %v4798_v39  ;;  %v2975_v45 = vpop.f32.mrb[121].mxu0  ;;  %4805 = vtanh.f32 %v2954_v27 }
 0x3bd   : > { %v4800_v6 = vpop.eup %4799  ;;  %v2976_v63 = vadd.f32 %v2975_v45, %v6269_v28  ;;  %v2977_v31 = vpop.f32.mrb[122].mxu0 }
 0x3be   : > { %4807 = vrcp.f32 %v3096_v58  ;;  %v3097_v10 = vadd.f32 1.0, %v4800_v6  ;;  %v2979_v12 = vpop.f32.mrb[123].mxu0 }
 0x3bf   : > { %4809 = vtanh.f32 %v2958_v55  ;;  %v3938_v26 = vmul.f32 -1.442695, %v2976_v63  ;;  %v2980_v1 = vadd.f32 %v2979_v12, %v6269_v28  ;;  %v2974_v55 = vadd.f32 %v2973_v32, %v6277_v18 }
 0x3c0   : > { %4811 = vrcp.f32 %v3097_v10  ;;  %v2978_v10 = vadd.f32 %v2977_v31, %v6277_v18 }
 0x3c1   : > { %4813 = vpow2.f32 %v3938_v26  ;;  %v3939_v2 = vmul.f32 -1.442695, %v2980_v1 }
 0x3c3   : > { %v4802_v3 = vpop.eup %4801  ;;  %4815 = vpow2.f32 %v3939_v2  ;;  %v2983_v42 = vpop.f32.mrb[124].mxu0 }
 0x3c4   : > { %v3098_v29 = vadd.f32 1.0, %v4802_v3  ;;  %v2985_v16 = vpop.f32.mrb[125].mxu0  ;;  %4817 = vtanh.f32 %v2964_v36 }
 0x3c5   : > { %v4804_v24 = vpop.eup %4803  ;;  %v2986_v11 = vadd.f32 %v2985_v16, %v6269_v28  ;;  %v2987_v44 = vpop.f32.mrb[126].mxu0 }
 0x3c6   : > { %4819 = vrcp.f32 %v3098_v29  ;;  %v3099_v15 = vadd.f32 1.0, %v4804_v24  ;;  %v2989_v41 = vpop.f32.mrb[127].mxu0  ;;  %v4806_v49 = vpop.eup %4805 }
 0x3c7   : > { %4821 = vtanh.f32 %v2968_v19  ;;  %v3940_v5 = vmul.f32 -1.442695, %v2986_v11  ;;  %v2990_v27 = vadd.f32 %v2989_v41, %v6269_v28 }
 0x3c8   : > { %v4808_v47 = vpop.eup %4807  ;;  %4823 = vrcp.f32 %v3099_v15 }
 0x3c9   : > { %v4810_v39 = vpop.eup %4809  ;;  %4825 = vpow2.f32 %v3940_v5  ;;  %v3941_v58 = vmul.f32 -1.442695, %v2990_v27  ;;  %v3144_v45 = vmul.f32 %v4808_v47, %v4806_v49  ;;  %v2984_v5 = vadd.f32 %v2983_v42, %v6277_v18 }
 0x3ca   : > { %v4812_v6 = vpop.eup %4811 }
 0x3cb   : > { %v4814_v63 = vpop.eup %4813  ;;  %4827 = vpow2.f32 %v3941_v58  ;;  %v2993_v12 = vpop.f32.mrb[128].mxu0  ;;  %v3167_v26 = vmul.f32 %v6289_v57, %v3144_v45  ;;  %v3145_v1 = vmul.f32 %v4812_v6, %v4810_v39  ;;  %v2988_v58 = vadd.f32 %v2987_v44, %v6277_v18 }
 0x3cc   : > { %v3100_v36 = vadd.f32 1.0, %v4814_v63  ;;  %v2995_v2 = vpop.f32.mrb[129].mxu0  ;;  %4829 = vtanh.f32 %v2974_v55 }
 0x3cd   : > { %v4816_v3 = vpop.eup %4815  ;;  %v2996_v19 = vadd.f32 %v2995_v2, %v6269_v28  ;;  %v2997_v29 = vpop.f32.mrb[130].mxu0  ;;  %3183 = vadd.xlane.f32.xlu0 %v3167_v26  ;;  %v3168_v15 = vmul.f32 %v6289_v57, %v3145_v1 }
 0x3ce   : > { %4831 = vrcp.f32 %v3100_v36  ;;  %v3101_v32 = vadd.f32 1.0, %v4816_v3  ;;  %v2999_v16 = vpop.f32.mrb[131].mxu0  ;;  %v4818_v24 = vpop.eup %4817 }
 0x3cf   : > { %4833 = vtanh.f32 %v2978_v10  ;;  %v3942_v11 = vmul.f32 -1.442695, %v2996_v19  ;;  %v3000_v31 = vadd.f32 %v2999_v16, %v6269_v28 }
 0x3d0   : > { %v4820_v41 = vpop.eup %4819  ;;  %4835 = vrcp.f32 %v3101_v32 }
 0x3d1   : > { %v4822_v49 = vpop.eup %4821  ;;  %4837 = vpow2.f32 %v3942_v11  ;;  %v3943_v27 = vmul.f32 -1.442695, %v3000_v31  ;;  %3185 = vadd.xlane.f32.xlu0 %v3168_v15  ;;  %v3146_v47 = vmul.f32 %v4820_v41, %v4818_v24  ;;  %v2994_v31 = vadd.f32 %v2993_v12, %v6277_v18 }
 0x3d2   : > { %v4824_v39 = vpop.eup %4823 }
 0x3d3   : > { %v4826_v55 = vpop.eup %4825  ;;  %4839 = vpow2.f32 %v3943_v27  ;;  %v3003_v45 = vpop.f32.mrb[132].mxu0  ;;  %v3169_v6 = vmul.f32 %v6289_v57, %v3146_v47  ;;  %v3147_v63 = vmul.f32 %v4824_v39, %v4822_v49  ;;  %v2998_v27 = vadd.f32 %v2997_v29, %v6277_v18 }
 0x3d4   : > { %v3102_v10 = vadd.f32 1.0, %v4826_v55  ;;  %v3005_v26 = vpop.f32.mrb[133].mxu0  ;;  %4841 = vtanh.f32 %v2984_v5 }
 0x3d5   : > { %v4828_v1 = vpop.eup %4827  ;;  %v3006_v36 = vadd.f32 %v3005_v26, %v6269_v28  ;;  %v3007_v42 = vpop.f32.mrb[134].mxu0  ;;  %3187 = vadd.xlane.f32.xlu1 %v3169_v6  ;;  %v3170_v16 = vmul.f32 %v6289_v57, %v3147_v63 }
 0x3d6   : > { %4843 = vrcp.f32 %v3102_v10  ;;  %v3103_v2 = vadd.f32 1.0, %v4828_v1  ;;  %v3009_v3 = vpop.f32.mrb[135].mxu0  ;;  %v4830_v19 = vpop.eup %4829 }
 0x3d7   : > { %4845 = vtanh.f32 %v2988_v58  ;;  %v3944_v32 = vmul.f32 -1.442695, %v3006_v36  ;;  %v3010_v44 = vadd.f32 %v3009_v3, %v6269_v28 }
 0x3d8   : > { %v4832_v24 = vpop.eup %4831  ;;  %4847 = vrcp.f32 %v3103_v2 }
 0x3d9   : > { %v4834_v11 = vpop.eup %4833  ;;  %4849 = vpow2.f32 %v3944_v32  ;;  %v3945_v15 = vmul.f32 -1.442695, %v3010_v44  ;;  %3189 = vadd.xlane.f32.xlu1 %v3170_v16  ;;  %v3148_v41 = vmul.f32 %v4832_v24, %v4830_v19  ;;  %v3004_v44 = vadd.f32 %v3003_v45, %v6277_v18 }
 0x3da   : > { %v4836_v49 = vpop.eup %4835 }
 0x3db   : > { %v4838_v5 = vpop.eup %4837  ;;  %4851 = vpow2.f32 %v3945_v15  ;;  %v3013_v47 = vpop.f32.mrb[136].mxu0  ;;  %v3171_v39 = vmul.f32 %v6289_v57, %v3148_v41  ;;  %v3149_v55 = vmul.f32 %v4836_v49, %v4834_v11  ;;  %v3008_v15 = vadd.f32 %v3007_v42, %v6277_v18 }
 0x3dc   : > { %v3104_v58 = vadd.f32 1.0, %v4838_v5  ;;  %v3015_v6 = vpop.f32.mrb[137].mxu0  ;;  %4853 = vtanh.f32 %v2994_v31 }
 0x3dd   : > { %v4840_v63 = vpop.eup %4839  ;;  %v3016_v10 = vadd.f32 %v3015_v6, %v6269_v28  ;;  %v3017_v12 = vpop.f32.mrb[138].mxu0  ;;  %3191 = vadd.xlane.f32.xlu0 %v3171_v39  ;;  %v3172_v26 = vmul.f32 %v6289_v57, %v3149_v55 }
 0x3de   : > { %4855 = vrcp.f32 %v3104_v58  ;;  %v3105_v1 = vadd.f32 1.0, %v4840_v63  ;;  %v3019_v36 = vpop.f32.mrb[139].mxu0  ;;  %v4842_v2 = vpop.eup %4841 }
 0x3df   : > { %4857 = vtanh.f32 %v2998_v27  ;;  %v3946_v29 = vmul.f32 -1.442695, %v3016_v10  ;;  %v3020_v3 = vadd.f32 %v3019_v36, %v6269_v28  ;;  %3193 = vadd.xlane.f32.xlu1 %v3172_v26 }
 0x3e0   : > { %v4844_v19 = vpop.eup %4843  ;;  %4859 = vrcp.f32 %v3105_v1 }
 0x3e1   : > { %v4846_v32 = vpop.eup %4845  ;;  %4861 = vpow2.f32 %v3946_v29  ;;  %v3947_v16 = vmul.f32 -1.442695, %v3020_v3  ;;  %v3150_v24 = vmul.f32 %v4844_v19, %v4842_v2  ;;  %v3014_v29 = vadd.f32 %v3013_v47, %v6277_v18 }
 0x3e2   : > { %v4848_v11 = vpop.eup %4847 }
 0x3e3   : > { %v4850_v31 = vpop.eup %4849  ;;  %4863 = vpow2.f32 %v3947_v16  ;;  %v3023_v41 = vpop.f32.mrb[140].mxu0  ;;  %v3173_v49 = vmul.f32 %v6289_v57, %v3150_v24  ;;  %v3151_v5 = vmul.f32 %v4848_v11, %v4846_v32  ;;  %v3018_v16 = vadd.f32 %v3017_v12, %v6277_v18 }
 0x3e4   : > { %v3106_v27 = vadd.f32 1.0, %v4850_v31  ;;  %v3025_v39 = vpop.f32.mrb[141].mxu0  ;;  %4865 = vtanh.f32 %v3004_v44  ;;  %v3024_v12 = vadd.f32 %v3023_v41, %v6277_v18 }
 0x3e5   : > { %v4852_v55 = vpop.eup %4851  ;;  %v3026_v58 = vadd.f32 %v3025_v39, %v6269_v28  ;;  %v3027_v6 = vpop.f32.mrb[142].mxu0  ;;  %3195 = vadd.xlane.f32.xlu0 %v3173_v49  ;;  %v3174_v45 = vmul.f32 %v6289_v57, %v3151_v5 }
 0x3e6   : > { %4867 = vrcp.f32 %v3106_v27  ;;  %v3107_v63 = vadd.f32 1.0, %v4852_v55  ;;  %v3029_v10 = vpop.f32.mrb[143].mxu0  ;;  %v4854_v26 = vpop.eup %4853 }
 0x3e7   : > { %4869 = vtanh.f32 %v3008_v15  ;;  %v3948_v42 = vmul.f32 -1.442695, %v3026_v58  ;;  %v3030_v1 = vadd.f32 %v3029_v10, %v6269_v28  ;;  %3197 = vadd.xlane.f32.xlu1 %v3174_v45  ;;  %v3028_v45 = vadd.f32 %v3027_v6, %v6277_v18 }
 0x3e8   : > { %v4856_v36 = vpop.eup %4855  ;;  %4871 = vrcp.f32 %v3107_v63 }
 0x3e9   : > { %v4858_v2 = vpop.eup %4857  ;;  %4873 = vpow2.f32 %v3948_v42  ;;  %v3949_v3 = vmul.f32 -1.442695, %v3030_v1  ;;  %v3152_v19 = vmul.f32 %v4856_v36, %v4854_v26 }
 0x3ea   : > { %v4860_v32 = vpop.eup %4859 }
 0x3eb   : > { %v4862_v44 = vpop.eup %4861  ;;  %4875 = vpow2.f32 %v3949_v3  ;;  %v3175_v24 = vmul.f32 %v6289_v57, %v3152_v19  ;;  %v3153_v11 = vmul.f32 %v4860_v32, %v4858_v2 }
 0x3ec   : > { %v3108_v31 = vadd.f32 1.0, %v4862_v44  ;;  %4877 = vtanh.f32 %v3014_v29 }
 0x3ed   : > { %v4864_v15 = vpop.eup %4863  ;;  %3199 = vadd.xlane.f32.xlu0 %v3175_v24  ;;  %v3176_v28 = vmul.f32 %v6289_v57, %v3153_v11 }
 0x3ee   : > { %4879 = vrcp.f32 %v3108_v31  ;;  %v3109_v49 = vadd.f32 1.0, %v4864_v15  ;;  %v4866_v47 = vpop.eup %4865 }
 0x3ef   : > { %4881 = vtanh.f32 %v3018_v16  ;;  %3201 = vadd.xlane.f32.xlu1 %v3176_v28 }
 0x3f0   : > { %v4868_v5 = vpop.eup %4867  ;;  %4883 = vrcp.f32 %v3109_v49 }
 0x3f1   : > { %v4870_v27 = vpop.eup %4869  ;;  %v3154_v39 = vmul.f32 %v4868_v5, %v4866_v47  ;;  %4885 = vtanh.f32 %v3024_v12 }
 0x3f2   : > { %v4872_v55 = vpop.eup %4871 }
 0x3f3   : > { %v4874_v58 = vpop.eup %4873  ;;  %v3177_v63 = vmul.f32 %v6289_v57, %v3154_v39  ;;  %v3155_v10 = vmul.f32 %v4872_v55, %v4870_v27 }
 0x3f4   : > { %v3110_v26 = vadd.f32 1.0, %v4874_v58 }
 0x3f5   : > { %v4876_v42 = vpop.eup %4875  ;;  %3203 = vadd.xlane.f32.xlu0 %v3177_v63  ;;  %v3178_v1 = vmul.f32 %v6289_v57, %v3155_v10  ;;  %v3951_v63 = vld [vmem:[#allocation5] ss:$0 sm:$0xff] }
 0x3f6   : > { %4887 = vrcp.f32 %v3110_v26  ;;  %v3111_v36 = vadd.f32 1.0, %v4876_v42  ;;  %v4878_v2 = vpop.eup %4877 }
 0x3f7   : > { %4889 = vtanh.f32 %v3028_v45  ;;  %3205 = vadd.xlane.f32.xlu1 %v3178_v1 }
 0x3f8   : > { %v4880_v41 = vpop.eup %4879  ;;  %4891 = vrcp.f32 %v3111_v36 }
 0x3f9   : > { %v4882_v29 = vpop.eup %4881  ;;  %v3156_v3 = vmul.f32 %v4880_v41, %v4878_v2 }
 0x3fa   : > { %v4884_v19 = vpop.eup %4883 }
 0x3fb   : > { %v3179_v18 = vmul.f32 %v6289_v57, %v3156_v3  ;;  %v3157_v6 = vmul.f32 %v4884_v19, %v4882_v29  ;;  %v4886_v44 = vpop.eup %4885 }
 0x3fd   : > { %3207 = vadd.xlane.f32.xlu0 %v3179_v18  ;;  %v3180_v32 = vmul.f32 %v6289_v57, %v3157_v6 }
 0x3ff   : > { %3209 = vadd.xlane.f32.xlu1 %v3180_v32 }
 0x400   : > { %v4888_v16 = vpop.eup %4887 }
 0x401   : > { %v4890_v24 = vpop.eup %4889  ;;  %v3158_v11 = vmul.f32 %v4888_v16, %v4886_v44 }
 0x402   : > { %v4892_v31 = vpop.eup %4891 }
 0x403   : > { %v3181_v15 = vmul.f32 %v6289_v57, %v3158_v11  ;;  %v3159_v28 = vmul.f32 %v4892_v31, %v4890_v24 }
 0x405   : > { %3211 = vadd.xlane.f32.xlu0 %v3181_v15  ;;  %v3182_v49 = vmul.f32 %v6289_v57, %v3159_v28 }
 0x407   : > { %3213 = vadd.xlane.f32.xlu1 %v3182_v49 }
 0x45a   : > { %v3184_v47 = vpop.xlane.xlu0 %3183 }
 0x45b   : > { %v3222_v42 = vadd.f32 %v3951_v63, %v3184_v47 }
 0x45d   : > { %v6329_v18 = vsel %vm548_vm2, %v3222_v42, -inf }
 0x45e   : > { %v3186_v27 = vpop.xlane.xlu0 %3185 }
 0x45f   : > { %v3223_v1 = vadd.f32 %v3951_v63, %v3186_v27  ;;  %v3256_v27 = vsel %vm3255_vm15, %v6329_v18, -inf }
 0x461   : > { %v6333_v44 = vsel %vm549_vm1, %v3223_v1, -inf }
 0x462   : > { %v3188_v5 = vpop.xlane.xlu1 %3187 }
 0x463   : > { %v3224_v36 = vadd.f32 %v3951_v63, %v3188_v5 }
 0x465   : > { %v6337_v16 = vsel %vm550_vm5, %v3224_v36, -inf }
 0x466   : > { %v3190_v12 = vpop.xlane.xlu1 %3189  ;;  %v3258_v42 = vsel %vm3255_vm15, %v6337_v16, -inf }
 0x467   : > { %v3225_v57 = vadd.f32 %v3951_v63, %v3190_v12 }
 0x469   : > { %v6351_v12 = vsel %vm551_vm4, %v3225_v57, -inf  ;;  %vm6703_vm4 = vcmp.lt.s32.totalorder %v6248_v0, 200 }
 0x46a   : > { %v3192_v39 = vpop.xlane.xlu0 %3191  ;;  %v3259_v57 = vsel %vm3255_vm15, %v6351_v12, -inf }
 0x46b   : > { %v3226_v2 = vadd.f32 %v3951_v63, %v3192_v39 }
 0x46c   : > { %v3194_v55 = vpop.xlane.xlu1 %3193 }
 0x46d   : > { %v3227_v3 = vadd.f32 %v3951_v63, %v3194_v55  ;;  %v6341_v24 = vsel %vm552_vm8, %v3226_v2, -inf }
 0x46e   : > { %v3260_v55 = vsel %vm3255_vm15, %v6341_v24, -inf }
 0x46f   : > { %v6345_v28 = vsel %vm553_vm7, %v3227_v3, -inf }
 0x470   : > { %v3262_v1 = vsel %vm3255_vm15, %v6345_v28, -inf }
 0x472   : > { %v3196_v58 = vpop.xlane.xlu0 %3195 }
 0x473   : > { %v3228_v19 = vadd.f32 %v3951_v63, %v3196_v58 }
 0x474   : > { %v3198_v45 = vpop.xlane.xlu1 %3197 }
 0x475   : > { %v3229_v6 = vadd.f32 %v3951_v63, %v3198_v45  ;;  %v6355_v39 = vsel %vm554_vm11, %v3228_v19, -inf  ;;  %v3261_v19 = vmax.f32 %v3256_v27, %v3260_v55 }
 0x476   : > { %v3264_v2 = vsel %vm3255_vm15, %v6355_v39, -inf }
 0x477   : > { %v6361_v58 = vsel %vm555_vm10, %v3229_v6, -inf }
 0x478   : > { %v3266_v6 = vsel %vm3255_vm15, %v6361_v58, -inf }
 0x47a   : > { %v3200_v10 = vpop.xlane.xlu0 %3199 }
 0x47b   : > { %v3230_v11 = vadd.f32 %v3951_v63, %v3200_v10 }
 0x47c   : > { %v3202_v26 = vpop.xlane.xlu1 %3201 }
 0x47d   : > { %v3231_v32 = vadd.f32 %v3951_v63, %v3202_v26  ;;  %v3257_v26 = vsel %vm3255_vm15, %v6333_v44, -inf  ;;  %v6375_v36 = vsel %vm556_vm14, %v3230_v11, -inf }
 0x47f   : > { %v6365_v45 = vsel %vm557_vm13, %v3231_v32, -inf }
 0x480   : > { %v3270_v32 = vsel %vm3255_vm15, %v6365_v45, -inf }
 0x482   : > { %v3204_v41 = vpop.xlane.xlu0 %3203 }
 0x483   : > { %v3232_v49 = vadd.f32 %v3951_v63, %v3204_v41 }
 0x484   : > { %v3206_v29 = vpop.xlane.xlu1 %3205 }
 0x485   : > { %v3233_v47 = vadd.f32 %v3951_v63, %v3206_v29  ;;  %v6381_v41 = vsel %vm558_vm3, %v3232_v49, -inf }
 0x486   : > { %v3272_v27 = vsel %vm3255_vm15, %v6381_v41, -inf }
 0x487   : > { %v6385_v29 = vsel %vm6637_vm0, %v3233_v47, -inf  ;;  %vm6691_vm0 = vcmp.lt.s32.totalorder %v6228_v21, 200 }
 0x488   : > { %v3274_v55 = vsel %vm3255_vm15, %v6385_v29, -inf }
 0x48a   : > { %v3208_v31 = vpop.xlane.xlu0 %3207 }
 0x48b   : > { %v3234_v10 = vadd.f32 %v3951_v63, %v3208_v31  ;;  %v3263_v31 = vmax.f32 %v3257_v26, %v3262_v1  ;;  %v3267_v26 = vmax.f32 %v3259_v57, %v3266_v6 }
 0x48c   : > { %v3210_v15 = vpop.xlane.xlu1 %3209 }
 0x48d   : > { %v3235_v5 = vadd.f32 %v3951_v63, %v3210_v15  ;;  %v3268_v15 = vsel %vm3255_vm15, %v6375_v36, -inf  ;;  %v6401_v49 = vsel %vm6691_vm0, %v3234_v10, -inf  ;;  %v3271_v1 = vmax.f32 %v3263_v31, %v3270_v32 }
 0x48e   : > { %v3269_v56 = vmax.f32 %v3261_v19, %v3268_v15  ;;  %v3275_v21 = vmax.f32 %v3267_v26, %v3274_v55  ;;  %vm3393_vm0 = vcmask 0  }
 0x48f   : > { %v6389_v3 = vsel %vm561_vm9, %v3235_v5, -inf  ;;  %v3265_v5 = vmax.f32 %v3258_v42, %v3264_v2  ;;  %v3276_v42 = vsel %vm3255_vm15, %v6401_v49, -inf }
 0x490   : > { %v3278_v35 = vsel %vm3255_vm15, %v6389_v3, -inf  ;;  %v3277_v6 = vmax.f32 %v3269_v56, %v3276_v42 }
 0x491   : > { %v3279_v25 = vmax.f32 %v3271_v1, %v3278_v35 }
 0x492   : > { %v3212_v11 = vpop.xlane.xlu0 %3211 }
 0x493   : > { %v3236_v47 = vadd.f32 %v3951_v63, %v3212_v11  ;;  %v3273_v11 = vmax.f32 %v3265_v5, %v3272_v27  ;;  %v6423_v27 = vld [vmem:[#allocation2] sm:$0x1] }
 0x494   : > { %v3214_v62 = vpop.xlane.xlu1 %3213 }
 0x495   : > { %v6411_v4 = vsel %vm562_vm12, %v3236_v47, -inf  ;;  %v3237_v10 = vadd.f32 %v3951_v63, %v3214_v62  ;;  %v3284_v63 = vmax.f32 %v3277_v6, %v3279_v25 }
 0x496   : > { %v3280_v2 = vsel %vm3255_vm15, %v6411_v4, -inf }
 0x497   : > { %v6419_v52 = vsel %vm6647_vm6, %v3237_v10, -inf  ;;  %v3281_v32 = vmax.f32 %v3273_v11, %v3280_v2 }
 0x498   : > { %v3282_v57 = vsel %vm3255_vm15, %v6419_v52, -inf }
 0x499   : > { %v3283_v62 = vmax.f32 %v3275_v21, %v3282_v57 }
 0x49b   : > { %v3285_v19 = vmax.f32 %v3281_v32, %v3283_v62 }
 0x49d   : > { %v3286_v31 = vmax.f32 %v3284_v63, %v3285_v19 }
 0x49f   : > { %v3287_v15 = vrot.slane %v3286_v31, 4 }
 0x4a1   : > { %v3288_v47 = vmax.f32 %v3286_v31, %v3287_v15 }
 0x4a3   : > { %v3289_v22 = vrot.slane %v3288_v47, 2 }
 0x4a5   : > { %v3290_v38 = vmax.f32 %v3288_v47, %v3289_v22 }
 0x4a7   : > { %v3291_v5 = vrot.slane %v3290_v38, 1 }
 0x4a9   : > { %v3292_v35 = vmax.f32 %v3290_v38, %v3291_v5 }
 0x4ab   : > { %v3293_v55 = vmax.f32 %v6423_v27, %v3292_v35 }
 0x4ad   : > { %vm3294_vm6 = vcmp.eq.f32.partialorder %v3293_v55, -inf  ;;  %3525 = vst.msk [vmem:[#allocation2] sm:$0x1] %vm3393_vm0, %v3293_v55 }
 0x4ae   : > { %v6427_v56 = vsel %vm3294_vm6, 0.0, %v3293_v55 }
 0x4af   : > { %v6431_v21 = vrot.slane %v6427_v56, %v6274_v59 }
 0x4b1   : > { %v3305_v25 = vsub.f32 %v6329_v18, %v6431_v21  ;;  %v3306_v22 = vsub.f32 %v6333_v44, %v6431_v21  ;;  %v3307_v38 = vsub.f32 %v6337_v16, %v6431_v21  ;;  %v3308_v26 = vsub.f32 %v6351_v12, %v6431_v21 }
 0x4b2   : > { %v3309_v1 = vsub.f32 %v6341_v24, %v6431_v21  ;;  %v3310_v2 = vsub.f32 %v6345_v28, %v6431_v21  ;;  %v3311_v18 = vsub.f32 %v6355_v39, %v6431_v21  ;;  %v3314_v44 = vsub.f32 %v6365_v45, %v6431_v21 }
 0x4b3   : > { %v3321_v10 = vmul.f32 1.442695, %v3305_v25  ;;  %v3323_v42 = vmul.f32 1.442695, %v3306_v22  ;;  %v3325_v11 = vmul.f32 1.442695, %v3307_v38  ;;  %v3312_v24 = vsub.f32 %v6361_v58, %v6431_v21 }
 0x4b4   : > { %v3327_v57 = vmul.f32 1.442695, %v3308_v26  ;;  %v3329_v16 = vmul.f32 1.442695, %v3309_v1  ;;  %v3331_v12 = vmul.f32 1.442695, %v3310_v2  ;;  %v3313_v28 = vsub.f32 %v6375_v36, %v6431_v21 }
 0x4b5   : > { %4893 = vpow2.f32 %v3321_v10  ;;  %v3333_v6 = vmul.f32 1.442695, %v3311_v18  ;;  %v3316_v32 = vsub.f32 %v6385_v29, %v6431_v21  ;;  %v3339_v39 = vmul.f32 1.442695, %v3314_v44 }
 0x4b6   : > { %4895 = vpow2.f32 %v3323_v42  ;;  %v3335_v62 = vmul.f32 1.442695, %v3312_v24  ;;  %v3315_v45 = vsub.f32 %v6381_v41, %v6431_v21  ;;  %v3337_v63 = vmul.f32 1.442695, %v3313_v28 }
 0x4b7   : > { %4897 = vpow2.f32 %v3325_v11  ;;  %v3318_v58 = vsub.f32 %v6389_v3, %v6431_v21  ;;  %v3343_v19 = vmul.f32 1.442695, %v3316_v32  ;;  %v3317_v47 = vsub.f32 %v6401_v49, %v6431_v21 }
 0x4b8   : > { %4899 = vpow2.f32 %v3327_v57  ;;  %v3341_v5 = vmul.f32 1.442695, %v3315_v45  ;;  %v3320_v3 = vsub.f32 %v6419_v52, %v6431_v21  ;;  %v3319_v42 = vsub.f32 %v6411_v4, %v6431_v21 }
 0x4b9   : > { %4901 = vpow2.f32 %v3329_v16  ;;  %v3347_v55 = vmul.f32 1.442695, %v3318_v58  ;;  %v3345_v1 = vmul.f32 1.442695, %v3317_v47 }
 0x4ba   : > { %4903 = vpow2.f32 %v3331_v12  ;;  %v3351_v2 = vmul.f32 1.442695, %v3320_v3  ;;  %v3349_v12 = vmul.f32 1.442695, %v3319_v42 }
 0x4bb   : > { %4905 = vpow2.f32 %v3333_v6 }
 0x4bc   : > { %4907 = vpow2.f32 %v3339_v39 }
 0x4bd   : > { %4909 = vpow2.f32 %v3335_v62 }
 0x4be   : > { %4911 = vpow2.f32 %v3337_v63 }
 0x4bf   : > { %v4894_v31 = vpop.eup %4893  ;;  %4913 = vpow2.f32 %v3343_v19 }
 0x4c0   : > { %v4896_v36 = vpop.eup %4895  ;;  %v3355_v15 = vsel %vm3255_vm15, %v4894_v31, 0.0  ;;  %3408 = vperm.xlu0 %4643, %v4894_v31   ;;  %4915 = vpow2.f32 %v3341_v5 }
 0x4c1   : > { %v4898_v29 = vpop.eup %4897  ;;  %v3356_v41 = vsel %vm3255_vm15, %v4896_v36, 0.0  ;;  %3413 = vperm.xlu1 %4644, %v4896_v36   ;;  %4917 = vpow2.f32 %v3347_v55 }
 0x4c2   : > { %v4900_v35 = vpop.eup %4899  ;;  %v3357_v25 = vadd.f32 %v3356_v41, %v3355_v15  ;;  %v3358_v22 = vsel %vm3255_vm15, %v4898_v29, 0.0  ;;  %4919 = vpow2.f32 %v3345_v1  ;;  %v3296_v41 = vsub.f32 %v6423_v27, %v6427_v56 }
 0x4c3   : > { %v4902_v38 = vpop.eup %4901  ;;  %v3360_v49 = vsel %vm3255_vm15, %v4900_v35, 0.0  ;;  %4921 = vpow2.f32 %v3351_v2 }
 0x4c4   : > { %v3359_v26 = vadd.f32 %v3358_v22, %v3357_v25  ;;  %v4904_v10 = vpop.eup %4903  ;;  %v3362_v57 = vsel %vm3255_vm15, %v4902_v38, 0.0  ;;  %4923 = vpow2.f32 %v3349_v12 }
 0x4c5   : > { %3418 = vperm.xlu1 %4644, %v4898_v29   ;;  %v4906_v52 = vpop.eup %4905  ;;  %v3364_v16 = vsel %vm3255_vm15, %v4904_v10, 0.0 }
 0x4c6   : > { %v3361_v11 = vadd.f32 %v3360_v49, %v3359_v26  ;;  %v4908_v18 = vpop.eup %4907  ;;  %v3366_v4 = vsel %vm3255_vm15, %v4906_v52, 0.0 }
 0x4c7   : > { %3453 = vperm.xlu0 %4643, %v4908_v18   ;;  %v4910_v24 = vpop.eup %4909  ;;  %v3372_v31 = vsel %vm3255_vm15, %v4908_v18, 0.0  ;;  %v3353_v18 = vld [vmem:[#allocation3] sm:$0x1] }
 0x4c8   : > { %v3363_v44 = vadd.f32 %v3362_v57, %v3361_v11  ;;  %v4912_v6 = vpop.eup %4911  ;;  %v3368_v39 = vsel %vm3255_vm15, %v4910_v24, 0.0 }
 0x4c9   : > { %3423 = vperm.xlu1 %4644, %v4900_v35   ;;  %v4914_v21 = vpop.eup %4913  ;;  %v3370_v63 = vsel %vm3255_vm15, %v4912_v6, 0.0 }
 0x4ca   : > { %v3365_v28 = vadd.f32 %v3364_v16, %v3363_v44  ;;  %v4916_v45 = vpop.eup %4915  ;;  %v3376_v35 = vsel %vm3255_vm15, %v4914_v21, 0.0 }
 0x4cb   : > { %3463 = vperm.xlu0 %4643, %v4914_v21   ;;  %v4918_v58 = vpop.eup %4917  ;;  %v3374_v29 = vsel %vm3255_vm15, %v4916_v45, 0.0 }
 0x4cc   : > { %v3367_v32 = vadd.f32 %v3366_v4, %v3365_v28  ;;  %v4920_v15 = vpop.eup %4919  ;;  %v3380_v26 = vsel %vm3255_vm15, %v4918_v58, 0.0  ;;  %v2788_v4 = vsel %vm549_vm1, %v6099_v17, 0.0 }
 0x4cd   : > { %3428 = vperm.xlu1 %4644, %v4902_v38   ;;  %v4922_v47 = vpop.eup %4921  ;;  %v3378_v55 = vsel %vm3255_vm15, %v4920_v15, 0.0  ;;  %v3297_v38 = vmul.f32 1.442695, %v3296_v41 }
 0x4ce   : > { %v3369_v62 = vadd.f32 %v3368_v39, %v3367_v32  ;;  %v4924_v25 = vpop.eup %4923  ;;  %v3384_v27 = vsel %vm3255_vm15, %v4922_v47, 0.0 }
 0x4cf   : > { %3473 = vperm.xlu0 %4643, %v4918_v58   ;;  %v3382_v49 = vsel %vm3255_vm15, %v4924_v25, 0.0  ;;  %4925 = vpow2.f32 %v3297_v38 }
 0x4d0   : > { %v3371_v19 = vadd.f32 %v3370_v63, %v3369_v62 }
 0x4d1   : > { %3433 = vperm.xlu1 %4644, %v4904_v10  }
 0x4d2   : > { %v3373_v36 = vadd.f32 %v3372_v31, %v3371_v19 }
 0x4d3   : > { %3483 = vperm.xlu0 %4643, %v4922_v47  }
 0x4d4   : > { %v3375_v5 = vadd.f32 %v3374_v29, %v3373_v36 }
 0x4d5   : > { %3438 = vperm.xlu1 %4644, %v4906_v52  }
 0x4d6   : > { %v3377_v3 = vadd.f32 %v3376_v35, %v3375_v5 }
 0x4d8   : > { %v3379_v22 = vadd.f32 %v3378_v55, %v3377_v3 }
 0x4d9   : > { %3443 = vperm.xlu1 %4644, %v4910_v24   ;;  %v4926_v57 = vpop.eup %4925 }
 0x4da   : > { %v3381_v1 = vadd.f32 %v3380_v26, %v3379_v22  ;;  %v3354_v16 = vmul.f32 %v4926_v57, %v3353_v18  ;;  %v6698_v18 = vld [vmem:[#allocation39_spill] sm:$0xff] }
 0x4db   : > { %v2800_v7 = vsel %vm561_vm9, %v6698_v18, 0.0 }
 0x4dc   : > { %v3383_v10 = vadd.f32 %v3382_v49, %v3381_v1 }
 0x4dd   : > { %3448 = vperm.xlu1 %4644, %v4912_v6   ;;  %v2787_v6 = vsel %vm548_vm2, %v6094_v51, 0.0 }
 0x4de   : > { %v3385_v56 = vadd.f32 %v3384_v27, %v3383_v10  ;;  %v6692_v10 = vld [vmem:[#allocation35_spill] sm:$0xff]  ;;  %v6693_v27 = vld [vmem:[#allocation34_spill] sm:$0xff] }
 0x4df   : > { %vm6694_vm1 = vcmp.lt.s32.totalorder %v6693_v27, 200 }
 0x4e0   : > { %v3386_v42 = vrot.slane %v3385_v56, 4  ;;  %v2798_v9 = vsel %vm6694_vm1, %v6692_v10, 0.0 }
 0x4e1   : > { %3458 = vperm.xlu1 %4644, %v4916_v45   ;;  %v2789_v45 = vsel %vm550_vm5, %v6117_v54, 0.0 }
 0x4e2   : > { %v3387_v2 = vadd.f32 %v3386_v42, %v3385_v56 }
 0x4e4   : > { %v3388_v11 = vrot.slane %v3387_v2, 2 }
 0x4e5   : > { %3468 = vperm.xlu1 %4644, %v4920_v15  }
 0x4e6   : > { %v3389_v52 = vadd.f32 %v3388_v11, %v3387_v2  ;;  %v6695_v2 = vld [vmem:[#allocation38_spill] sm:$0xff]  ;;  %v6696_v11 = vld [vmem:[#allocation37_spill] sm:$0xff] }
 0x4e7   : > { %vm6697_vm2 = vcmp.lt.s32.totalorder %v6696_v11, 200 }
 0x4e8   : > { %v3390_v44 = vrot.slane %v3389_v52, 1  ;;  %v2799_v8 = vsel %vm6697_vm2, %v6695_v2, 0.0 }
 0x4e9   : > { %3478 = vperm.xlu1 %4644, %v4924_v25  }
 0x4ea   : > { %v3391_v24 = vadd.f32 %v3390_v44, %v3389_v52 }
 0x4ec   : > { %v3392_v12 = vadd.f32 %v3391_v24, %v3354_v16 }
 0x4ed   : > { %3398 = vperm.xlu1 %4644, %v4926_v57  }
 0x4ee   : > { %3394 = vst.msk [vmem:[#allocation3] sm:$0x1] %vm3393_vm0, %v3392_v12  ;;  %v6700_v12 = vld [vmem:[#allocation41_spill] sm:$0xff] }
 0x53f   : > { %v3409_v28 = vpop.permute.xlu0 %3408 }
 0x540   : > { %v3414_v21 = vpop.permute.xlu1 %3413  ;;  %v3486_v32 = vmul.f32 %v3409_v28, %v2787_v6  ;;  %v2801_v6 = vsel %vm562_vm12, %v6700_v12, 0.0 }
 0x541   : > { %v3487_v39 = vmul.f32 %v3414_v21, %v2788_v4 }
 0x543   : > { %v3502_v62 = vadd.f32 %v3487_v39, %v3486_v32  ;;  %v6702_v39 = vld [vmem:[#allocation42_spill] sm:$0xff] }
 0x544   : > { %v3419_v63 = vpop.permute.xlu1 %3418 }
 0x545   : > { %v3488_v58 = vmul.f32 %v3419_v63, %v2789_v45 }
 0x546   : > { %v3454_v35 = vpop.permute.xlu0 %3453 }
 0x547   : > { %v3503_v19 = vadd.f32 %v3502_v62, %v3488_v58  ;;  %v3495_v30 = vmul.f32 %v3454_v35, %v2796_v33  ;;  %v2802_v62 = vsel %vm6703_vm4, %v6702_v39, 0.0 }
 0x548   : > { %v3424_v51 = vpop.permute.xlu1 %3423 }
 0x549   : > { %v3489_v31 = vmul.f32 %v3424_v51, %v2790_v43 }
 0x54a   : > { %v3464_v37 = vpop.permute.xlu0 %3463 }
 0x54b   : > { %v3504_v36 = vadd.f32 %v3503_v19, %v3489_v31  ;;  %v3497_v56 = vmul.f32 %v3464_v37, %v2798_v9 }
 0x54c   : > { %v3429_v17 = vpop.permute.xlu1 %3428 }
 0x54d   : > { %v3490_v15 = vmul.f32 %v3429_v17, %v2791_v50  ;;  %v3395_v17 = vld [vmem:[#allocation4] sm:$0x1] }
 0x54e   : > { %v3474_v60 = vpop.permute.xlu0 %3473 }
 0x54f   : > { %v3505_v29 = vadd.f32 %v3504_v36, %v3490_v15  ;;  %v3499_v44 = vmul.f32 %v3474_v60, %v2800_v7 }
 0x550   : > { %v3434_v54 = vpop.permute.xlu1 %3433 }
 0x551   : > { %v3491_v47 = vmul.f32 %v3434_v54, %v2792_v23 }
 0x552   : > { %v3484_v24 = vpop.permute.xlu0 %3483 }
 0x553   : > { %v3506_v5 = vadd.f32 %v3505_v29, %v3491_v47  ;;  %v3501_v45 = vmul.f32 %v3484_v24, %v2802_v62  ;;  %v3532_v47 = vld [vmem:[#allocation3] sm:$0x1] (!%p3952_p2) }
 0x554   : > { %v3439_v34 = vpop.permute.xlu1 %3438  ;;  %3533 = vst.msk [vmem:[%s495_s11] sm:$0x1] (!%p3952_p2), %vm3393_vm0, %v3532_v47 }
 0x555   : > { %v3492_v41 = vmul.f32 %v3439_v34, %v2793_v14 }
 0x557   : > { %v3507_v3 = vadd.f32 %v3506_v5, %v3492_v41  ;;  %v3534_v5 = vld [vmem:[#allocation2] sm:$0x1] (!%p3952_p2) }
 0x558   : > { %v3444_v20 = vpop.permute.xlu1 %3443  ;;  %3535 = vst.msk [vmem:[%s500_s17] sm:$0x1] (!%p3952_p2), %vm3393_vm0, %v3534_v5 }
 0x559   : > { %v3493_v55 = vmul.f32 %v3444_v20, %v2794_v40 }
 0x55b   : > { %v3508_v25 = vadd.f32 %v3507_v3, %v3493_v55 }
 0x55c   : > { %v3449_v22 = vpop.permute.xlu1 %3448 }
 0x55d   : > { %v3494_v38 = vmul.f32 %v3449_v22, %v2795_v48 }
 0x55f   : > { %v3509_v26 = vadd.f32 %v3508_v25, %v3494_v38 }
 0x560   : > { %v3459_v46 = vpop.permute.xlu1 %3458 }
 0x561   : > { %v3496_v1 = vmul.f32 %v3459_v46, %v2797_v53  ;;  %v3510_v49 = vadd.f32 %v3509_v26, %v3495_v30 }
 0x563   : > { %v3511_v42 = vadd.f32 %v3510_v49, %v3496_v1 }
 0x564   : > { %v3469_v13 = vpop.permute.xlu1 %3468 }
 0x565   : > { %v3498_v52 = vmul.f32 %v3469_v13, %v2799_v8  ;;  %v3512_v57 = vadd.f32 %v3511_v42, %v3497_v56 }
 0x567   : > { %v3513_v16 = vadd.f32 %v3512_v57, %v3498_v52 }
 0x568   : > { %v3479_v4 = vpop.permute.xlu1 %3478 }
 0x569   : > { %v3500_v21 = vmul.f32 %v3479_v4, %v2801_v6  ;;  %v3514_v32 = vadd.f32 %v3513_v16, %v3499_v44 }
 0x56b   : > { %v3515_v63 = vadd.f32 %v3514_v32, %v3500_v21 }
 0x56c   : > { %v3399_v51 = vpop.permute.xlu1 %3398 }
 0x56d   : > { %v3516_v58 = vadd.f32 %v3515_v63, %v3501_v45  ;;  %v3404_v36 = vrot.slane %v3399_v51, %v6274_v59 }
 0x56f   : > { %v3517_v19 = vrot.slane %v3516_v58, 4  ;;  %v3405_v29 = vmul.f32 %v3404_v36, %v3395_v17 }
 0x571   : > { %v3518_v43 = vadd.f32 %v3517_v19, %v3516_v58 }
 0x573   : > { %v3519_v31 = vrot.slane %v3518_v43, 2 }
 0x575   : > { %v3520_v50 = vadd.f32 %v3519_v31, %v3518_v43 }
 0x577   : > { %v3521_v15 = vrot.slane %v3520_v50, 1  ;;  %3529 = sbr.rel (%p3952_p2) target bundleno = 1414 (0x586), region = 80 }
 0x579   : > { %v3522_v23 = vadd.f32 %v3521_v15, %v3520_v50 }
 0x57b   : > { %v3523_v54 = vadd.f32 %v3522_v23, %v3405_v29 }
 0x57d   : > { %3524 = vst [vmem:[#allocation4] sm:$0x1] %v3523_v54 }
 0x584   : > { %v3530_v0 = vld [vmem:[#allocation4] sm:$0x1] }
 0x585   : > { %3531 = vst [vmem:[%s5624_s10] sm:$0x1] %v3530_v0 }
 0x586 PF: > { %s6706_s26 = sld [smem:[#allocation26_spill]]  ;;  %s6707_s7 = sld [smem:[#allocation32_spill]] }
 0x587   : > { %s6708_s8 = sld [smem:[#allocation44_spill]]  ;;  %s3558_s18 = sshll.u32 %s5624_s10, 4  ;;  %s3559_s18 = int_to_ptr.vmem [resolvable:$true] %s3558_s18 }
 0x588   : > { %s3537_s11 = scalar_lea.sflag [#allocation8], %s467_s25  ;;  %s5095_s1 = scalar_lea.vmem %s3559_s18, 16 }
 0x589   : > { %p5096_p4 = scmp.ne.s32.totalorder %s3559_s18, %s5095_s1  ;;  %s5246_s22 = smov [#allocation17]  }
 0x58a   : > { %s5099_s17 = sshll.u32 %s5246_s22, 4  ;;  %s5100_s17 = int_to_ptr.vmem [resolvable:$false] %s5099_s17 }
 0x58b   : > { %s5101_s29 = scalar_lea.vmem %s5100_s17, 32  ;;  %p5102_p13 = scmp.lt.s32.totalorder %s3559_s18, %s5100_s17 }
 0x58c   : > { %s3953_s27 = sshll.u32 %s6706_s26, 4  ;;  %p6709_p9 = scmp.ne.s32.totalorder %s6707_s7, 0 }
 0x58d   : > { %s6551_s9 = scalar_lea.hbm %s6708_s8, %s3953_s27  ;;  %p5103_p7 = scmp.lt.s32.totalorder %s5101_s29, %s5095_s1 }
 0x58e   : > { %p5097_p5 = pnand %p5096_p4, %p6709_p9 }
 0x58f   : > { %p5104_p11 = por %p5103_p7, %p5102_p13 }
 0x590   : > { %p5098_p8 = pneg %p5097_p5 }
 0x592   : > { %p5105_p6 = pnand %p5104_p11, %p5098_p8 }
 0x594   : > { %5108 = shalt.err (!%p5105_p6)
}
 0x595   : > { %s5109_s25 = scalar_lea.hbm %s6551_s9, 16  ;;  %s5113_s13 = scalar_lea.hbm %s6708_s8, 32 }
 0x596   : > { %p5110_p3 = scmp.ne.s32.totalorder %s6551_s9, %s5109_s25  ;;  %p5114_p10 = scmp.lt.u32.totalorder %s6551_s9, %s6708_s8 }
 0x597   : > { %p5115_p1 = scmp.lt.u32.totalorder %s5113_s13, %s5109_s25  ;;  %p5117_p4 = scmp.lt.u32.totalorder %s5109_s25, %s6551_s9 }
 0x598   : > { %p5111_p12 = pnand %p5110_p3, %p6709_p9 }
 0x599   : > { %p5116_p2 = por %p5115_p1, %p5114_p10 }
 0x59a   : > { %p5112_p0 = pneg %p5111_p12 }
 0x59b   : > { %p5118_p5 = por %p5117_p4, %p5116_p2 }
 0x59d   : > { %p5119_p8 = pnand %p5118_p5, %p5112_p0 }
 0x59f   : > { %5122 = shalt.err (!%p5119_p8)
}
 0x5a0   : > { %4508 = dma.vmem_to_hbm [thread:$0]  (%p6709_p9), %s3559_s18, 16, %s6551_s9, %s3537_s11  }
 0x5a1 PF: > { %s6710_s6 = sld [smem:[#allocation23_spill]]  ;;  %s6711_s23 = sld [smem:[#allocation33_spill]] }
 0x5a2   : > { %p4540_p13 = scmp.ge.s32.totalorder %s5229_s20, 2 }
 0x5a7   : > { %s3578_s26 = sand.u32 1, %s6710_s6   ;;  %p6712_p7 = scmp.ne.s32.totalorder %s6711_s23, 0 }
 0x5a8   : > { %s3579_s27 = scalar_lea.sflag [#allocation8], %s3578_s26 }
 0x5a9   : > { %p4527_p11 = pnand %p4540_p13, %p6712_p7 }
 0x5ab   : > { %5184 = dma.done.wait (!%p4527_p11), %s3579_s27, 16  }
 0x5ac   : > { %5186 = vsyncadd (!%p4527_p11), %s3579_s27, 4294967280  ;;  %s31_s20 = sadd.s32 1, %s5229_s20   ;;  %s6713_s14 = sld [smem:[#allocation24_spill]] }
 0x5ad   : > { %p28_p6 = scmp.ge.s32.totalorder %s31_s20, 6   ;;  %s6714_s13 = sld [smem:[#allocation31_spill]] }
 0x5ae   : > { %s6715_s7 = sld [smem:[#allocation30_spill]]  ;;  %s6716_s6 = sld [smem:[#allocation27_spill]] }
 0x5af   : > { %s6717_s18 = sld [smem:[#allocation28_spill]]  ;;  %s6718_s24 = sld [smem:[#allocation29_spill]] }
 0x5b0   : > { %s6719_s11 = smov %s5193_s12  ;;  %s6724_s17 = smov %s5225_s19 }
 0x5b1   :  { %30 = sbr.rel (!%p28_p6) target bundleno = 17 (0x11), region = 145 }
 0x5b2   : > { %s6720_s12 = smov %s6713_s14  ;;  %s6721_s14 = smov %s5205_s15 }
 0x5b3   : > { %s6722_s15 = smov %s5209_s16 }
 0x5b4   : > { %s6723_s16 = smov %s6715_s7 }
 0x5b5   : > { %s6725_s19 = smov %s6718_s24 }
 0x5b8   :  { %3597 = vsyncpa [#allocation7], 1 }
 0x5b9   :  { %3599 = vsyncpa [#allocation7 + $0x1], 1 }
 0x5ba   :  { %3600 = vsyncpa [#allocation10], 1 }
 0x5bb   :  { %3601 = vsyncpa [#allocation13], 1 }
 0x5bc   :  { %3602 = vsyncpa [#allocation16], 1 }
 0x5bd   :  { %3603 = vsyncpa [#allocation8], 1 }
 0x5be   :  { %3605 = vsyncpa [#allocation8 + $0x1], 1 }

</bundles_post_ra>
